<compile_context>
chip_gen: v5e
topology: v5e:2x2
jax: 0.10.0
libtpu: 0.0.40
codegen_flags: <defaults>
</compile_context>

<pallas_src>
import jax
import jax.numpy as jnp
from jax import lax
from jax.experimental import pallas as pl
from jax.experimental.pallas import tpu as pltpu

EPS = 1e-5
LANE = 128


def _round_up(x, m):
    return (x + m - 1) // m * m


def _bottleneck_kernel(x_ref, w1_ref, b1_ref, w2_ref, b2_ref, w3_ref, b3_ref,
                       out_ref, pad_ref, im2col_ref):
    """One (batch n, row-tile t) step.

    x_ref     : (1, 1, H_tile+2, W, Cp) f32   input slab incl. 1-row halo
    w1_ref    : (Cp,   Cw)              bf16  conv1 weight (BN1 scale folded)
    b1_ref    : (1,    Cw)              f32   BN1 shift
    w2_ref    : (9*Cw, Cw)              bf16  conv2 weights, taps stacked on K
    b2_ref    : (1,    Cw)              f32   BN2 shift
    w3_ref    : (Cw,   Cp)              bf16  conv3 weight (BN3 scale folded)
    b3_ref    : (1,    Cp)              f32   BN3 shift
    out_ref   : (1, H_tile, W, Cp)      f32
    pad_ref   : (H_tile+2, Wp2, Cw)     bf16  h1 with 1-px zero halo
    im2col_ref: (H_tile*W, 9*Cw)        bf16  fused conv2 operand
    """
    rows, Wp2, Cw = pad_ref.shape          # rows = H_tile + 2
    H_tile = rows - 2
    W = x_ref.shape[3]
    Cp = w3_ref.shape[1]

    t = pl.program_id(1)
    nt = pl.num_programs(1)

    # ---- conv1 (1x1) + BN1 shift + ReLU on the H_tile+2 halo rows ---------
    xb = x_ref[...].reshape(rows * W, Cp).astype(jnp.bfloat16)
    h1 = jnp.dot(xb, w1_ref[...], preferred_element_type=jnp.float32)
    h1 = jnp.maximum(h1 + b1_ref[...], 0.0)
    pad_ref[:, 1:W + 1, :] = h1.reshape(rows, W, Cw).astype(jnp.bfloat16)

    # Zero only the 1-px halo: left/right columns always; top/bottom halo
    # rows only when this tile touches the image border (conv2 zero padding).
    pad_ref[:, 0:1, :] = jnp.zeros((rows, 1, Cw), jnp.bfloat16)
    pad_ref[:, W + 1:W + 2, :] = jnp.zeros((rows, 1, Cw), jnp.bfloat16)

    @pl.when(t == 0)
    def _():
        pad_ref[0:1, :, :] = jnp.zeros((1, Wp2, Cw), jnp.bfloat16)

    @pl.when(t == nt - 1)
    def _():
        pad_ref[H_tile + 1:H_tile + 2, :, :] = jnp.zeros((1, Wp2, Cw), jnp.bfloat16)

    # ---- conv2 (3x3, pad=1) as one big-K matmul via im2col -----------------
    for kh in range(3):
        for kw in range(3):
            k = kh * 3 + kw
            win = pad_ref[kh:kh + H_tile, kw:kw + W, :].reshape(H_tile * W, Cw)
            im2col_ref[:, k * Cw:(k + 1) * Cw] = win

    acc = jnp.dot(im2col_ref[...], w2_ref[...],
                  preferred_element_type=jnp.float32)        # (H_tile*W, Cw)

    # ---- BN2 shift + ReLU ---------------------------------------------------
    h2 = jnp.maximum(acc + b2_ref[...], 0.0).astype(jnp.bfloat16)

    # ---- conv3 (1x1) + BN3 shift -------------------------------------------
    h3 = jnp.dot(h2, w3_ref[...], preferred_element_type=jnp.float32) + b3_ref[...]

    # ---- residual add (reload identity interior rows, f32 exact) + ReLU -----
    ident = x_ref[...].reshape(rows, W, Cp)[1:H_tile + 1].reshape(H_tile * W, Cp)
    out = jnp.maximum(h3 + ident, 0.0)
    out_ref[...] = out.reshape(1, H_tile, W, Cp)


def _fold_bn(gamma, beta, mean, var):
    scale = gamma / jnp.sqrt(var + EPS)
    shift = beta - mean * scale
    return scale.astype(jnp.float32), shift.astype(jnp.float32)


def bottleneck_forward(x_nchw, params, tag='clean', h_tile=8):
    """x_nchw: (N, Cin, H, W) float32. Returns (N, Cout, H, W)."""
    x = jnp.transpose(x_nchw, (0, 2, 3, 1)).astype(jnp.float32)   # NHWC
    N, H, W, Cin = x.shape

    w1_t = params['conv1_w']                  # (width, Cin, 1, 1)
    w2_t = params['conv2_w']                  # (width, width, 3, 3)
    w3_t = params['conv3_w']                  # (Cout, width, 1, 1)
    width = w1_t.shape[0]
    Cout = w3_t.shape[0]
    assert Cin == Cout, "identity residual requires inplanes == planes*expansion"
    # TODO(synk): stride>1 / groups>1 / dilation>1 and the downsample branch
    # are not implemented (module defaults leave them disabled).

    bn = params[f'{tag}_bn']
    s1, b1 = _fold_bn(*bn['bn1'])
    s2, b2 = _fold_bn(*bn['bn2'])
    s3, b3 = _fold_bn(*bn['bn3'])

    Cp = _round_up(Cin, LANE)        # lane-dense in/out channels
    Cw = _round_up(width, LANE)      # lane-dense bottleneck width

    # Matmul-form weights (in, out), BN scale folded into output columns,
    # zero-padded to lane-dense shapes, cast to bf16 for the MXU.
    w1 = jnp.zeros((Cp, Cw), jnp.float32).at[:Cin, :width].set(
        (w1_t[:, :, 0, 0] * s1[:, None]).T).astype(jnp.bfloat16)
    w3 = jnp.zeros((Cw, Cp), jnp.float32).at[:width, :Cout].set(
        (w3_t[:, :, 0, 0] * s3[:, None]).T).astype(jnp.bfloat16)
    w2_taps = []
    for kh in range(3):
        for kw in range(3):
            blk = jnp.zeros((Cw, Cw), jnp.float32).at[:width, :width].set(
                (w2_t[:, :, kh, kw] * s2[:, None]).T)
            w2_taps.append(blk)
    w2 = jnp.concatenate(w2_taps, axis=0).astype(jnp.bfloat16)     # (9*Cw, Cw)

    b1p = jnp.zeros((1, Cw), jnp.float32).at[0, :width].set(b1)
    b2p = jnp.zeros((1, Cw), jnp.float32).at[0, :width].set(b2)
    b3p = jnp.zeros((1, Cp), jnp.float32).at[0, :Cout].set(b3)

    # Row tiling: each grid step processes H_tile rows plus a 1-row halo.
    H_tile = h_tile if H % h_tile == 0 else H
    nt = H // H_tile

    # Zero-pad H halo + channels, then materialize overlapping row slabs.
    x_p = jnp.pad(x, ((0, 0), (1, 1), (0, 0), (0, Cp - Cin)))
    slabs = jnp.stack(
        [x_p[:, t * H_tile:t * H_tile + H_tile + 2] for t in range(nt)],
        axis=1)                                   # (N, nt, H_tile+2, W, Cp)

    Wp2 = _round_up(W + 2, 8)                     # sublane-padded scratch width

    out = pl.pallas_call(
        _bottleneck_kernel,
        out_shape=jax.ShapeDtypeStruct((N, H, W, Cp), jnp.float32),
        grid=(N, nt),
        in_specs=[
            pl.BlockSpec((1, 1, H_tile + 2, W, Cp), lambda n, t: (n, t, 0, 0, 0)),
            pl.BlockSpec((Cp, Cw), lambda n, t: (0, 0)),
            pl.BlockSpec((1, Cw), lambda n, t: (0, 0)),
            pl.BlockSpec((9 * Cw, Cw), lambda n, t: (0, 0)),
            pl.BlockSpec((1, Cw), lambda n, t: (0, 0)),
            pl.BlockSpec((Cw, Cp), lambda n, t: (0, 0)),
            pl.BlockSpec((1, Cp), lambda n, t: (0, 0)),
        ],
        out_specs=pl.BlockSpec((1, H_tile, W, Cp), lambda n, t: (n, t, 0, 0)),
        scratch_shapes=[
            pltpu.VMEM((H_tile + 2, Wp2, Cw), jnp.bfloat16),    # padded h1
            pltpu.VMEM((H_tile * W, 9 * Cw), jnp.bfloat16),     # im2col slab
        ],
        compiler_params=pltpu.CompilerParams(
            dimension_semantics=("parallel", "parallel"),
            vmem_limit_bytes=48 * 1024 * 1024),
    )(slabs, w1, b1p, w2, b2p, w3, b3p)

    out = out[:, :, :, :Cout]
    return jnp.transpose(out, (0, 3, 1, 2))       # back to NCHW


# ---------------------------- pure-JAX reference ----------------------------
def _ref_bn(y, gamma, beta, mean, var):
    inv = gamma / jnp.sqrt(var + EPS)
    return (y - mean[None, :, None, None]) * inv[None, :, None, None] \
        + beta[None, :, None, None]


def bottleneck_ref(x, params, tag='clean'):
    bn = params[f'{tag}_bn']
    dn = ('NCHW', 'OIHW', 'NCHW')
    y = lax.conv_general_dilated(x, params['conv1_w'], (1, 1), 'VALID',
                                 dimension_numbers=dn)
    y = jax.nn.relu(_ref_bn(y, *bn['bn1']))
    y = lax.conv_general_dilated(y, params['conv2_w'], (1, 1),
                                 ((1, 1), (1, 1)), dimension_numbers=dn)
    y = jax.nn.relu(_ref_bn(y, *bn['bn2']))
    y = lax.conv_general_dilated(y, params['conv3_w'], (1, 1), 'VALID',
                                 dimension_numbers=dn)
    y = _ref_bn(y, *bn['bn3'])
    return jax.nn.relu(y + x)


# ------------------------------- param init ---------------------------------
def init_params(key, inplanes, planes, base_width=64, groups=1):
    expansion = 4
    width = int(planes * (base_width / 64.0)) * groups
    out_ch = planes * expansion
    keys = jax.random.split(key, 16)

    def bn_set(k, c):
        k1, k2, k3, k4 = jax.random.split(k, 4)
        gamma = 1.0 + 0.1 * jax.random.normal(k1, (c,), jnp.float32)
        beta = 0.1 * jax.random.normal(k2, (c,), jnp.float32)
        mean = 0.1 * jax.random.normal(k3, (c,), jnp.float32)
        var = jnp.abs(jax.random.normal(k4, (c,), jnp.float32)) + 0.5
        return (gamma, beta, mean, var)

    return {
        'conv1_w': 0.2 * jax.random.normal(keys[0], (width, inplanes, 1, 1), jnp.float32),
        'conv2_w': 0.2 * jax.random.normal(keys[1], (width, width, 3, 3), jnp.float32),
        'conv3_w': 0.2 * jax.random.normal(keys[2], (out_ch, width, 1, 1), jnp.float32),
        'clean_bn': {'bn1': bn_set(keys[3], width),
                     'bn2': bn_set(keys[4], width),
                     'bn3': bn_set(keys[5], out_ch)},
        'adv_bn': {'bn1': bn_set(keys[6], width),
                   'bn2': bn_set(keys[7], width),
                   'bn3': bn_set(keys[8], out_ch)},
    }


if __name__ == "__main__":
    key = jax.random.PRNGKey(0)
    kx, kp = jax.random.split(key)

    # inplanes == planes * expansion so the identity add is valid
    # (module default downsample=None).
    N, inplanes, planes, H, W = 2, 16, 4, 16, 16
    x = jax.random.normal(kx, (N, inplanes, H, W), jnp.float32)
    params = init_params(kp, inplanes, planes)

    out_clean = jax.block_until_ready(bottleneck_forward(x, params, tag='clean'))
    out_adv = jax.block_until_ready(bottleneck_forward(x, params, tag='adv'))

    ref_clean = bottleneck_ref(x, params, tag='clean')
    ref_adv = bottleneck_ref(x, params, tag='adv')

    assert out_clean.shape == (N, planes * 4, H, W)
    # bf16 MXU inputs with f32 accumulation -> bf16-level tolerance vs f32 ref.
    assert jnp.allclose(out_clean, ref_clean, atol=5e-2, rtol=5e-2), \
        float(jnp.max(jnp.abs(out_clean - ref_clean)))
    assert jnp.allclose(out_adv, ref_adv, atol=5e-2, rtol=5e-2), \
        float(jnp.max(jnp.abs(out_adv - ref_adv)))

    print("KERNEL_OK")
</pallas_src>

<mosaic_0001>
module attributes {stable_mosaic.version = 11 : i64} {
  func.func @_bottleneck_kernel(%arg0: i32, %arg1: i32, %arg2: memref<1x1x10x16x128xf32, #tpu.memory_space<vmem>>, %arg3: memref<128x128xbf16, #tpu.memory_space<vmem>>, %arg4: memref<1x128xf32, #tpu.memory_space<vmem>>, %arg5: memref<1152x128xbf16, #tpu.memory_space<vmem>>, %arg6: memref<1x128xf32, #tpu.memory_space<vmem>>, %arg7: memref<128x128xbf16, #tpu.memory_space<vmem>>, %arg8: memref<1x128xf32, #tpu.memory_space<vmem>>, %arg9: memref<1x8x16x128xf32, #tpu.memory_space<vmem>>, %arg10: memref<10x24x128xbf16, #tpu.memory_space<vmem>>, %arg11: memref<128x1152xbf16, #tpu.memory_space<vmem>>) attributes {dimension_semantics = [#tpu.dimension_semantics<parallel>, #tpu.dimension_semantics<parallel>], iteration_bounds = array<i64: 2, 2>, scalar_prefetch = 0 : i64, scratch_operands = 2 : i64, tpu.core_type = #tpu.core_type<tc>, window_params = [{transform_indices = @transform_0, window_bounds = array<i64: 1, 1, 10, 16, 128>}, {pipeline_mode = #tpu.pipeline_mode<synchronous>, transform_indices = @transform_1, window_bounds = array<i64: 128, 128>}, {pipeline_mode = #tpu.pipeline_mode<synchronous>, transform_indices = @transform_2, window_bounds = array<i64: 1, 128>}, {pipeline_mode = #tpu.pipeline_mode<synchronous>, transform_indices = @transform_3, window_bounds = array<i64: 1152, 128>}, {pipeline_mode = #tpu.pipeline_mode<synchronous>, transform_indices = @transform_4, window_bounds = array<i64: 1, 128>}, {pipeline_mode = #tpu.pipeline_mode<synchronous>, transform_indices = @transform_5, window_bounds = array<i64: 128, 128>}, {pipeline_mode = #tpu.pipeline_mode<synchronous>, transform_indices = @transform_6, window_bounds = array<i64: 1, 128>}, {transform_indices = @transform_7, window_bounds = array<i64: 1, 8, 16, 128>}]} {
    %c0 = arith.constant 0 : index
    %c0_0 = arith.constant 0 : index
    %c0_1 = arith.constant 0 : index
    %c0_2 = arith.constant 0 : index
    %c0_3 = arith.constant 0 : index
    %0 = vector.load %arg2[%c0, %c0_0, %c0_1, %c0_2, %c0_3] : memref<1x1x10x16x128xf32, #tpu.memory_space<vmem>>, vector<1x1x10x16x128xf32>
    %1 = vector.shape_cast %0 : vector<1x1x10x16x128xf32> to vector<160x128xf32>
    %2 = arith.truncf %1 : vector<160x128xf32> to vector<160x128xbf16>
    %c0_4 = arith.constant 0 : index
    %c0_5 = arith.constant 0 : index
    %3 = vector.load %arg3[%c0_4, %c0_5] : memref<128x128xbf16, #tpu.memory_space<vmem>>, vector<128x128xbf16>
    %cst = arith.constant dense<0.000000e+00> : vector<160x128xf32>
    %4 = tpu.matmul %2, %3, %cst {dimension_numbers = #tpu.dot_dimension_numbers<[1], [0], [0], [1], [0, 0, 1, 1], [], []>} : vector<160x128xbf16>, vector<128x128xbf16>, vector<160x128xf32> -> vector<160x128xf32>
    %c0_6 = arith.constant 0 : index
    %c0_7 = arith.constant 0 : index
    %5 = vector.load %arg4[%c0_6, %c0_7] : memref<1x128xf32, #tpu.memory_space<vmem>>, vector<1x128xf32>
    %6 = vector.broadcast %5 : vector<1x128xf32> to vector<160x128xf32>
    %7 = arith.addf %4, %6 : vector<160x128xf32>
    %cst_8 = arith.constant 0.000000e+00 : f32
    %8 = vector.broadcast %cst_8 : f32 to vector<160x128xf32>
    %9 = arith.maximumf %7, %8 : vector<160x128xf32>
    %10 = vector.shape_cast %9 : vector<160x128xf32> to vector<10x16x128xf32>
    %11 = arith.truncf %10 : vector<10x16x128xf32> to vector<10x16x128xbf16>
    %c0_9 = arith.constant 0 : index
    %c1 = arith.constant 1 : index
    %c0_10 = arith.constant 0 : index
    %12 = vector.load %arg10[%c0_9, %c1, %c0_10] : memref<10x24x128xbf16, #tpu.memory_space<vmem>>, vector<10x16x128xbf16>
    tpu.vector_store %arg10[%c0_9, %c1, %c0_10], %11 {strides = array<i32>} : memref<10x24x128xbf16, #tpu.memory_space<vmem>>, vector<10x16x128xbf16>,
    %cst_11 = arith.constant 0.000000e+00 : bf16
    %13 = vector.broadcast %cst_11 : bf16 to vector<10x1x128xbf16>
    %c0_12 = arith.constant 0 : index
    %c0_13 = arith.constant 0 : index
    %c0_14 = arith.constant 0 : index
    %14 = vector.load %arg10[%c0_12, %c0_13, %c0_14] : memref<10x24x128xbf16, #tpu.memory_space<vmem>>, vector<10x1x128xbf16>
    tpu.vector_store %arg10[%c0_12, %c0_13, %c0_14], %13 {strides = array<i32>} : memref<10x24x128xbf16, #tpu.memory_space<vmem>>, vector<10x1x128xbf16>,
    %cst_15 = arith.constant 0.000000e+00 : bf16
    %15 = vector.broadcast %cst_15 : bf16 to vector<10x1x128xbf16>
    %c0_16 = arith.constant 0 : index
    %c17 = arith.constant 17 : index
    %c0_17 = arith.constant 0 : index
    %16 = vector.load %arg10[%c0_16, %c17, %c0_17] : memref<10x24x128xbf16, #tpu.memory_space<vmem>>, vector<10x1x128xbf16>
    tpu.vector_store %arg10[%c0_16, %c17, %c0_17], %15 {strides = array<i32>} : memref<10x24x128xbf16, #tpu.memory_space<vmem>>, vector<10x1x128xbf16>,
    %c0_i32 = arith.constant 0 : i32
    %17 = arith.cmpi eq, %arg1, %c0_i32 : i32
    %18 = arith.extui %17 : i1 to i32
    %c0_i32_18 = arith.constant 0 : i32
    %19 = arith.cmpi ne, %18, %c0_i32_18 : i32
    scf.if %19 {
      %cst_79 = arith.constant 0.000000e+00 : bf16
      %73 = vector.broadcast %cst_79 : bf16 to vector<1x24x128xbf16>
      %c0_80 = arith.constant 0 : index
      %c0_81 = arith.constant 0 : index
      %c0_82 = arith.constant 0 : index
      %74 = vector.load %arg10[%c0_80, %c0_81, %c0_82] : memref<10x24x128xbf16, #tpu.memory_space<vmem>>, vector<1x24x128xbf16>
      tpu.vector_store %arg10[%c0_80, %c0_81, %c0_82], %73 {strides = array<i32>} : memref<10x24x128xbf16, #tpu.memory_space<vmem>>, vector<1x24x128xbf16>,
    } else {
    }
    %c1_i32 = arith.constant 1 : i32
    %20 = arith.cmpi eq, %arg1, %c1_i32 : i32
    %21 = arith.extui %20 : i1 to i32
    %c0_i32_19 = arith.constant 0 : i32
    %22 = arith.cmpi ne, %21, %c0_i32_19 : i32
    scf.if %22 {
      %cst_79 = arith.constant 0.000000e+00 : bf16
      %73 = vector.broadcast %cst_79 : bf16 to vector<1x24x128xbf16>
      %c9 = arith.constant 9 : index
      %c0_80 = arith.constant 0 : index
      %c0_81 = arith.constant 0 : index
      %74 = vector.load %arg10[%c9, %c0_80, %c0_81] : memref<10x24x128xbf16, #tpu.memory_space<vmem>>, vector<1x24x128xbf16>
      tpu.vector_store %arg10[%c9, %c0_80, %c0_81], %73 {strides = array<i32>} : memref<10x24x128xbf16, #tpu.memory_space<vmem>>, vector<1x24x128xbf16>,
    } else {
    }
    %c0_20 = arith.constant 0 : index
    %c0_21 = arith.constant 0 : index
    %c0_22 = arith.constant 0 : index
    %23 = vector.load %arg10[%c0_20, %c0_21, %c0_22] : memref<10x24x128xbf16, #tpu.memory_space<vmem>>, vector<8x16x128xbf16>
    %24 = vector.shape_cast %23 : vector<8x16x128xbf16> to vector<128x128xbf16>
    %c0_23 = arith.constant 0 : index
    %c0_24 = arith.constant 0 : index
    %25 = vector.load %arg11[%c0_23, %c0_24] : memref<128x1152xbf16, #tpu.memory_space<vmem>>, vector<128x128xbf16>
    tpu.vector_store %arg11[%c0_23, %c0_24], %24 {strides = array<i32>} : memref<128x1152xbf16, #tpu.memory_space<vmem>>, vector<128x128xbf16>,
    %c0_25 = arith.constant 0 : index
    %c1_26 = arith.constant 1 : index
    %c0_27 = arith.constant 0 : index
    %26 = vector.load %arg10[%c0_25, %c1_26, %c0_27] : memref<10x24x128xbf16, #tpu.memory_space<vmem>>, vector<8x16x128xbf16>
    %27 = vector.shape_cast %26 : vector<8x16x128xbf16> to vector<128x128xbf16>
    %c0_28 = arith.constant 0 : index
    %c128 = arith.constant 128 : index
    %28 = vector.load %arg11[%c0_28, %c128] : memref<128x1152xbf16, #tpu.memory_space<vmem>>, vector<128x128xbf16>
    tpu.vector_store %arg11[%c0_28, %c128], %27 {strides = array<i32>} : memref<128x1152xbf16, #tpu.memory_space<vmem>>, vector<128x128xbf16>,
    %c0_29 = arith.constant 0 : index
    %c2 = arith.constant 2 : index
    %c0_30 = arith.constant 0 : index
    %29 = vector.load %arg10[%c0_29, %c2, %c0_30] : memref<10x24x128xbf16, #tpu.memory_space<vmem>>, vector<8x16x128xbf16>
    %30 = vector.shape_cast %29 : vector<8x16x128xbf16> to vector<128x128xbf16>
    %c0_31 = arith.constant 0 : index
    %c256 = arith.constant 256 : index
    %31 = vector.load %arg11[%c0_31, %c256] : memref<128x1152xbf16, #tpu.memory_space<vmem>>, vector<128x128xbf16>
    tpu.vector_store %arg11[%c0_31, %c256], %30 {strides = array<i32>} : memref<128x1152xbf16, #tpu.memory_space<vmem>>, vector<128x128xbf16>,
    %c1_32 = arith.constant 1 : index
    %c0_33 = arith.constant 0 : index
    %c0_34 = arith.constant 0 : index
    %32 = vector.load %arg10[%c1_32, %c0_33, %c0_34] : memref<10x24x128xbf16, #tpu.memory_space<vmem>>, vector<8x16x128xbf16>
    %33 = vector.shape_cast %32 : vector<8x16x128xbf16> to vector<128x128xbf16>
    %c0_35 = arith.constant 0 : index
    %c384 = arith.constant 384 : index
    %34 = vector.load %arg11[%c0_35, %c384] : memref<128x1152xbf16, #tpu.memory_space<vmem>>, vector<128x128xbf16>
    tpu.vector_store %arg11[%c0_35, %c384], %33 {strides = array<i32>} : memref<128x1152xbf16, #tpu.memory_space<vmem>>, vector<128x128xbf16>,
    %c1_36 = arith.constant 1 : index
    %c1_37 = arith.constant 1 : index
    %c0_38 = arith.constant 0 : index
    %35 = vector.load %arg10[%c1_36, %c1_37, %c0_38] : memref<10x24x128xbf16, #tpu.memory_space<vmem>>, vector<8x16x128xbf16>
    %36 = vector.shape_cast %35 : vector<8x16x128xbf16> to vector<128x128xbf16>
    %c0_39 = arith.constant 0 : index
    %c512 = arith.constant 512 : index
    %37 = vector.load %arg11[%c0_39, %c512] : memref<128x1152xbf16, #tpu.memory_space<vmem>>, vector<128x128xbf16>
    tpu.vector_store %arg11[%c0_39, %c512], %36 {strides = array<i32>} : memref<128x1152xbf16, #tpu.memory_space<vmem>>, vector<128x128xbf16>,
    %c1_40 = arith.constant 1 : index
    %c2_41 = arith.constant 2 : index
    %c0_42 = arith.constant 0 : index
    %38 = vector.load %arg10[%c1_40, %c2_41, %c0_42] : memref<10x24x128xbf16, #tpu.memory_space<vmem>>, vector<8x16x128xbf16>
    %39 = vector.shape_cast %38 : vector<8x16x128xbf16> to vector<128x128xbf16>
    %c0_43 = arith.constant 0 : index
    %c640 = arith.constant 640 : index
    %40 = vector.load %arg11[%c0_43, %c640] : memref<128x1152xbf16, #tpu.memory_space<vmem>>, vector<128x128xbf16>
    tpu.vector_store %arg11[%c0_43, %c640], %39 {strides = array<i32>} : memref<128x1152xbf16, #tpu.memory_space<vmem>>, vector<128x128xbf16>,
    %c2_44 = arith.constant 2 : index
    %c0_45 = arith.constant 0 : index
    %c0_46 = arith.constant 0 : index
    %41 = vector.load %arg10[%c2_44, %c0_45, %c0_46] : memref<10x24x128xbf16, #tpu.memory_space<vmem>>, vector<8x16x128xbf16>
    %42 = vector.shape_cast %41 : vector<8x16x128xbf16> to vector<128x128xbf16>
    %c0_47 = arith.constant 0 : index
    %c768 = arith.constant 768 : index
    %43 = vector.load %arg11[%c0_47, %c768] : memref<128x1152xbf16, #tpu.memory_space<vmem>>, vector<128x128xbf16>
    tpu.vector_store %arg11[%c0_47, %c768], %42 {strides = array<i32>} : memref<128x1152xbf16, #tpu.memory_space<vmem>>, vector<128x128xbf16>,
    %c2_48 = arith.constant 2 : index
    %c1_49 = arith.constant 1 : index
    %c0_50 = arith.constant 0 : index
    %44 = vector.load %arg10[%c2_48, %c1_49, %c0_50] : memref<10x24x128xbf16, #tpu.memory_space<vmem>>, vector<8x16x128xbf16>
    %45 = vector.shape_cast %44 : vector<8x16x128xbf16> to vector<128x128xbf16>
    %c0_51 = arith.constant 0 : index
    %c896 = arith.constant 896 : index
    %46 = vector.load %arg11[%c0_51, %c896] : memref<128x1152xbf16, #tpu.memory_space<vmem>>, vector<128x128xbf16>
    tpu.vector_store %arg11[%c0_51, %c896], %45 {strides = array<i32>} : memref<128x1152xbf16, #tpu.memory_space<vmem>>, vector<128x128xbf16>,
    %c2_52 = arith.constant 2 : index
    %c2_53 = arith.constant 2 : index
    %c0_54 = arith.constant 0 : index
    %47 = vector.load %arg10[%c2_52, %c2_53, %c0_54] : memref<10x24x128xbf16, #tpu.memory_space<vmem>>, vector<8x16x128xbf16>
    %48 = vector.shape_cast %47 : vector<8x16x128xbf16> to vector<128x128xbf16>
    %c0_55 = arith.constant 0 : index
    %c1024 = arith.constant 1024 : index
    %49 = vector.load %arg11[%c0_55, %c1024] : memref<128x1152xbf16, #tpu.memory_space<vmem>>, vector<128x128xbf16>
    tpu.vector_store %arg11[%c0_55, %c1024], %48 {strides = array<i32>} : memref<128x1152xbf16, #tpu.memory_space<vmem>>, vector<128x128xbf16>,
    %c0_56 = arith.constant 0 : index
    %c0_57 = arith.constant 0 : index
    %50 = vector.load %arg11[%c0_56, %c0_57] : memref<128x1152xbf16, #tpu.memory_space<vmem>>, vector<128x1152xbf16>
    %c0_58 = arith.constant 0 : index
    %c0_59 = arith.constant 0 : index
    %51 = vector.load %arg5[%c0_58, %c0_59] : memref<1152x128xbf16, #tpu.memory_space<vmem>>, vector<1152x128xbf16>
    %cst_60 = arith.constant dense<0.000000e+00> : vector<128x128xf32>
    %52 = tpu.matmul %50, %51, %cst_60 {dimension_numbers = #tpu.dot_dimension_numbers<[1], [0], [0], [1], [0, 0, 1, 1], [], []>} : vector<128x1152xbf16>, vector<1152x128xbf16>, vector<128x128xf32> -> vector<128x128xf32>
    %c0_61 = arith.constant 0 : index
    %c0_62 = arith.constant 0 : index
    %53 = vector.load %arg6[%c0_61, %c0_62] : memref<1x128xf32, #tpu.memory_space<vmem>>, vector<1x128xf32>
    %54 = vector.broadcast %53 : vector<1x128xf32> to vector<128x128xf32>
    %55 = arith.addf %52, %54 : vector<128x128xf32>
    %cst_63 = arith.constant 0.000000e+00 : f32
    %56 = vector.broadcast %cst_63 : f32 to vector<128x128xf32>
    %57 = arith.maximumf %55, %56 : vector<128x128xf32>
    %58 = arith.truncf %57 : vector<128x128xf32> to vector<128x128xbf16>
    %c0_64 = arith.constant 0 : index
    %c0_65 = arith.constant 0 : index
    %59 = vector.load %arg7[%c0_64, %c0_65] : memref<128x128xbf16, #tpu.memory_space<vmem>>, vector<128x128xbf16>
    %cst_66 = arith.constant dense<0.000000e+00> : vector<128x128xf32>
    %60 = tpu.matmul %58, %59, %cst_66 {dimension_numbers = #tpu.dot_dimension_numbers<[1], [0], [0], [1], [0, 0, 1, 1], [], []>} : vector<128x128xbf16>, vector<128x128xbf16>, vector<128x128xf32> -> vector<128x128xf32>
    %c0_67 = arith.constant 0 : index
    %c0_68 = arith.constant 0 : index
    %61 = vector.load %arg8[%c0_67, %c0_68] : memref<1x128xf32, #tpu.memory_space<vmem>>, vector<1x128xf32>
    %62 = vector.broadcast %61 : vector<1x128xf32> to vector<128x128xf32>
    %63 = arith.addf %60, %62 : vector<128x128xf32>
    %c0_69 = arith.constant 0 : index
    %c0_70 = arith.constant 0 : index
    %c0_71 = arith.constant 0 : index
    %c0_72 = arith.constant 0 : index
    %c0_73 = arith.constant 0 : index
    %64 = vector.load %arg2[%c0_69, %c0_70, %c0_71, %c0_72, %c0_73] : memref<1x1x10x16x128xf32, #tpu.memory_space<vmem>>, vector<1x1x10x16x128xf32>
    %65 = vector.shape_cast %64 : vector<1x1x10x16x128xf32> to vector<10x16x128xf32>
    %66 = vector.extract_strided_slice %65 {offsets = [1, 0, 0], sizes = [8, 16, 128], strides = [1, 1, 1]} : vector<10x16x128xf32> to vector<8x16x128xf32>
    %67 = vector.shape_cast %66 : vector<8x16x128xf32> to vector<128x128xf32>
    %68 = arith.addf %63, %67 : vector<128x128xf32>
    %cst_74 = arith.constant 0.000000e+00 : f32
    %69 = vector.broadcast %cst_74 : f32 to vector<128x128xf32>
    %70 = arith.maximumf %68, %69 : vector<128x128xf32>
    %71 = vector.shape_cast %70 : vector<128x128xf32> to vector<1x8x16x128xf32>
    %c0_75 = arith.constant 0 : index
    %c0_76 = arith.constant 0 : index
    %c0_77 = arith.constant 0 : index
    %c0_78 = arith.constant 0 : index
    %72 = vector.load %arg9[%c0_75, %c0_76, %c0_77, %c0_78] : memref<1x8x16x128xf32, #tpu.memory_space<vmem>>, vector<1x8x16x128xf32>
    tpu.vector_store %arg9[%c0_75, %c0_76, %c0_77, %c0_78], %71 {strides = array<i32>} : memref<1x8x16x128xf32, #tpu.memory_space<vmem>>, vector<1x8x16x128xf32>,
    return
  }
  func.func @transform_0(%arg0: i32, %arg1: i32) -> (i32, i32, i32, i32, i32) {
    %c0_i32 = arith.constant 0 : i32
    %c0_i32_0 = arith.constant 0 : i32
    %c0_i32_1 = arith.constant 0 : i32
    %c0_i32_2 = arith.constant 0 : i32
    return %arg0, %arg1, %c0_i32, %c0_i32_0, %c0_i32_1 : i32, i32, i32, i32, i32
  }
  func.func @transform_1(%arg0: i32, %arg1: i32) -> (i32, i32) {
    %c0_i32 = arith.constant 0 : i32
    %c0_i32_0 = arith.constant 0 : i32
    %c0_i32_1 = arith.constant 0 : i32
    return %c0_i32, %c0_i32_0 : i32, i32
  }
  func.func @transform_2(%arg0: i32, %arg1: i32) -> (i32, i32) {
    %c0_i32 = arith.constant 0 : i32
    %c0_i32_0 = arith.constant 0 : i32
    %c0_i32_1 = arith.constant 0 : i32
    return %c0_i32, %c0_i32_0 : i32, i32
  }
  func.func @transform_3(%arg0: i32, %arg1: i32) -> (i32, i32) {
    %c0_i32 = arith.constant 0 : i32
    %c0_i32_0 = arith.constant 0 : i32
    %c0_i32_1 = arith.constant 0 : i32
    return %c0_i32, %c0_i32_0 : i32, i32
  }
  func.func @transform_4(%arg0: i32, %arg1: i32) -> (i32, i32) {
    %c0_i32 = arith.constant 0 : i32
    %c0_i32_0 = arith.constant 0 : i32
    %c0_i32_1 = arith.constant 0 : i32
    return %c0_i32, %c0_i32_0 : i32, i32
  }
  func.func @transform_5(%arg0: i32, %arg1: i32) -> (i32, i32) {
    %c0_i32 = arith.constant 0 : i32
    %c0_i32_0 = arith.constant 0 : i32
    %c0_i32_1 = arith.constant 0 : i32
    return %c0_i32, %c0_i32_0 : i32, i32
  }
  func.func @transform_6(%arg0: i32, %arg1: i32) -> (i32, i32) {
    %c0_i32 = arith.constant 0 : i32
    %c0_i32_0 = arith.constant 0 : i32
    %c0_i32_1 = arith.constant 0 : i32
    return %c0_i32, %c0_i32_0 : i32, i32
  }
  func.func @transform_7(%arg0: i32, %arg1: i32) -> (i32, i32, i32, i32) {
    %c0_i32 = arith.constant 0 : i32
    %c0_i32_0 = arith.constant 0 : i32
    %c0_i32_1 = arith.constant 0 : i32
    return %arg0, %arg1, %c0_i32, %c0_i32_0 : i32, i32, i32, i32
  }
}

</mosaic_0001>

<bundles_post_ra>
// kernel: tpu_custom_call.1
= control target key start
LH: loop header
LB: loop body
LE: loop exit
PB: predicated region body
PF: predicated region fallthrough
CT: control target
= control target key end

     0   :  { %s6085_s0 = inlined_call_operand.hbm [shape: f32[2,2,10,16,128], index: 0, kind: input, shape index: {}]   ;;  %s6086_s1 = inlined_call_operand.hbm [shape: bf16[128,128], index: 1, kind: input, shape index: {}]   ;;  %s6087_s2 = inlined_call_operand.vmem [shape: f32[1,128], index: 2, kind: input, shape index: {}]   ;;  %s6088_s3 = inlined_call_operand.hbm [shape: bf16[1152,128], index: 3, kind: input, shape index: {}]   ;;  %s6089_s4 = inlined_call_operand.vmem [shape: f32[1,128], index: 4, kind: input, shape index: {}]   ;;  %s6090_s5 = inlined_call_operand.hbm [shape: bf16[128,128], index: 5, kind: input, shape index: {}]   ;;  %s6091_s6 = inlined_call_operand.vmem [shape: f32[1,128], index: 6, kind: input, shape index: {}]   ;;  %s6092_s7 = inlined_call_operand.hbm [shape: f32[2,16,16,128], index: 7, kind: output, shape index: {}]  }
   0x1   :  { %6103 = sst [smem:[#allocation24_spill]] %s6086_s1 }
   0x2   :  { %6104 = sst [smem:[#allocation25_spill]] %s6088_s3 }
   0x3   :  { %6105 = sst [smem:[#allocation26_spill]] %s6090_s5 }
   0x4   :  { %6106 = sst [smem:[#allocation27_spill]] %s6092_s7 }
   0x5   :  { %12 = vsyncpa [#allocation5], 0 }
   0x6   :  { %14 = vsyncpa [#allocation5 + $0x1], 0 }
   0x7   :  { %15 = vsyncpa [#allocation8], 0 }
   0x8   :  { %16 = vsyncpa [#allocation11], 0 }
   0x9   :  { %17 = vsyncpa [#allocation6], 0 }
   0xa   :  { %19 = vsyncpa [#allocation6 + $0x1], 0  ;;  %s5262_s24 = smov 0   ;;  %s5264_s25 = smov 0  }
   0xb   :  { %s5266_s26 = smov 0   ;;  %s5268_s27 = smov 0  }
   0xc   :  { %s5270_s28 = smov 0   ;;  %s5272_s29 = smov 0  }
   0xd   :  { %s5274_s30 = smov 0   ;;  %s5276_s8 = smov 0  }
   0xe LB: > { %6107 = sst [smem:[#allocation17_spill]] %s5181_s24  ;;  %s3988_s9 = sadd.s32 4294967295, %s5209_s8   ;;  %s5209_s8 = sphi %s5276_s8, %s25_s8   ;;  %s5205_s30 = sphi %s5274_s30, %s6148_s30   ;;  %s5201_s29 = sphi %s5272_s29, %s6142_s29   ;;  %s5197_s28 = sphi %s5270_s28, %s6147_s28   ;;  %s5193_s27 = sphi %s5268_s27, %s6141_s27   ;;  %s5189_s26 = sphi %s5266_s26, %s6146_s26   ;;  %s5185_s25 = sphi %s5264_s25, %s6145_s25   ;;  %s5181_s24 = sphi %s5262_s24, %s6144_s24  }
   0xf   : > { %6108 = sst [smem:[#allocation18_spill]] %s5201_s29  ;;  %s3989_s10 = sadd.s32 4294967294, %s5209_s8  }
  0x10   : > { %6109 = sst [smem:[#allocation19_spill]] %s5209_s8  ;;  %p59_p0 = scmp.ne.s32.totalorder %s5185_s25, %s5181_s24 }
  0x11   : > { %p5306_p1 = scmp.eq.s32.totalorder %s3988_s9, 0  ;;  %p5310_p2 = scmp.eq.s32.totalorder %s3988_s9, 3 }
  0x12   : > { %p217_p3 = scmp.eq.s32.totalorder %s3989_s10, 3  ;;  %p3990_p5 = scmp.ge.s32.totalorder %s5209_s8, 1 }
  0x13   : > { %p5316_p4 = por %p5306_p1, %p59_p0  ;;  %p224_p7 = scmp.lt.s32.totalorder %s5209_s8, 5 }
  0x14   : > { %p5321_p6 = por %p217_p3, %p59_p0  ;;  %s6115_s1 = sld [smem:[#allocation24_spill]] }
  0x15   : > { %p5329_p8 = pnand %p3990_p5, %p224_p7  ;;  %s5211_s19 = smov [#allocation7]  }
  0x16   : > { %s6113_s14 = scalar_select %p5321_p6, 1, 0 }
  0x17   : > { %p4879_p9 = pneg %p5329_p8  ;;  %s237_s20 = sshll.u32 %s5211_s19, 4  ;;  %s238_s20 = int_to_ptr.vmem [resolvable:$true] %s237_s20 }
  0x18   : > { %6114 = sst [smem:[#allocation20_spill]] %s6113_s14  ;;  %s5212_s10 = smov 64  }
  0x19   : > { %p5337_p10 = pnand %p4879_p9, %p5306_p1  ;;  %s6118_s3 = sld [smem:[#allocation25_spill]] }
  0x1a   : > { %s235_s17 = sshll.u32 %s6115_s1, 4  ;;  %s5213_s15 = smov 4   ;;  %s236_s17 = int_to_ptr.hbm [resolvable:$true] %s235_s17 }
  0x1b   : > { %4882 = dma.hbm_to_vmem [thread:$0]  (!%p5337_p10), %s236_s17, 1024, %s238_s20, [#allocation8], %s5212_s10, %s5212_s10, %s5213_s15  }
  0x1c   : > { %s5214_s16 = smov [#allocation9]   ;;  %s6119_s5 = sld [smem:[#allocation26_spill]] }
  0x1d   : > { %s254_s19 = sshll.u32 %s5214_s16, 4  ;;  %s5215_s23 = smov [#allocation10]   ;;  %s255_s19 = int_to_ptr.vmem [resolvable:$true] %s254_s19 }
  0x1e   : > { %s34_s17 = sadd.s32 1, %s5201_s29  ;;  %s37_s1 = sadd.s32 1, %s5205_s30 }
  0x1f   : > { %s252_s9 = sshll.u32 %s6118_s3, 4  ;;  %s271_s3 = sshll.u32 %s5215_s23, 4  ;;  %s253_s9 = int_to_ptr.hbm [resolvable:$true] %s252_s9  ;;  %s272_s3 = int_to_ptr.vmem [resolvable:$true] %s271_s3 }
  0x20   : > { %4885 = dma.hbm_to_vmem [thread:$0]  (!%p5337_p10), %s253_s9, 9216, %s255_s19, [#allocation8], %s5212_s10, %s5212_s10, %s5213_s15  }
  0x21   : > { %p35_p11 = scmp.ge.s32.totalorder %s34_s17, 2  ;;  %s46_s14 = sadd.s32 1, %s5189_s26 }
  0x22   : > { %s269_s22 = sshll.u32 %s6119_s5, 4  ;;  %p53_p12 = scmp.ne.s32.totalorder %s5189_s26, %s5185_s25  ;;  %s270_s22 = int_to_ptr.hbm [resolvable:$true] %s269_s22 }
  0x23   : > { %4888 = dma.hbm_to_vmem [thread:$0]  (!%p5337_p10), %s270_s22, 1024, %s272_s3, [#allocation11], %s5212_s10, %s5212_s10, %s5213_s15  }
  0x24   : > { %s6150_s17 = smov (%p35_p11, %s34_s17), 0  ;;  %s6152_s1 = smov (!%p35_p11, %s37_s1), %s5205_s30 }
  0x25   : > { %6120 = sst [smem:[#allocation21_spill]] %s6150_s17  ;;  %s42_s20 = ssub.s32 %s5201_s29, %s6150_s17 }
  0x26   : > { %p54_p13 = scmp.eq.s32.totalorder %s5209_s8, 0  ;;  %p39_p0 = scmp.ge.s32.totalorder %s6152_s1, 2 }
  0x27   : > { %p5366_p3 = por %p5310_p2, %p53_p12  ;;  %p4900_p7 = scmp.lt.s32.totalorder %s5209_s8, 4 }
  0x28   : > { %p55_p5 = por %p54_p13, %p53_p12  ;;  %s6154_s1 = smov (%p39_p0, %s6152_s1), 0 }
  0x29   : > { %s6121_s21 = scalar_select %p5366_p3, 1, 0 }
  0x2a   : > { %6123 = sst [smem:[#allocation23_spill]] %s6154_s1  ;;  %s288_s3 = sand.u32 1, %s5189_s26  }
  0x2b   : > { %6122 = sst [smem:[#allocation22_spill]] %s6121_s21  ;;  %s4860_s9 = smul.u32 20, %s5201_s29 }
  0x2c   : > { %s41_s10 = ssub.s32 %s5205_s30, %s6154_s1  ;;  %s4859_s16 = smul.u32 160, %s288_s3 }
  0x2d   : > { %s43_s15 = sor.u32 %s42_s20, %s41_s10  ;;  %s4861_s19 = smul.u32 40, %s5205_s30 }
  0x2e   : > { %p44_p9 = scmp.eq.s32.totalorder %s43_s15, 0  ;;  %p4890_p10 = pnand %p4900_p7, %p55_p5 }
  0x2f   : > { %s297_s12 = sadd.s32 %s4861_s19, %s4860_s9  ;;  %s292_s23 = scalar_lea.vmem [#allocation4], %s4859_s16 }
  0x30   : > { %s5379_s22 = scalar_select %p44_p9, %s5189_s26, %s46_s14  }
  0x31   : > { %s302_s5 = sshll.u32 %s292_s23, 4  ;;  %s3995_s17 = sshll.u32 %s297_s12, 3  ;;  %s303_s5 = int_to_ptr.vmem [resolvable:$true] %s302_s5 }
  0x32   : > { %s299_s21 = scalar_lea.hbm %s6085_s0, %s3995_s17  ;;  %s289_s29 = scalar_lea.sflag [#allocation5], %s288_s3 }
  0x33   : > { %s300_s7 = sshll.u32 %s299_s21, 4  ;;  %s5216_s1 = smov 128   ;;  %s301_s7 = int_to_ptr.hbm [resolvable:$true] %s300_s7 }
  0x34   : > { %s5217_s20 = smov 8   ;;  %314 = sbr.rel (%p5329_p8) target bundleno = 1094 (0x446), region = 48 }
  0x35   : > { %4892 = dma.hbm_to_vmem [thread:$0]  (!%p4890_p10), %s301_s7, 2560, %s303_s5, %s289_s29, %s5216_s1, %s5216_s1, %s5217_s20  }
  0x36   : > { %s5387_s14 = sand.u32 (!%p5329_p8), 1, %s5185_s25  }
  0x37   : > { %s4862_s9 = smul.u32 (!%p5329_p8), 160, %s5387_s14  ;;  %s317_s10 = scalar_lea.sflag (!%p5329_p8), [#allocation5], %s5387_s14 }
  0x39   : > { %s5391_s15 = scalar_lea.vmem [#allocation4], %s4862_s9 }
  0x3a   : > { %5164 = dma.done.wait (%p5316_p4), %s317_s10, 2560  }
  0x3b   : > { %5166 = vsyncadd (%p5316_p4), %s317_s10, 4294964736 }
  0x3c   : > { %5168 = dma.done.wait (%p5306_p1), [#allocation8], 10240  }
  0x3d   : > { %5170 = vsyncadd (%p5306_p1), [#allocation8], 4294957056 }
  0x3e   : > { %5172 = dma.done.wait (%p5306_p1), [#allocation11], 1024  }
  0x3f   : > { %5174 = vsyncadd (%p5306_p1), [#allocation11], 4294966272  ;;  %s4000_s5 = sshll.u32 %s5387_s14, 7  ;;  %v4681_v0 = vld [vmem:[#allocation7 + $0x38] sm:$0xff]  ;;  %v4680_v1 = vld [vmem:[#allocation7 + $0x30] sm:$0xff]  ;;  %vm769_vm0 = vcmask 1043456  }
  0x40   : > { %467 = vmatpush.bf16.msra.mxu0 %v4681_v0  ;;  %v4679_v2 = vld [vmem:[#allocation7 + $0x28] sm:$0xff]  ;;  %v4678_v3 = vld [vmem:[#allocation7 + $0x20] sm:$0xff]  ;;  %v4677_v4 = vld [vmem:[#allocation7 + $0x18] sm:$0xff]  ;;  %vm770_vm1 = vsmask.f32 7938  ;;  %vm776_vm4 = vcmask 1040384  }
  0x41   : > { %v4676_v5 = vld [vmem:[#allocation7 + $0x10] sm:$0xff]  ;;  %v4675_v6 = vld [vmem:[#allocation7 + $0x8] sm:$0xff]  ;;  %v4674_v7 = vld [vmem:[#allocation7] sm:$0xff]  ;;  %vm566_vm3 = vsmask.f32 256  ;;  %s5573_s29 = scalar_lea.vmem [#allocation12], %s4000_s5 }
  0x42   : > { %v369_v8 = vld [vmem:[%s5391_s15] sm:$0xff]  ;;  %v370_v9 = vld [vmem:[%s5391_s15 + $0x8] sm:$0xff]  ;;  %v371_v11 = vld [vmem:[%s5391_s15 + $0x10] sm:$0xff]  ;;  %vm567_vm5 = vsmask.f32 4368  ;;  %p4033_p1 = scmp.ne.s32.totalorder %s5193_s27, 0 }
  0x43   : > { %v389_v10 = vpack.c.bf16 %v370_v9, %v369_v8  ;;  %v372_v12 = vld [vmem:[%s5391_s15 + $0x18] sm:$0xff]  ;;  %v373_v14 = vld [vmem:[%s5391_s15 + $0x20] sm:$0xff]  ;;  %v374_v15 = vld [vmem:[%s5391_s15 + $0x28] sm:$0xff] }
  0x44   : > { %468 = vmatpush.bf16.msra.mxu0 %v4680_v1  ;;  %v390_v13 = vpack.c.bf16 %v372_v12, %v371_v11  ;;  %v391_v16 = vpack.c.bf16 %v374_v15, %v373_v14  ;;  %v375_v17 = vld [vmem:[%s5391_s15 + $0x30] sm:$0xff]  ;;  %v376_v18 = vld [vmem:[%s5391_s15 + $0x38] sm:$0xff]  ;;  %v377_v20 = vld [vmem:[%s5391_s15 + $0x40] sm:$0xff] }
  0x45   : > { %v392_v19 = vpack.c.bf16 %v376_v18, %v375_v17  ;;  %v378_v21 = vld [vmem:[%s5391_s15 + $0x48] sm:$0xff]  ;;  %v379_v23 = vld [vmem:[%s5391_s15 + $0x50] sm:$0xff]  ;;  %v380_v24 = vld [vmem:[%s5391_s15 + $0x58] sm:$0xff] }
  0x46   : > { %v393_v22 = vpack.c.bf16 %v378_v21, %v377_v20  ;;  %v394_v25 = vpack.c.bf16 %v380_v24, %v379_v23  ;;  %v381_v26 = vld [vmem:[%s5391_s15 + $0x60] sm:$0xff]  ;;  %v382_v27 = vld [vmem:[%s5391_s15 + $0x68] sm:$0xff]  ;;  %v383_v29 = vld [vmem:[%s5391_s15 + $0x70] sm:$0xff] }
  0x47   : > { %v395_v28 = vpack.c.bf16 %v382_v27, %v381_v26  ;;  %v384_v30 = vld [vmem:[%s5391_s15 + $0x78] sm:$0xff]  ;;  %v385_v32 = vld [vmem:[%s5391_s15 + $0x80] sm:$0xff]  ;;  %v386_v33 = vld [vmem:[%s5391_s15 + $0x88] sm:$0xff] }
  0x48   : > { %469 = vmatpush.bf16.msra.mxu0 %v4679_v2  ;;  %v396_v31 = vpack.c.bf16 %v384_v30, %v383_v29  ;;  %v5427_v34 = vld [vmem:[%s6087_s2] ss:$0 sm:$0xff]  ;;  %v397_v35 = vpack.c.bf16 %v386_v33, %v385_v32  ;;  %vm5432_vm2 = vmand %vm769_vm0, %vm770_vm1  ;;  %v387_v49 = vld [vmem:[%s5391_s15 + $0x90] sm:$0xff] }
  0x49   : > { %v772_v46 = vld [vmem:[#allocation2] sm:$0xf]  ;;  %v388_v50 = vld [vmem:[%s5391_s15 + $0x98] sm:$0xff]  ;;  %vm5441_vm6 = vmand %vm776_vm4, %vm566_vm3 }
  0x4a   : > { %v398_v54 = vpack.c.bf16 %v388_v50, %v387_v49  ;;  %vm5446_vm7 = vmor %vm566_vm3, %vm567_vm5  ;;  %v778_v61 = vld [vmem:[#allocation2 + $0x8] sm:$0x1]  ;;  %v781_v12 = vld [vmem:[#allocation2 + $0xc] sm:$0xf] }
  0x4b   : > { %vm5459_vm8 = vmand %vm776_vm4, %vm770_vm1 }
  0x4c   : > { %470 = vmatpush.bf16.msra.mxu0 %v4678_v3 }
  0x50   : > { %471 = vmatpush.bf16.msra.mxu0 %v4677_v4 }
  0x54   : > { %472 = vmatpush.bf16.msra.mxu0 %v4676_v5 }
  0x58   : > { %473 = vmatpush.bf16.msra.mxu0 %v4675_v6 }
  0x5c   : > { %474 = vmatpush.bf16.msra.mxu0 %v4674_v7 }
  0x5f   : > { %475 = vmatmul.bf16.vlgmr.msra.gmra.mxu0 %v389_v10 }
  0x6f   : > { %480 = vmatmul.bf16.gmra.mxu0 %v390_v13 }
  0x7f   : > { %485 = vmatmul.bf16.gmra.mxu0 %v391_v16 }
  0x8f   : > { %490 = vmatmul.bf16.gmra.mxu0 %v392_v19 }
  0x9f   : > { %495 = vmatmul.bf16.gmra.mxu0 %v393_v22 }
  0xaf   : > { %500 = vmatmul.bf16.gmra.mxu0 %v394_v25  ;;  %v785_v25 = vld [vmem:[#allocation2 + $0x14] sm:$0x1] }
  0xbf   : > { %505 = vmatmul.bf16.gmra.mxu0 %v395_v28 }
  0xcf   : > { %510 = vmatmul.bf16.gmra.mxu0 %v396_v31 }
  0xdc   : > { %v476_v36 = vpop.f32.mrf.mxu0 }
  0xdd   : > { %v477_v37 = vadd.f32 %v5427_v34, %v476_v36 }
  0xdf   : > { %v526_v38 = vmax.f32 %v477_v37, 0.0  ;;  %515 = vmatmul.bf16.gmra.mxu0 %v397_v35 }
  0xe1   : > { %v546_v39 = vpack.c.bf16 %v526_v38, %v526_v38 }
  0xe3   : > { %v570_v40 = vshrl.u32 %v546_v39, 16  ;;  %v573_v43 = vshll.u32 %v546_v39, 16 }
  0xe4   : > { %v478_v41 = vpop.f32.mrf.mxu0 }
  0xe5   : > { %v572_v42 = vrot.slane %v570_v40, 7  ;;  %v479_v44 = vadd.f32 %v5427_v34, %v478_v41  ;;  %v788_v41 = vld [vmem:[#allocation2 + $0x18] sm:$0xf] }
  0xe7   : > { %v575_v47 = vor.u32 %v573_v43, %v572_v42  ;;  %v527_v48 = vmax.f32 %v479_v44, 0.0  ;;  %v576_v62 = vrot.slane %v572_v42, 4 }
  0xe9   : > { %v773_v51 = vsel %vm5432_vm2, %v575_v47, %v772_v46  ;;  %v547_v52 = vpack.c.bf16 %v527_v48, %v527_v48 }
  0xea   : > { %774 = vst [vmem:[#allocation2] sm:$0xf] %v773_v51 }
  0xeb   : > { %v578_v53 = vshrl.u32 %v547_v52, 16  ;;  %v581_v58 = vshll.u32 %v547_v52, 16 }
  0xec   : > { %v481_v55 = vpop.f32.mrf.mxu0 }
  0xed   : > { %v580_v57 = vrot.slane %v578_v53, 7  ;;  %v482_v59 = vadd.f32 %v5427_v34, %v481_v55 }
  0xef   : > { %v583_v63 = vor.u32 %v581_v58, %v580_v57  ;;  %v585_v0 = vrot.slane %v580_v57, 4  ;;  %v528_v1 = vmax.f32 %v482_v59, 0.0  ;;  %520 = vmatmul.bf16.gmra.mxu0 %v398_v54  ;;  %v792_v54 = vld [vmem:[#allocation2 + $0x20] sm:$0x1] }
  0xf1   : > { %v844_v2 = vld [vmem:[#allocation2] sm:$0x1]  ;;  %v584_v3 = vsel %vm5446_vm7, %v576_v62, %v583_v63  ;;  %v779_v4 = vsel %vm5441_vm6, %v585_v0, %v778_v61  ;;  %v548_v5 = vpack.c.bf16 %v528_v1, %v528_v1 }
  0xf2   : > { %v845_v6 = vsel %vm5441_vm6, 0, %v844_v2  ;;  %775 = vst [vmem:[#allocation2 + $0x4] sm:$0xf] %v584_v3 }
  0xf3   : > { %846 = vst [vmem:[#allocation2] sm:$0x1] %v845_v6  ;;  %v587_v7 = vshrl.u32 %v548_v5, 16  ;;  %v590_v10 = vshll.u32 %v548_v5, 16 }
  0xf4   : > { %780 = vst [vmem:[#allocation2 + $0x8] sm:$0x1] %v779_v4  ;;  %v483_v8 = vpop.f32.mrf.mxu0 }
  0xf5   : > { %v589_v9 = vrot.slane %v587_v7, 7  ;;  %v484_v11 = vadd.f32 %v5427_v34, %v483_v8  ;;  %v795_v7 = vld [vmem:[#allocation2 + $0x24] sm:$0xf] }
  0xf7   : > { %v592_v13 = vor.u32 %v590_v10, %v589_v9  ;;  %v529_v14 = vmax.f32 %v484_v11, 0.0  ;;  %v593_v26 = vrot.slane %v589_v9, 4 }
  0xf9   : > { %v782_v16 = vsel %vm5432_vm2, %v592_v13, %v781_v12  ;;  %v549_v17 = vpack.c.bf16 %v529_v14, %v529_v14 }
  0xfa   : > { %783 = vst [vmem:[#allocation2 + $0xc] sm:$0xf] %v782_v16 }
  0xfb   : > { %v875_v18 = vld [vmem:[#allocation2 + $0x8] sm:$0x1]  ;;  %v595_v19 = vshrl.u32 %v549_v17, 16  ;;  %v598_v23 = vshll.u32 %v549_v17, 16 }
  0xfc   : > { %v876_v20 = vsel %vm5459_vm8, 0, %v875_v18  ;;  %v486_v21 = vpop.f32.mrf.mxu0 }
  0xfd   : > { %877 = vst [vmem:[#allocation2 + $0x8] sm:$0x1] %v876_v20  ;;  %v597_v22 = vrot.slane %v595_v19, 7  ;;  %v487_v24 = vadd.f32 %v5427_v34, %v486_v21  ;;  %v799_v20 = vld [vmem:[#allocation2 + $0x2c] sm:$0x1] }
  0xff   : > { %v600_v27 = vor.u32 %v598_v23, %v597_v22  ;;  %v602_v28 = vrot.slane %v597_v22, 4  ;;  %v530_v29 = vmax.f32 %v487_v24, 0.0 }
 0x101   : > { %v847_v30 = vld [vmem:[#allocation2 + $0xc] sm:$0x1]  ;;  %v601_v31 = vsel %vm5446_vm7, %v593_v26, %v600_v27  ;;  %v786_v32 = vsel %vm5441_vm6, %v602_v28, %v785_v25  ;;  %v550_v33 = vpack.c.bf16 %v530_v29, %v530_v29 }
 0x102   : > { %v848_v35 = vsel %vm5441_vm6, 0, %v847_v30  ;;  %784 = vst [vmem:[#allocation2 + $0x10] sm:$0xf] %v601_v31 }
 0x103   : > { %849 = vst [vmem:[#allocation2 + $0xc] sm:$0x1] %v848_v35  ;;  %v604_v36 = vshrl.u32 %v550_v33, 16  ;;  %v607_v39 = vshll.u32 %v550_v33, 16 }
 0x104   : > { %787 = vst [vmem:[#allocation2 + $0x14] sm:$0x1] %v786_v32  ;;  %v488_v37 = vpop.f32.mrf.mxu0 }
 0x105   : > { %v606_v38 = vrot.slane %v604_v36, 7  ;;  %v489_v40 = vadd.f32 %v5427_v34, %v488_v37  ;;  %v802_v36 = vld [vmem:[#allocation2 + $0x30] sm:$0xf] }
 0x107   : > { %v609_v42 = vor.u32 %v607_v39, %v606_v38  ;;  %v531_v43 = vmax.f32 %v489_v40, 0.0  ;;  %v610_v55 = vrot.slane %v606_v38, 4 }
 0x109   : > { %v789_v44 = vsel %vm5432_vm2, %v609_v42, %v788_v41  ;;  %v551_v46 = vpack.c.bf16 %v531_v43, %v531_v43 }
 0x10a   : > { %790 = vst [vmem:[#allocation2 + $0x18] sm:$0xf] %v789_v44 }
 0x10b   : > { %v878_v47 = vld [vmem:[#allocation2 + $0x14] sm:$0x1]  ;;  %v612_v48 = vshrl.u32 %v551_v46, 16  ;;  %v615_v52 = vshll.u32 %v551_v46, 16 }
 0x10c   : > { %v879_v49 = vsel %vm5459_vm8, 0, %v878_v47  ;;  %v491_v50 = vpop.f32.mrf.mxu0 }
 0x10d   : > { %880 = vst [vmem:[#allocation2 + $0x14] sm:$0x1] %v879_v49  ;;  %v614_v51 = vrot.slane %v612_v48, 7  ;;  %v492_v53 = vadd.f32 %v5427_v34, %v491_v50  ;;  %v806_v49 = vld [vmem:[#allocation2 + $0x38] sm:$0x1] }
 0x10f   : > { %v617_v57 = vor.u32 %v615_v52, %v614_v51  ;;  %v619_v58 = vrot.slane %v614_v51, 4  ;;  %v532_v59 = vmax.f32 %v492_v53, 0.0 }
 0x111   : > { %v850_v61 = vld [vmem:[#allocation2 + $0x18] sm:$0x1]  ;;  %v618_v62 = vsel %vm5446_vm7, %v610_v55, %v617_v57  ;;  %v793_v63 = vsel %vm5441_vm6, %v619_v58, %v792_v54  ;;  %v552_v0 = vpack.c.bf16 %v532_v59, %v532_v59 }
 0x112   : > { %v851_v1 = vsel %vm5441_vm6, 0, %v850_v61  ;;  %791 = vst [vmem:[#allocation2 + $0x1c] sm:$0xf] %v618_v62 }
 0x113   : > { %852 = vst [vmem:[#allocation2 + $0x18] sm:$0x1] %v851_v1  ;;  %v621_v2 = vshrl.u32 %v552_v0, 16  ;;  %v624_v5 = vshll.u32 %v552_v0, 16 }
 0x114   : > { %794 = vst [vmem:[#allocation2 + $0x20] sm:$0x1] %v793_v63  ;;  %v493_v3 = vpop.f32.mrf.mxu0 }
 0x115   : > { %v623_v4 = vrot.slane %v621_v2, 7  ;;  %v494_v6 = vadd.f32 %v5427_v34, %v493_v3  ;;  %v809_v2 = vld [vmem:[#allocation2 + $0x3c] sm:$0xf] }
 0x117   : > { %v626_v8 = vor.u32 %v624_v5, %v623_v4  ;;  %v533_v9 = vmax.f32 %v494_v6, 0.0  ;;  %v627_v21 = vrot.slane %v623_v4, 4 }
 0x119   : > { %v796_v10 = vsel %vm5432_vm2, %v626_v8, %v795_v7  ;;  %v553_v11 = vpack.c.bf16 %v533_v9, %v533_v9 }
 0x11a   : > { %797 = vst [vmem:[#allocation2 + $0x24] sm:$0xf] %v796_v10 }
 0x11b   : > { %v881_v12 = vld [vmem:[#allocation2 + $0x20] sm:$0x1]  ;;  %v629_v13 = vshrl.u32 %v553_v11, 16  ;;  %v632_v18 = vshll.u32 %v553_v11, 16 }
 0x11c   : > { %v882_v14 = vsel %vm5459_vm8, 0, %v881_v12  ;;  %v496_v16 = vpop.f32.mrf.mxu0 }
 0x11d   : > { %883 = vst [vmem:[#allocation2 + $0x20] sm:$0x1] %v882_v14  ;;  %v631_v17 = vrot.slane %v629_v13, 7  ;;  %v497_v19 = vadd.f32 %v5427_v34, %v496_v16  ;;  %v813_v14 = vld [vmem:[#allocation2 + $0x44] sm:$0x1] }
 0x11f   : > { %v634_v22 = vor.u32 %v632_v18, %v631_v17  ;;  %v636_v23 = vrot.slane %v631_v17, 4  ;;  %v534_v24 = vmax.f32 %v497_v19, 0.0 }
 0x121   : > { %v853_v25 = vld [vmem:[#allocation2 + $0x24] sm:$0x1]  ;;  %v635_v26 = vsel %vm5446_vm7, %v627_v21, %v634_v22  ;;  %v800_v27 = vsel %vm5441_vm6, %v636_v23, %v799_v20  ;;  %v554_v28 = vpack.c.bf16 %v534_v24, %v534_v24 }
 0x122   : > { %v854_v29 = vsel %vm5441_vm6, 0, %v853_v25  ;;  %798 = vst [vmem:[#allocation2 + $0x28] sm:$0xf] %v635_v26 }
 0x123   : > { %855 = vst [vmem:[#allocation2 + $0x24] sm:$0x1] %v854_v29  ;;  %v638_v30 = vshrl.u32 %v554_v28, 16  ;;  %v641_v33 = vshll.u32 %v554_v28, 16 }
 0x124   : > { %801 = vst [vmem:[#allocation2 + $0x2c] sm:$0x1] %v800_v27  ;;  %v498_v31 = vpop.f32.mrf.mxu0 }
 0x125   : > { %v640_v32 = vrot.slane %v638_v30, 7  ;;  %v499_v35 = vadd.f32 %v5427_v34, %v498_v31  ;;  %v816_v30 = vld [vmem:[#allocation2 + $0x48] sm:$0xf] }
 0x127   : > { %v643_v37 = vor.u32 %v641_v33, %v640_v32  ;;  %v535_v38 = vmax.f32 %v499_v35, 0.0  ;;  %v644_v50 = vrot.slane %v640_v32, 4 }
 0x129   : > { %v803_v39 = vsel %vm5432_vm2, %v643_v37, %v802_v36  ;;  %v555_v40 = vpack.c.bf16 %v535_v38, %v535_v38 }
 0x12a   : > { %804 = vst [vmem:[#allocation2 + $0x30] sm:$0xf] %v803_v39 }
 0x12b   : > { %v884_v41 = vld [vmem:[#allocation2 + $0x2c] sm:$0x1]  ;;  %v646_v42 = vshrl.u32 %v555_v40, 16  ;;  %v649_v47 = vshll.u32 %v555_v40, 16 }
 0x12c   : > { %v885_v43 = vsel %vm5459_vm8, 0, %v884_v41  ;;  %v501_v44 = vpop.f32.mrf.mxu0 }
 0x12d   : > { %886 = vst [vmem:[#allocation2 + $0x2c] sm:$0x1] %v885_v43  ;;  %v648_v46 = vrot.slane %v646_v42, 7  ;;  %v502_v48 = vadd.f32 %v5427_v34, %v501_v44  ;;  %v820_v43 = vld [vmem:[#allocation2 + $0x50] sm:$0x1] }
 0x12f   : > { %v651_v51 = vor.u32 %v649_v47, %v648_v46  ;;  %v653_v52 = vrot.slane %v648_v46, 4  ;;  %v536_v53 = vmax.f32 %v502_v48, 0.0 }
 0x131   : > { %v856_v54 = vld [vmem:[#allocation2 + $0x30] sm:$0x1]  ;;  %v652_v55 = vsel %vm5446_vm7, %v644_v50, %v651_v51  ;;  %v807_v57 = vsel %vm5441_vm6, %v653_v52, %v806_v49  ;;  %v556_v58 = vpack.c.bf16 %v536_v53, %v536_v53 }
 0x132   : > { %v857_v59 = vsel %vm5441_vm6, 0, %v856_v54  ;;  %805 = vst [vmem:[#allocation2 + $0x34] sm:$0xf] %v652_v55 }
 0x133   : > { %858 = vst [vmem:[#allocation2 + $0x30] sm:$0x1] %v857_v59  ;;  %v655_v61 = vshrl.u32 %v556_v58, 16  ;;  %v658_v0 = vshll.u32 %v556_v58, 16 }
 0x134   : > { %808 = vst [vmem:[#allocation2 + $0x38] sm:$0x1] %v807_v57  ;;  %v503_v62 = vpop.f32.mrf.mxu0 }
 0x135   : > { %v657_v63 = vrot.slane %v655_v61, 7  ;;  %v504_v1 = vadd.f32 %v5427_v34, %v503_v62  ;;  %v823_v61 = vld [vmem:[#allocation2 + $0x54] sm:$0xf] }
 0x137   : > { %v660_v3 = vor.u32 %v658_v0, %v657_v63  ;;  %v537_v4 = vmax.f32 %v504_v1, 0.0  ;;  %v661_v16 = vrot.slane %v657_v63, 4 }
 0x139   : > { %v810_v5 = vsel %vm5432_vm2, %v660_v3, %v809_v2  ;;  %v557_v6 = vpack.c.bf16 %v537_v4, %v537_v4 }
 0x13a   : > { %811 = vst [vmem:[#allocation2 + $0x3c] sm:$0xf] %v810_v5 }
 0x13b   : > { %v887_v7 = vld [vmem:[#allocation2 + $0x38] sm:$0x1]  ;;  %v663_v8 = vshrl.u32 %v557_v6, 16  ;;  %v666_v12 = vshll.u32 %v557_v6, 16 }
 0x13c   : > { %v888_v9 = vsel %vm5459_vm8, 0, %v887_v7  ;;  %v506_v10 = vpop.f32.mrf.mxu0 }
 0x13d   : > { %889 = vst [vmem:[#allocation2 + $0x38] sm:$0x1] %v888_v9  ;;  %v665_v11 = vrot.slane %v663_v8, 7  ;;  %v507_v13 = vadd.f32 %v5427_v34, %v506_v10  ;;  %v827_v9 = vld [vmem:[#allocation2 + $0x5c] sm:$0x1] }
 0x13f   : > { %v668_v17 = vor.u32 %v666_v12, %v665_v11  ;;  %v670_v18 = vrot.slane %v665_v11, 4  ;;  %v538_v19 = vmax.f32 %v507_v13, 0.0 }
 0x141   : > { %v859_v20 = vld [vmem:[#allocation2 + $0x3c] sm:$0x1]  ;;  %v669_v21 = vsel %vm5446_vm7, %v661_v16, %v668_v17  ;;  %v814_v22 = vsel %vm5441_vm6, %v670_v18, %v813_v14  ;;  %v558_v23 = vpack.c.bf16 %v538_v19, %v538_v19 }
 0x142   : > { %v860_v24 = vsel %vm5441_vm6, 0, %v859_v20  ;;  %812 = vst [vmem:[#allocation2 + $0x40] sm:$0xf] %v669_v21 }
 0x143   : > { %861 = vst [vmem:[#allocation2 + $0x3c] sm:$0x1] %v860_v24  ;;  %v672_v25 = vshrl.u32 %v558_v23, 16  ;;  %v675_v28 = vshll.u32 %v558_v23, 16 }
 0x144   : > { %815 = vst [vmem:[#allocation2 + $0x44] sm:$0x1] %v814_v22  ;;  %v508_v26 = vpop.f32.mrf.mxu0 }
 0x145   : > { %v674_v27 = vrot.slane %v672_v25, 7  ;;  %v509_v29 = vadd.f32 %v5427_v34, %v508_v26  ;;  %v830_v25 = vld [vmem:[#allocation2 + $0x60] sm:$0xf] }
 0x147   : > { %v677_v31 = vor.u32 %v675_v28, %v674_v27  ;;  %v539_v32 = vmax.f32 %v509_v29, 0.0  ;;  %v678_v44 = vrot.slane %v674_v27, 4 }
 0x149   : > { %v817_v33 = vsel %vm5432_vm2, %v677_v31, %v816_v30  ;;  %v559_v35 = vpack.c.bf16 %v539_v32, %v539_v32 }
 0x14a   : > { %818 = vst [vmem:[#allocation2 + $0x48] sm:$0xf] %v817_v33 }
 0x14b   : > { %v890_v36 = vld [vmem:[#allocation2 + $0x44] sm:$0x1]  ;;  %v680_v37 = vshrl.u32 %v559_v35, 16  ;;  %v683_v41 = vshll.u32 %v559_v35, 16 }
 0x14c   : > { %v891_v38 = vsel %vm5459_vm8, 0, %v890_v36  ;;  %v511_v39 = vpop.f32.mrf.mxu0 }
 0x14d   : > { %892 = vst [vmem:[#allocation2 + $0x44] sm:$0x1] %v891_v38  ;;  %v682_v40 = vrot.slane %v680_v37, 7  ;;  %v512_v42 = vadd.f32 %v5427_v34, %v511_v39  ;;  %v834_v38 = vld [vmem:[#allocation2 + $0x68] sm:$0x1] }
 0x14f   : > { %v685_v46 = vor.u32 %v683_v41, %v682_v40  ;;  %v687_v47 = vrot.slane %v682_v40, 4  ;;  %v540_v48 = vmax.f32 %v512_v42, 0.0 }
 0x151   : > { %v862_v49 = vld [vmem:[#allocation2 + $0x48] sm:$0x1]  ;;  %v686_v50 = vsel %vm5446_vm7, %v678_v44, %v685_v46  ;;  %v821_v51 = vsel %vm5441_vm6, %v687_v47, %v820_v43  ;;  %v560_v52 = vpack.c.bf16 %v540_v48, %v540_v48 }
 0x152   : > { %v863_v53 = vsel %vm5441_vm6, 0, %v862_v49  ;;  %819 = vst [vmem:[#allocation2 + $0x4c] sm:$0xf] %v686_v50 }
 0x153   : > { %864 = vst [vmem:[#allocation2 + $0x48] sm:$0x1] %v863_v53  ;;  %v689_v54 = vshrl.u32 %v560_v52, 16  ;;  %v692_v58 = vshll.u32 %v560_v52, 16 }
 0x154   : > { %822 = vst [vmem:[#allocation2 + $0x50] sm:$0x1] %v821_v51  ;;  %v513_v55 = vpop.f32.mrf.mxu0 }
 0x155   : > { %v691_v57 = vrot.slane %v689_v54, 7  ;;  %v514_v59 = vadd.f32 %v5427_v34, %v513_v55  ;;  %v837_v54 = vld [vmem:[#allocation2 + $0x6c] sm:$0xf] }
 0x157   : > { %v694_v62 = vor.u32 %v692_v58, %v691_v57  ;;  %v541_v63 = vmax.f32 %v514_v59, 0.0  ;;  %v695_v10 = vrot.slane %v691_v57, 4 }
 0x159   : > { %v824_v0 = vsel %vm5432_vm2, %v694_v62, %v823_v61  ;;  %v561_v1 = vpack.c.bf16 %v541_v63, %v541_v63 }
 0x15a   : > { %825 = vst [vmem:[#allocation2 + $0x54] sm:$0xf] %v824_v0 }
 0x15b   : > { %v893_v2 = vld [vmem:[#allocation2 + $0x50] sm:$0x1]  ;;  %v697_v3 = vshrl.u32 %v561_v1, 16  ;;  %v700_v7 = vshll.u32 %v561_v1, 16 }
 0x15c   : > { %v894_v4 = vsel %vm5459_vm8, 0, %v893_v2  ;;  %v516_v5 = vpop.f32.mrf.mxu0  ;;  %v841_v2 = vld [vmem:[#allocation2 + $0x74] sm:$0x1] }
 0x15d   : > { %895 = vst [vmem:[#allocation2 + $0x50] sm:$0x1] %v894_v4  ;;  %v699_v6 = vrot.slane %v697_v3, 7  ;;  %v517_v8 = vadd.f32 %v5427_v34, %v516_v5 }
 0x15f   : > { %v702_v11 = vor.u32 %v700_v7, %v699_v6  ;;  %v704_v12 = vrot.slane %v699_v6, 4  ;;  %v542_v13 = vmax.f32 %v517_v8, 0.0 }
 0x161   : > { %v865_v14 = vld [vmem:[#allocation2 + $0x54] sm:$0x1]  ;;  %v703_v16 = vsel %vm5446_vm7, %v695_v10, %v702_v11  ;;  %v828_v17 = vsel %vm5441_vm6, %v704_v12, %v827_v9  ;;  %v562_v18 = vpack.c.bf16 %v542_v13, %v542_v13 }
 0x162   : > { %v866_v19 = vsel %vm5441_vm6, 0, %v865_v14  ;;  %826 = vst [vmem:[#allocation2 + $0x58] sm:$0xf] %v703_v16 }
 0x163   : > { %867 = vst [vmem:[#allocation2 + $0x54] sm:$0x1] %v866_v19  ;;  %v706_v20 = vshrl.u32 %v562_v18, 16  ;;  %v709_v23 = vshll.u32 %v562_v18, 16 }
 0x164   : > { %829 = vst [vmem:[#allocation2 + $0x5c] sm:$0x1] %v828_v17  ;;  %v518_v21 = vpop.f32.mrf.mxu0 }
 0x165   : > { %v708_v22 = vrot.slane %v706_v20, 7  ;;  %v519_v24 = vadd.f32 %v5427_v34, %v518_v21 }
 0x167   : > { %v711_v26 = vor.u32 %v709_v23, %v708_v22  ;;  %v543_v27 = vmax.f32 %v519_v24, 0.0  ;;  %v712_v39 = vrot.slane %v708_v22, 4 }
 0x169   : > { %v831_v28 = vsel %vm5432_vm2, %v711_v26, %v830_v25  ;;  %v563_v29 = vpack.c.bf16 %v543_v27, %v543_v27 }
 0x16a   : > { %832 = vst [vmem:[#allocation2 + $0x60] sm:$0xf] %v831_v28 }
 0x16b   : > { %v896_v30 = vld [vmem:[#allocation2 + $0x5c] sm:$0x1]  ;;  %v714_v31 = vshrl.u32 %v563_v29, 16  ;;  %v717_v36 = vshll.u32 %v563_v29, 16 }
 0x16c   : > { %v897_v32 = vsel %vm5459_vm8, 0, %v896_v30  ;;  %v521_v33 = vpop.f32.mrf.mxu0 }
 0x16d   : > { %898 = vst [vmem:[#allocation2 + $0x5c] sm:$0x1] %v897_v32  ;;  %v716_v35 = vrot.slane %v714_v31, 7  ;;  %v522_v37 = vadd.f32 %v5427_v34, %v521_v33 }
 0x16f   : > { %v719_v40 = vor.u32 %v717_v36, %v716_v35  ;;  %v721_v41 = vrot.slane %v716_v35, 4  ;;  %v544_v42 = vmax.f32 %v522_v37, 0.0 }
 0x171   : > { %v868_v43 = vld [vmem:[#allocation2 + $0x60] sm:$0x1]  ;;  %v720_v44 = vsel %vm5446_vm7, %v712_v39, %v719_v40  ;;  %v835_v46 = vsel %vm5441_vm6, %v721_v41, %v834_v38  ;;  %v564_v47 = vpack.c.bf16 %v544_v42, %v544_v42 }
 0x172   : > { %v869_v48 = vsel %vm5441_vm6, 0, %v868_v43  ;;  %833 = vst [vmem:[#allocation2 + $0x64] sm:$0xf] %v720_v44 }
 0x173   : > { %870 = vst [vmem:[#allocation2 + $0x60] sm:$0x1] %v869_v48  ;;  %v723_v49 = vshrl.u32 %v564_v47, 16  ;;  %v726_v52 = vshll.u32 %v564_v47, 16 }
 0x174   : > { %836 = vst [vmem:[#allocation2 + $0x68] sm:$0x1] %v835_v46  ;;  %v523_v50 = vpop.f32.mrf.mxu0 }
 0x175   : > { %v725_v51 = vrot.slane %v723_v49, 7  ;;  %v524_v53 = vadd.f32 %v5427_v34, %v523_v50 }
 0x177   : > { %v728_v55 = vor.u32 %v726_v52, %v725_v51  ;;  %v545_v57 = vmax.f32 %v524_v53, 0.0  ;;  %v729_v3 = vrot.slane %v725_v51, 4 }
 0x179   : > { %v838_v58 = vsel %vm5432_vm2, %v728_v55, %v837_v54  ;;  %v565_v59 = vpack.c.bf16 %v545_v57, %v545_v57 }
 0x17a   : > { %839 = vst [vmem:[#allocation2 + $0x6c] sm:$0xf] %v838_v58 }
 0x17b   : > { %v899_v61 = vld [vmem:[#allocation2 + $0x68] sm:$0x1]  ;;  %v731_v62 = vshrl.u32 %v565_v59, 16  ;;  %v734_v1 = vshll.u32 %v565_v59, 16 }
 0x17c   : > { %v900_v63 = vsel %vm5459_vm8, 0, %v899_v61 }
 0x17d   : > { %901 = vst [vmem:[#allocation2 + $0x68] sm:$0x1] %v900_v63  ;;  %v733_v0 = vrot.slane %v731_v62, 7 }
 0x17f   : > { %v736_v34 = vor.u32 %v734_v1, %v733_v0  ;;  %v738_v4 = vrot.slane %v733_v0, 4 }
 0x181   : > { %v871_v5 = vld [vmem:[#allocation2 + $0x6c] sm:$0x1]  ;;  %v737_v45 = vsel %vm5446_vm7, %v729_v3, %v736_v34  ;;  %v842_v6 = vsel %vm5441_vm6, %v738_v4, %v841_v2 }
 0x182   : > { %v872_v7 = vsel %vm5441_vm6, 0, %v871_v5  ;;  %840 = vst [vmem:[#allocation2 + $0x70] sm:$0xf] %v737_v45 }
 0x183   : > { %873 = vst [vmem:[#allocation2 + $0x6c] sm:$0x1] %v872_v7 }
 0x184   : > { %843 = vst [vmem:[#allocation2 + $0x74] sm:$0x1] %v842_v6 }
 0x189   : > { %908 = sbr.rel (%p4033_p1) target bundleno = 402 (0x192), region = 68 }
 0x18b   : > { %v902_v8 = vld [vmem:[#allocation2 + $0x74] sm:$0x1] }
 0x18c   : > { %v903_v9 = vsel %vm5459_vm8, 0, %v902_v8 }
 0x18d   : > { %904 = vst [vmem:[#allocation2 + $0x74] sm:$0x1] %v903_v9 }
 0x18e   : > { %v5218_v60 = vmov 0  }
 0x18f   : > { %909 = vst [vmem:[#allocation2] sm:$0xf] %v5218_v60 }
 0x190   : > { %910 = vst [vmem:[#allocation2 + $0x4] sm:$0xf] %v5218_v60 }
 0x191   : > { %911 = vst [vmem:[#allocation2 + $0x8] sm:$0xf] %v5218_v60 }
 0x192 PF: > { %p4034_p2 = scmp.ne.s32.totalorder %s5193_s27, 1 }
 0x194   : > { %915 = sbr.rel (%p4034_p2) target bundleno = 413 (0x19d), region = 72 }
 0x199   : > { %v5219_v56 = vmov 0  }
 0x19a   : > { %917 = vst [vmem:[#allocation2 + $0x6c] sm:$0xf] %v5219_v56 }
 0x19b   : > { %918 = vst [vmem:[#allocation2 + $0x70] sm:$0xf] %v5219_v56 }
 0x19c   : > { %919 = vst [vmem:[#allocation2 + $0x74] sm:$0xf] %v5219_v56 }
 0x19d PF: > { %v4761_v15 = vld [vmem:[#allocation9 + $0x38] sm:$0xff]  ;;  %v4760_v13 = vld [vmem:[#allocation9 + $0x30] sm:$0xff]  ;;  %v4759_v18 = vld [vmem:[#allocation9 + $0x28] sm:$0xff]  ;;  %vm976_vm9 = vsmask.f32 3328  ;;  %vm1251_vm11 = vcmask 1042432  }
 0x19e   : > { %v4769_v10 = vld [vmem:[#allocation9 + $0x78] sm:$0xff]  ;;  %3204 = vmatpush.bf16.msra.mxu1 %v4761_v15  ;;  %v4768_v14 = vld [vmem:[#allocation9 + $0x70] sm:$0xff]  ;;  %v4767_v19 = vld [vmem:[#allocation9 + $0x68] sm:$0xff]  ;;  %vm977_vm10 = vsmask.f32 7440  ;;  %vm1252_vm12 = vcmask 1046532  }
 0x19f   : > { %v4809_v11 = vld [vmem:[#allocation9 + $0x1b8] sm:$0xff]  ;;  %3253 = vmatpush.bf16.msra.mxu2 %v4769_v10  ;;  %v4808_v16 = vld [vmem:[#allocation9 + $0x1b0] sm:$0xff]  ;;  %v4807_v20 = vld [vmem:[#allocation9 + $0x1a8] sm:$0xff]  ;;  %s4834_s17 = sshll.u32 %s5193_s27, 4  ;;  %s4670_s1 = sshll.u32 %s5197_s28, 5 }
 0x1a0   : > { %v4777_v12 = vld [vmem:[#allocation9 + $0xb8] sm:$0xff]  ;;  %3498 = vmatpush.bf16.msrb.mxu0 %v4809_v11  ;;  %v4776_v17 = vld [vmem:[#allocation9 + $0xb0] sm:$0xff]  ;;  %v4775_v21 = vld [vmem:[#allocation9 + $0xa8] sm:$0xff]  ;;  %s3863_s21 = sadd.s32 %s4834_s17, %s4670_s1  ;;  %s6136_s12 = sld [smem:[#allocation27_spill]] }
 0x1a1   : > { %3302 = vmatpush.bf16.msra.mxu3 %v4777_v12  ;;  %v4758_v22 = vld [vmem:[#allocation9 + $0x20] sm:$0xff]  ;;  %v920_v26 = vld [vmem:[#allocation2] sm:$0xf]  ;;  %v921_v27 = vld [vmem:[#allocation2 + $0x4] sm:$0xf]  ;;  %s4671_s3 = sshll.u32 %s3863_s21, 3 }
 0x1a2   : > { %3205 = vmatpush.bf16.msra.mxu1 %v4760_v13  ;;  %v4766_v23 = vld [vmem:[#allocation9 + $0x60] sm:$0xff]  ;;  %936 = vst [vmem:[#allocation3] sm:$0xf] %v920_v26  ;;  %v952_v28 = vld [vmem:[#allocation2] sm:$0xf]  ;;  %v4757_v29 = vld [vmem:[#allocation9 + $0x18] sm:$0xff] }
 0x1a3   : > { %3254 = vmatpush.bf16.msra.mxu2 %v4768_v14  ;;  %v4806_v24 = vld [vmem:[#allocation9 + $0x1a0] sm:$0xff]  ;;  %937 = vst [vmem:[#allocation3 + $0x24] sm:$0xf] %v921_v27  ;;  %v953_v30 = vld [vmem:[#allocation2 + $0x4] sm:$0xf]  ;;  %v4765_v32 = vld [vmem:[#allocation9 + $0x58] sm:$0xff] }
 0x1a4   : > { %3499 = vmatpush.bf16.msrb.mxu0 %v4808_v16  ;;  %v4774_v25 = vld [vmem:[#allocation9 + $0xa0] sm:$0xff]  ;;  %v954_v31 = vld [vmem:[#allocation2 + $0x8] sm:$0x1]  ;;  %v4805_v33 = vld [vmem:[#allocation9 + $0x198] sm:$0xff]  ;;  %v980_v35 = vshrl.u32 %v952_v28, 16  ;;  %v983_v36 = vshll.u32 %v952_v28, 16 }
 0x1a5   : > { %3303 = vmatpush.bf16.msra.mxu3 %v4776_v17  ;;  %v989_v37 = vshll.u32 %v953_v30, 16  ;;  %v993_v38 = vshrl.u32 %v953_v30, 16  ;;  %v4773_v39 = vld [vmem:[#allocation9 + $0x98] sm:$0xff]  ;;  %v999_v40 = vshll.u32 %v954_v31, 16  ;;  %v1760_v41 = vld [vmem:[#allocation2 + $0x18] sm:$0xf]  ;;  %vm5579_vm13 = vmor %vm1251_vm11, %vm1252_vm12 }
 0x1a6   : > { %3206 = vmatpush.bf16.msra.mxu1 %v4759_v18  ;;  %v1761_v42 = vld [vmem:[#allocation2 + $0x1c] sm:$0xf]  ;;  %v982_v43 = vrot.slane %v980_v35, 4  ;;  %v985_v44 = vrot.slane %v983_v36, 5  ;;  %1776 = vst [vmem:[#allocation3 + $0x18] sm:$0xf] %v1760_v41  ;;  %vm5585_vm14 = vmor %vm976_vm9, %vm977_vm10  ;;  %s3865_s23 = scalar_lea.hbm %s6136_s12, %s4671_s3 }
 0x1a7   : > { %3255 = vmatpush.bf16.msra.mxu2 %v4767_v19  ;;  %v991_v46 = vrot.slane %v989_v37, 5  ;;  %v995_v47 = vrot.slane %v993_v38, 4  ;;  %v4756_v48 = vld [vmem:[#allocation9 + $0x10] sm:$0xff]  ;;  %1777 = vst [vmem:[#allocation3 + $0x3c] sm:$0xf] %v1761_v42  ;;  %v1001_v52 = vrot.slane %v999_v40, 5 }
 0x1a8   : > { %3500 = vmatpush.bf16.msrb.mxu0 %v4807_v20  ;;  %v1203_v49 = vld [vmem:[#allocation2] sm:$0xe]  ;;  %v986_v50 = vor.u32 %v985_v44, %v982_v43  ;;  %v1204_v53 = vld [vmem:[#allocation2 + $0x4] sm:$0xf]  ;;  %v1205_v54 = vld [vmem:[#allocation2 + $0x8] sm:$0x1] }
 0x1a9   : > { %3304 = vmatpush.bf16.msra.mxu3 %v4775_v21  ;;  %v996_v51 = vor.u32 %v995_v47, %v991_v46  ;;  %v4035_v57 = vrot.slane %v1203_v49, 9  ;;  %v4764_v58 = vld [vmem:[#allocation9 + $0x50] sm:$0xff]  ;;  %v1256_v61 = vrot.slane %v1204_v53, 5  ;;  %v1259_v62 = vrot.slane %v1205_v54, 5  ;;  %v4755_v34 = vld [vmem:[#allocation9 + $0x8] sm:$0xff]  ;;  %v4754_v17 = vld [vmem:[#allocation9] sm:$0xff] }
 0x1aa   : > { %3207 = vmatpush.bf16.msra.mxu1 %v4758_v22  ;;  %v922_v63 = vld [vmem:[#allocation2 + $0xc] sm:$0xf]  ;;  %v987_v2 = vrot.slane %v986_v50, 4  ;;  %v4763_v4 = vld [vmem:[#allocation9 + $0x48] sm:$0xff]  ;;  %v956_v9 = vld [vmem:[#allocation2 + $0x10] sm:$0xf] }
 0x1ab   : > { %3256 = vmatpush.bf16.msra.mxu2 %v4766_v23  ;;  %v4804_v0 = vld [vmem:[#allocation9 + $0x190] sm:$0xff]  ;;  %v997_v3 = vrot.slane %v996_v51, 4  ;;  %v1257_v5 = vsel %vm5579_vm13, %v4035_v57, %v1256_v61  ;;  %v1258_v45 = vrot.slane %v1256_v61, 4  ;;  %938 = vst [vmem:[#allocation3 + $0x48] sm:$0xf] %v922_v63  ;;  %v4803_v12 = vld [vmem:[#allocation9 + $0x188] sm:$0xff] }
 0x1ac   : > { %3501 = vmatpush.bf16.msrb.mxu0 %v4806_v24  ;;  %v4772_v1 = vld [vmem:[#allocation9 + $0x90] sm:$0xff]  ;;  %v992_v7 = vsel %vm5585_vm14, %v987_v2, %v991_v46  ;;  %1326 = vst [vmem:[#allocation3 + $0x8] sm:$0xf] %v1257_v5  ;;  %v957_v60 = vld [vmem:[#allocation2 + $0x14] sm:$0x1]  ;;  %v4771_v13 = vld [vmem:[#allocation9 + $0x88] sm:$0xff] }
 0x1ad   : > { %3305 = vmatpush.bf16.msra.mxu3 %v4774_v25  ;;  %v955_v6 = vld [vmem:[#allocation2 + $0xc] sm:$0xf]  ;;  %v1002_v8 = vsel %vm5585_vm14, %v997_v3, %v1001_v52  ;;  %1187 = vst [vmem:[#allocation3 + $0x4] sm:$0xf] %v992_v7  ;;  %v1260_v56 = vsel %vm5579_vm13, %v1258_v45, %v1259_v62  ;;  %v923_v15 = vld [vmem:[#allocation2 + $0x10] sm:$0xf] }
 0x1ae   : > { %3208 = vmatpush.bf16.msra.mxu1 %v4757_v29  ;;  %v1004_v10 = vshrl.u32 %v955_v6, 16  ;;  %v1007_v11 = vshll.u32 %v955_v6, 16  ;;  %1188 = vst [vmem:[#allocation3 + $0x28] sm:$0xf] %v1002_v8  ;;  %v1013_v14 = vshll.u32 %v956_v9, 16  ;;  %v1017_v16 = vshrl.u32 %v956_v9, 16 }
 0x1af   : > { %3257 = vmatpush.bf16.msra.mxu2 %v4765_v32  ;;  %v4762_v18 = vld [vmem:[#allocation9 + $0x40] sm:$0xff]  ;;  %1327 = vst [vmem:[#allocation3 + $0x2c] sm:$0xf] %v1260_v56  ;;  %v1023_v23 = vshll.u32 %v957_v60, 16  ;;  %v4085_v26 = vld [vmem:[#allocation3 + $0x18] sm:$0xf] }
 0x1b0   : > { %3502 = vmatpush.bf16.msrb.mxu0 %v4805_v33  ;;  %v4061_v19 = vld [vmem:[#allocation3] sm:$0xf]  ;;  %v4686_v20 = vld [vmem:[#allocation3 + $0x20] sm:$0xf0]  ;;  %v1006_v21 = vrot.slane %v1004_v10, 4  ;;  %v1009_v22 = vrot.slane %v1007_v11, 5 }
 0x1b1   : > { %3306 = vmatpush.bf16.msra.mxu3 %v4773_v39  ;;  %v4802_v24 = vld [vmem:[#allocation9 + $0x180] sm:$0xff]  ;;  %939 = vst [vmem:[#allocation3 + $0x6c] sm:$0xf] %v923_v15  ;;  %v1015_v27 = vrot.slane %v1013_v14, 5  ;;  %v1019_v28 = vrot.slane %v1017_v16, 4  ;;  %v4793_v30 = vld [vmem:[#allocation9 + $0x138] sm:$0xff]  ;;  %v4062_v43 = vor.u32 %v4686_v20, %v4061_v19 }
 0x1b2   : > { %3209 = vmatpush.bf16.msra.mxu1 %v4756_v48  ;;  %v4770_v25 = vld [vmem:[#allocation9 + $0x80] sm:$0xff]  ;;  %v1762_v29 = vld [vmem:[#allocation2 + $0x24] sm:$0xf]  ;;  %v4689_v31 = vld [vmem:[#allocation3 + $0x38] sm:$0xf0]  ;;  %v1010_v32 = vor.u32 %v1009_v22, %v1006_v21  ;;  %v1025_v37 = vrot.slane %v1023_v23, 5 }
 0x1b3   : > { %3258 = vmatpush.bf16.msra.mxu2 %v4764_v58  ;;  %v1763_v33 = vld [vmem:[#allocation2 + $0x28] sm:$0xf]  ;;  %1778 = vst [vmem:[#allocation3 + $0x60] sm:$0xf] %v1762_v29  ;;  %v4785_v35 = vld [vmem:[#allocation9 + $0xf8] sm:$0xff]  ;;  %v1020_v36 = vor.u32 %v1019_v28, %v1015_v27  ;;  %v4086_v50 = vor.u32 %v4689_v31, %v4085_v26  ;;  %v4791_v60 = vld [vmem:[#allocation9 + $0x128] sm:$0xff] }
 0x1b4   : > { %3503 = vmatpush.bf16.msrb.mxu0 %v4804_v0  ;;  %1779 = vst [vmem:[#allocation3 + $0x84] sm:$0xf] %v1763_v33  ;;  %v1206_v38 = vld [vmem:[#allocation2 + $0xc] sm:$0xe]  ;;  %v4069_v39 = vld [vmem:[#allocation3 + $0x8] sm:$0xf] }
 0x1b5   : > { %3307 = vmatpush.bf16.msra.mxu3 %v4772_v1  ;;  %v1011_v40 = vrot.slane %v1010_v32, 4  ;;  %v1207_v41 = vld [vmem:[#allocation2 + $0x10] sm:$0xf]  ;;  %v4036_v42 = vrot.slane %v1206_v38, 9  ;;  %v4682_v44 = vld [vmem:[#allocation3 + $0x4] sm:$0xf] }
 0x1b6   : > { %3210 = vmatpush.bf16.msra.mxu1 %v4755_v34  ;;  %v1021_v46 = vrot.slane %v1020_v36, 4  ;;  %v1208_v47 = vld [vmem:[#allocation2 + $0x14] sm:$0x1]  ;;  %v1263_v48 = vrot.slane %v1207_v41, 5  ;;  %v4063_v49 = vld [vmem:[#allocation3 + $0x24] sm:$0xf0] }
 0x1b7   : > { %3259 = vmatpush.bf16.msra.mxu2 %v4763_v4  ;;  %v1016_v51 = vsel %vm5585_vm14, %v1011_v40, %v1015_v27  ;;  %v1266_v52 = vrot.slane %v1208_v47, 5  ;;  %v4066_v53 = vor.u32 %v4682_v44, %v4063_v49  ;;  %v4687_v54 = vld [vmem:[#allocation3 + $0x28] sm:$0xf0]  ;;  %v924_v61 = vld [vmem:[#allocation2 + $0x18] sm:$0xf]  ;;  %v4792_v63 = vld [vmem:[#allocation9 + $0x130] sm:$0xff] }
 0x1b8   : > { %3504 = vmatpush.bf16.msrb.mxu0 %v4803_v12  ;;  %v1026_v57 = vsel %vm5585_vm14, %v1021_v46, %v1025_v37  ;;  %1189 = vst [vmem:[#allocation3 + $0x4c] sm:$0xf] %v1016_v51  ;;  %v1264_v58 = vsel %vm5579_vm13, %v4036_v42, %v1263_v48  ;;  %v4070_v62 = vor.u32 %v4687_v54, %v4069_v39  ;;  %v1265_v0 = vrot.slane %v1263_v48, 4  ;;  %v4784_v1 = vld [vmem:[#allocation9 + $0xf0] sm:$0xff]  ;;  %v925_v2 = vld [vmem:[#allocation2 + $0x1c] sm:$0xf] }
 0x1b9   : > { %3308 = vmatpush.bf16.msra.mxu3 %v4771_v13  ;;  %1190 = vst [vmem:[#allocation3 + $0x70] sm:$0xf] %v1026_v57  ;;  %v958_v3 = vld [vmem:[#allocation2 + $0x18] sm:$0xf]  ;;  %v959_v4 = vld [vmem:[#allocation2 + $0x1c] sm:$0xf] }
 0x1ba   : > { %3211 = vmatpush.bf16.msra.mxu1 %v4754_v17  ;;  %1328 = vst [vmem:[#allocation3 + $0x50] sm:$0xf] %v1264_v58  ;;  %v1267_v34 = vsel %vm5579_vm13, %v1265_v0, %v1266_v52  ;;  %v960_v5 = vld [vmem:[#allocation2 + $0x20] sm:$0x1]  ;;  %v1028_v45 = vshrl.u32 %v958_v3, 16  ;;  %v1031_v6 = vshll.u32 %v958_v3, 16 }
 0x1bb   : > { %3260 = vmatpush.bf16.msra.mxu2 %v4762_v18  ;;  %940 = vst [vmem:[#allocation3 + $0x90] sm:$0xf] %v924_v61  ;;  %v1037_v7 = vshll.u32 %v959_v4, 16  ;;  %v1041_v8 = vshrl.u32 %v959_v4, 16  ;;  %v1047_v9 = vshll.u32 %v960_v5, 16  ;;  %v4783_v14 = vld [vmem:[#allocation9 + $0xe8] sm:$0xff] }
 0x1bc   : > { %3505 = vmatpush.bf16.msrb.mxu0 %v4802_v24  ;;  %1329 = vst [vmem:[#allocation3 + $0x74] sm:$0xf] %v1267_v34  ;;  %v1030_v56 = vrot.slane %v1028_v45, 4  ;;  %v1033_v15 = vrot.slane %v1031_v6, 5  ;;  %v1764_v10 = vld [vmem:[#allocation2 + $0x30] sm:$0xf] }
 0x1bd   : > { %3309 = vmatpush.bf16.msra.mxu3 %v4770_v25  ;;  %3212 = vmatmul.bf16.vlgmr.msra.gmra.mxu1 %v4062_v43  ;;  %941 = vst [vmem:[#allocation3 + $0xb4] sm:$0xf] %v925_v2  ;;  %v1765_v11 = vld [vmem:[#allocation2 + $0x34] sm:$0xf]  ;;  %v1039_v12 = vrot.slane %v1037_v7, 5  ;;  %v1043_v13 = vrot.slane %v1041_v8, 4 }
 0x1be   : > { %3351 = vmatpush.bf16.msrb.mxu1 %v4785_v35  ;;  %3261 = vmatmul.bf16.vlgmr.msra.gmra.mxu2 %v4066_v53  ;;  %v1034_v16 = vor.u32 %v1033_v15, %v1030_v56  ;;  %1780 = vst [vmem:[#allocation3 + $0xa8] sm:$0xf] %v1764_v10  ;;  %v1209_v17 = vld [vmem:[#allocation2 + $0x18] sm:$0xe]  ;;  %v4097_v18 = vld [vmem:[#allocation3 + $0x48] sm:$0xf] }
 0x1bf   : > { %3400 = vmatpush.bf16.msrb.mxu2 %v4793_v30  ;;  %3506 = vmatmul.bf16.vlgmr.msrb.gmra.mxu0 %v4086_v50  ;;  %v4695_v19 = vld [vmem:[#allocation3 + $0x68] sm:$0xf0]  ;;  %v4121_v20 = vld [vmem:[#allocation3 + $0x60] sm:$0xf]  ;;  %v4698_v21 = vld [vmem:[#allocation3 + $0x80] sm:$0xf0]  ;;  %v1044_v22 = vor.u32 %v1043_v13, %v1039_v12 }
 0x1c0   : > { %3310 = vmatmul.bf16.vlgmr.msra.gmra.mxu3 %v4070_v62  ;;  %v1049_v23 = vrot.slane %v1047_v9, 5  ;;  %1781 = vst [vmem:[#allocation3 + $0xcc] sm:$0xf] %v1765_v11  ;;  %v1210_v24 = vld [vmem:[#allocation2 + $0x1c] sm:$0xf]  ;;  %v1035_v26 = vrot.slane %v1034_v16, 4  ;;  %v4098_v42 = vor.u32 %v4695_v19, %v4097_v18  ;;  %v4122_v44 = vor.u32 %v4698_v21, %v4121_v20 }
 0x1c1   : > { %v4691_v25 = vld [vmem:[#allocation3 + $0x4c] sm:$0xf]  ;;  %v1211_v27 = vld [vmem:[#allocation2 + $0x20] sm:$0x1]  ;;  %v4037_v28 = vrot.slane %v1209_v17, 9  ;;  %v1045_v30 = vrot.slane %v1044_v22, 4 }
 0x1c2   : > { %3352 = vmatpush.bf16.msrb.mxu1 %v4784_v1  ;;  %v4099_v29 = vld [vmem:[#allocation3 + $0x6c] sm:$0xf0]  ;;  %v1270_v31 = vrot.slane %v1210_v24, 5  ;;  %v1273_v32 = vrot.slane %v1211_v27, 5  ;;  %v1040_v36 = vsel %vm5585_vm14, %v1035_v26, %v1039_v12  ;;  %v926_v37 = vld [vmem:[#allocation2 + $0x24] sm:$0xf] }
 0x1c3   : > { %3401 = vmatpush.bf16.msrb.mxu2 %v4792_v63  ;;  %v4105_v33 = vld [vmem:[#allocation3 + $0x50] sm:$0xf]  ;;  %v4696_v35 = vld [vmem:[#allocation3 + $0x70] sm:$0xf0]  ;;  %v1050_v38 = vsel %vm5585_vm14, %v1045_v30, %v1049_v23  ;;  %1191 = vst [vmem:[#allocation3 + $0x94] sm:$0xf] %v1040_v36  ;;  %v4102_v43 = vor.u32 %v4691_v25, %v4099_v29 }
 0x1c4   : > { %v1271_v39 = vsel %vm5579_vm13, %v4037_v28, %v1270_v31  ;;  %v1272_v40 = vrot.slane %v1270_v31, 4  ;;  %v961_v41 = vld [vmem:[#allocation2 + $0x24] sm:$0xf]  ;;  %1192 = vst [vmem:[#allocation3 + $0xb8] sm:$0xf] %v1050_v38  ;;  %v4106_v48 = vor.u32 %v4696_v35, %v4105_v33  ;;  %v4790_v0 = vld [vmem:[#allocation9 + $0x120] sm:$0xff] }
 0x1c5   : > { %v962_v46 = vld [vmem:[#allocation2 + $0x28] sm:$0xf]  ;;  %v963_v47 = vld [vmem:[#allocation2 + $0x2c] sm:$0x1]  ;;  %1330 = vst [vmem:[#allocation3 + $0x98] sm:$0xf] %v1271_v39 }
 0x1c6   : > { %3353 = vmatpush.bf16.msrb.mxu1 %v4783_v14  ;;  %v1274_v49 = vsel %vm5579_vm13, %v1272_v40, %v1273_v32  ;;  %v927_v50 = vld [vmem:[#allocation2 + $0x28] sm:$0xf]  ;;  %v1052_v51 = vshrl.u32 %v961_v41, 16  ;;  %v1055_v52 = vshll.u32 %v961_v41, 16  ;;  %v1061_v53 = vshll.u32 %v962_v46, 16  ;;  %v4782_v34 = vld [vmem:[#allocation9 + $0xe0] sm:$0xff] }
 0x1c7   : > { %3402 = vmatpush.bf16.msrb.mxu2 %v4791_v60  ;;  %1331 = vst [vmem:[#allocation3 + $0xbc] sm:$0xf] %v1274_v49  ;;  %v1065_v54 = vshrl.u32 %v962_v46, 16  ;;  %v1071_v61 = vshll.u32 %v963_v47, 16  ;;  %v1766_v2 = vld [vmem:[#allocation2 + $0x3c] sm:$0xf] }
 0x1c8   : > { %942 = vst [vmem:[#allocation3 + $0xd8] sm:$0xf] %v926_v37  ;;  %v1054_v57 = vrot.slane %v1052_v51, 4  ;;  %v1057_v58 = vrot.slane %v1055_v52, 5  ;;  %v1063_v62 = vrot.slane %v1061_v53, 5  ;;  %s3866_s27 = sshll.u32 %s5573_s29, 4  ;;  %s3867_s27 = int_to_ptr.vmem [resolvable:$true] %s3866_s27 }
 0x1c9   : > { %943 = vst [vmem:[#allocation3 + $0xfc] sm:$0xf] %v927_v50  ;;  %v1067_v63 = vrot.slane %v1065_v54, 4  ;;  %v1767_v3 = vld [vmem:[#allocation2 + $0x40] sm:$0xf]  ;;  %v1073_v5 = vrot.slane %v1071_v61, 5 }
 0x1ca   : > { %v1058_v1 = vor.u32 %v1057_v58, %v1054_v57  ;;  %1782 = vst [vmem:[#allocation3 + $0xf0] sm:$0xf] %v1766_v2  ;;  %v1212_v45 = vld [vmem:[#allocation2 + $0x24] sm:$0xe]  ;;  %3354 = vmatpush.bf16.msrb.mxu1 %v4782_v34  ;;  %v1213_v9 = vld [vmem:[#allocation2 + $0x28] sm:$0xf] }
 0x1cb   : > { %v1068_v4 = vor.u32 %v1067_v63, %v1063_v62  ;;  %3403 = vmatpush.bf16.msrb.mxu2 %v4790_v0  ;;  %1783 = vst [vmem:[#allocation3 + $0x114] sm:$0xf] %v1767_v3  ;;  %v4038_v7 = vrot.slane %v1212_v45, 9  ;;  %v1214_v56 = vld [vmem:[#allocation2 + $0x2c] sm:$0x1]  ;;  %v1277_v15 = vrot.slane %v1213_v9, 5 }
 0x1cc   : > { %v1059_v6 = vrot.slane %v1058_v1, 4  ;;  %v4133_v10 = vld [vmem:[#allocation3 + $0x90] sm:$0xf]  ;;  %v4704_v11 = vld [vmem:[#allocation3 + $0xb0] sm:$0xf0]  ;;  %v1280_v13 = vrot.slane %v1214_v56, 5 }
 0x1cd   : > { %3217 = vmatmul.bf16.gmra.mxu1 %v4098_v42  ;;  %v1069_v8 = vrot.slane %v1068_v4, 4  ;;  %v4700_v14 = vld [vmem:[#allocation3 + $0x94] sm:$0xf]  ;;  %v4135_v16 = vld [vmem:[#allocation3 + $0xb4] sm:$0xf0]  ;;  %v1278_v17 = vsel %vm5579_vm13, %v4038_v7, %v1277_v15  ;;  %v1279_v18 = vrot.slane %v1277_v15, 4  ;;  %v4134_v28 = vor.u32 %v4704_v11, %v4133_v10 }
 0x1ce   : > { %3266 = vmatmul.bf16.gmra.mxu2 %v4102_v43  ;;  %v1064_v60 = vsel %vm5585_vm14, %v1059_v6, %v1063_v62  ;;  %v4157_v19 = vld [vmem:[#allocation3 + $0xa8] sm:$0xf]  ;;  %v4707_v20 = vld [vmem:[#allocation3 + $0xc8] sm:$0xf0]  ;;  %1332 = vst [vmem:[#allocation3 + $0xe0] sm:$0xf] %v1278_v17  ;;  %v4138_v32 = vor.u32 %v4700_v14, %v4135_v16 }
 0x1cf   : > { %3511 = vmatmul.bf16.gmra.mxu0 %v4122_v44  ;;  %v1074_v12 = vsel %vm5585_vm14, %v1069_v8, %v1073_v5  ;;  %1193 = vst [vmem:[#allocation3 + $0xdc] sm:$0xf] %v1064_v60  ;;  %v928_v21 = vld [vmem:[#allocation2 + $0x30] sm:$0xf]  ;;  %v929_v22 = vld [vmem:[#allocation2 + $0x34] sm:$0xf]  ;;  %v1281_v24 = vsel %vm5579_vm13, %v1279_v18, %v1280_v13  ;;  %v4158_v38 = vor.u32 %v4707_v20, %v4157_v19 }
 0x1d0   : > { %3315 = vmatmul.bf16.gmra.mxu3 %v4106_v48  ;;  %1194 = vst [vmem:[#allocation3 + $0x100] sm:$0xf] %v1074_v12  ;;  %v4141_v23 = vld [vmem:[#allocation3 + $0x98] sm:$0xf]  ;;  %v4705_v26 = vld [vmem:[#allocation3 + $0xb8] sm:$0xf0] }
 0x1d1   : > { %944 = vst [vmem:[#allocation3 + $0x120] sm:$0xf] %v928_v21  ;;  %v964_v25 = vld [vmem:[#allocation2 + $0x30] sm:$0xf]  ;;  %v965_v27 = vld [vmem:[#allocation2 + $0x34] sm:$0xf]  ;;  %v4142_v39 = vor.u32 %v4705_v26, %v4141_v23 }
 0x1d2   : > { %1333 = vst [vmem:[#allocation3 + $0x104] sm:$0xf] %v1281_v24  ;;  %v966_v29 = vld [vmem:[#allocation2 + $0x38] sm:$0x1]  ;;  %v1076_v30 = vshrl.u32 %v964_v25, 16  ;;  %v1079_v31 = vshll.u32 %v964_v25, 16 }
 0x1d3   : > { %945 = vst [vmem:[#allocation3 + $0x144] sm:$0xf] %v929_v22  ;;  %v1085_v33 = vshll.u32 %v965_v27, 16  ;;  %v1089_v35 = vshrl.u32 %v965_v27, 16  ;;  %v1095_v36 = vshll.u32 %v966_v29, 16  ;;  %v4789_v50 = vld [vmem:[#allocation9 + $0x118] sm:$0xff] }
 0x1d4   : > { %v1768_v37 = vld [vmem:[#allocation2 + $0x48] sm:$0xf]  ;;  %v1078_v40 = vrot.slane %v1076_v30, 4  ;;  %v1081_v41 = vrot.slane %v1079_v31, 5  ;;  %v1769_v42 = vld [vmem:[#allocation2 + $0x4c] sm:$0xf]  ;;  %3404 = vmatpush.bf16.msrb.mxu2 %v4789_v50 }
 0x1d5   : > { %v1087_v43 = vrot.slane %v1085_v33, 5  ;;  %v1091_v44 = vrot.slane %v1089_v35, 4  ;;  %1784 = vst [vmem:[#allocation3 + $0x138] sm:$0xf] %v1768_v37  ;;  %v1215_v47 = vld [vmem:[#allocation2 + $0x30] sm:$0xe] }
 0x1d6   : > { %v1082_v46 = vor.u32 %v1081_v41, %v1078_v40  ;;  %v1097_v49 = vrot.slane %v1095_v36, 5  ;;  %1785 = vst [vmem:[#allocation3 + $0x15c] sm:$0xf] %v1769_v42  ;;  %v4039_v51 = vrot.slane %v1215_v47, 9  ;;  %v1216_v53 = vld [vmem:[#allocation2 + $0x34] sm:$0xf] }
 0x1d7   : > { %v1092_v48 = vor.u32 %v1091_v44, %v1087_v43  ;;  %v4781_v54 = vld [vmem:[#allocation9 + $0xd8] sm:$0xff]  ;;  %v1217_v58 = vld [vmem:[#allocation2 + $0x38] sm:$0x1]  ;;  %v1284_v61 = vrot.slane %v1216_v53, 5  ;;  %v930_v0 = vld [vmem:[#allocation2 + $0x3c] sm:$0xf] }
 0x1d8   : > { %v1083_v52 = vrot.slane %v1082_v46, 4  ;;  %v1287_v63 = vrot.slane %v1217_v58, 5  ;;  %3355 = vmatpush.bf16.msrb.mxu1 %v4781_v54  ;;  %v967_v34 = vld [vmem:[#allocation2 + $0x3c] sm:$0xf]  ;;  %v968_v4 = vld [vmem:[#allocation2 + $0x40] sm:$0xf] }
 0x1d9   : > { %v1093_v57 = vrot.slane %v1092_v48, 4  ;;  %v1285_v2 = vsel %vm5579_vm13, %v4039_v51, %v1284_v61  ;;  %v1286_v3 = vrot.slane %v1284_v61, 4  ;;  %v969_v5 = vld [vmem:[#allocation2 + $0x44] sm:$0x1]  ;;  %v931_v6 = vld [vmem:[#allocation2 + $0x40] sm:$0xf] }
 0x1da   : > { %v1088_v62 = vsel %vm5585_vm14, %v1083_v52, %v1087_v43  ;;  %1334 = vst [vmem:[#allocation3 + $0x128] sm:$0xf] %v1285_v2  ;;  %v1100_v7 = vshrl.u32 %v967_v34, 16  ;;  %v1103_v8 = vshll.u32 %v967_v34, 16  ;;  %v4169_v9 = vld [vmem:[#allocation3 + $0xd8] sm:$0xf] }
 0x1db   : > { %v1098_v1 = vsel %vm5585_vm14, %v1093_v57, %v1097_v49  ;;  %1195 = vst [vmem:[#allocation3 + $0x124] sm:$0xf] %v1088_v62  ;;  %v1288_v45 = vsel %vm5579_vm13, %v1286_v3, %v1287_v63  ;;  %v4713_v60 = vld [vmem:[#allocation3 + $0xf8] sm:$0xf0]  ;;  %v4171_v15 = vld [vmem:[#allocation3 + $0xfc] sm:$0xf0] }
 0x1dc   : > { %1196 = vst [vmem:[#allocation3 + $0x148] sm:$0xf] %v1098_v1  ;;  %v4709_v56 = vld [vmem:[#allocation3 + $0xdc] sm:$0xf]  ;;  %v1109_v10 = vshll.u32 %v968_v4, 16  ;;  %v1113_v11 = vshrl.u32 %v968_v4, 16 }
 0x1dd   : > { %3222 = vmatmul.bf16.gmra.mxu1 %v4134_v28  ;;  %1335 = vst [vmem:[#allocation3 + $0x14c] sm:$0xf] %v1288_v45  ;;  %v4193_v12 = vld [vmem:[#allocation3 + $0xf0] sm:$0xf]  ;;  %v4716_v13 = vld [vmem:[#allocation3 + $0x110] sm:$0xf0]  ;;  %v4170_v28 = vor.u32 %v4713_v60, %v4169_v9  ;;  %v4174_v29 = vor.u32 %v4709_v56, %v4171_v15 }
 0x1de   : > { %3271 = vmatmul.bf16.gmra.mxu2 %v4138_v32  ;;  %v4177_v14 = vld [vmem:[#allocation3 + $0xe0] sm:$0xf]  ;;  %946 = vst [vmem:[#allocation3 + $0x168] sm:$0xf] %v930_v0  ;;  %v1102_v16 = vrot.slane %v1100_v7, 4  ;;  %v1105_v17 = vrot.slane %v1103_v8, 5  ;;  %v4194_v33 = vor.u32 %v4716_v13, %v4193_v12 }
 0x1df   : > { %3516 = vmatmul.bf16.gmra.mxu0 %v4158_v38  ;;  %v1119_v18 = vshll.u32 %v969_v5, 16  ;;  %947 = vst [vmem:[#allocation3 + $0x18c] sm:$0xf] %v931_v6  ;;  %v1111_v19 = vrot.slane %v1109_v10, 5  ;;  %v1115_v20 = vrot.slane %v1113_v11, 4  ;;  %v4788_v46 = vld [vmem:[#allocation9 + $0x110] sm:$0xff] }
 0x1e0   : > { %3320 = vmatmul.bf16.gmra.mxu3 %v4142_v39  ;;  %v1770_v21 = vld [vmem:[#allocation2 + $0x54] sm:$0xf]  ;;  %v4714_v22 = vld [vmem:[#allocation3 + $0x100] sm:$0xf0]  ;;  %v1106_v23 = vor.u32 %v1105_v17, %v1102_v16  ;;  %v1771_v24 = vld [vmem:[#allocation2 + $0x58] sm:$0xf]  ;;  %3405 = vmatpush.bf16.msrb.mxu2 %v4788_v46 }
 0x1e1   : > { %1786 = vst [vmem:[#allocation3 + $0x180] sm:$0xf] %v1770_v21  ;;  %v1116_v25 = vor.u32 %v1115_v20, %v1111_v19  ;;  %v1121_v26 = vrot.slane %v1119_v18, 5  ;;  %v1218_v27 = vld [vmem:[#allocation2 + $0x3c] sm:$0xe]  ;;  %v4178_v35 = vor.u32 %v4714_v22, %v4177_v14  ;;  %v4780_v49 = vld [vmem:[#allocation9 + $0xd0] sm:$0xff] }
 0x1e2   : > { %1787 = vst [vmem:[#allocation3 + $0x1a4] sm:$0xf] %v1771_v24  ;;  %v1107_v30 = vrot.slane %v1106_v23, 4  ;;  %v1219_v31 = vld [vmem:[#allocation2 + $0x40] sm:$0xf]  ;;  %v4040_v32 = vrot.slane %v1218_v27, 9  ;;  %3356 = vmatpush.bf16.msrb.mxu1 %v4780_v49 }
 0x1e3   : > { %v1117_v36 = vrot.slane %v1116_v25, 4  ;;  %v1220_v37 = vld [vmem:[#allocation2 + $0x44] sm:$0x1]  ;;  %v1291_v38 = vrot.slane %v1219_v31, 5  ;;  %v970_v41 = vld [vmem:[#allocation2 + $0x48] sm:$0xf] }
 0x1e4   : > { %v1112_v39 = vsel %vm5585_vm14, %v1107_v30, %v1111_v19  ;;  %v1294_v40 = vrot.slane %v1220_v37, 5  ;;  %v1124_v47 = vshrl.u32 %v970_v41, 16  ;;  %v5637_v50 = vld [vmem:[#allocation9 + $0x1f8] sm:$0xff]  ;;  %v5639_v51 = vld [vmem:[#allocation9 + $0x1f0] sm:$0xff]  ;;  %v1127_v61 = vshll.u32 %v970_v41, 16  ;;  %v5643_v7 = vld [vmem:[#allocation9 + $0x1e8] sm:$0xff] }
 0x1e5   : > { %v1122_v42 = vsel %vm5585_vm14, %v1117_v36, %v1121_v26  ;;  %1197 = vst [vmem:[#allocation3 + $0x16c] sm:$0xf] %v1112_v39  ;;  %v1292_v43 = vsel %vm5579_vm13, %v4040_v32, %v1291_v38  ;;  %v1293_v44 = vrot.slane %v1291_v38, 4  ;;  %3547 = vmatpush.bf16.msra.mxu0 %v5637_v50  ;;  %v932_v52 = vld [vmem:[#allocation2 + $0x48] sm:$0xf]  ;;  %v4787_v38 = vld [vmem:[#allocation9 + $0x108] sm:$0xff] }
 0x1e6   : > { %1198 = vst [vmem:[#allocation3 + $0x190] sm:$0xf] %v1122_v42  ;;  %v933_v53 = vld [vmem:[#allocation2 + $0x4c] sm:$0xf]  ;;  %v972_v57 = vld [vmem:[#allocation2 + $0x50] sm:$0x1]  ;;  %3406 = vmatpush.bf16.msrb.mxu2 %v4787_v38 }
 0x1e7   : > { %v1295_v48 = vsel %vm5579_vm13, %v1293_v44, %v1294_v40  ;;  %1336 = vst [vmem:[#allocation3 + $0x170] sm:$0xf] %v1292_v43  ;;  %v971_v54 = vld [vmem:[#allocation2 + $0x4c] sm:$0xf]  ;;  %v1126_v58 = vrot.slane %v1124_v47, 4  ;;  %v1143_v0 = vshll.u32 %v972_v57, 16 }
 0x1e8   : > { %1337 = vst [vmem:[#allocation3 + $0x194] sm:$0xf] %v1295_v48  ;;  %v1133_v62 = vshll.u32 %v971_v54, 16  ;;  %v1137_v63 = vshrl.u32 %v971_v54, 16  ;;  %v1129_v1 = vrot.slane %v1127_v61, 5  ;;  %v4801_v40 = vld [vmem:[#allocation9 + $0x178] sm:$0xff] }
 0x1e9   : > { %948 = vst [vmem:[#allocation3 + $0x1b0] sm:$0xf] %v932_v52  ;;  %v1772_v2 = vld [vmem:[#allocation2 + $0x60] sm:$0xf]  ;;  %v4205_v3 = vld [vmem:[#allocation3 + $0x120] sm:$0xf]  ;;  %3548 = vmatpush.bf16.msra.mxu0 %v5639_v51  ;;  %3449 = vmatpush.bf16.msrb.mxu3 %v4801_v40 }
 0x1ea   : > { %949 = vst [vmem:[#allocation3 + $0x1d4] sm:$0xf] %v933_v53  ;;  %v4722_v34 = vld [vmem:[#allocation3 + $0x140] sm:$0xf0]  ;;  %v4207_v5 = vld [vmem:[#allocation3 + $0x144] sm:$0xf0]  ;;  %v1130_v15 = vor.u32 %v1129_v1, %v1126_v58 }
 0x1eb   : > { %v4718_v4 = vld [vmem:[#allocation3 + $0x124] sm:$0xf]  ;;  %v4229_v45 = vld [vmem:[#allocation3 + $0x138] sm:$0xf]  ;;  %v4725_v6 = vld [vmem:[#allocation3 + $0x158] sm:$0xf0]  ;;  %v4206_v22 = vor.u32 %v4722_v34, %v4205_v3 }
 0x1ec   : > { %v1135_v8 = vrot.slane %v1133_v62, 5  ;;  %v1139_v9 = vrot.slane %v1137_v63, 4  ;;  %v4213_v60 = vld [vmem:[#allocation3 + $0x128] sm:$0xf]  ;;  %v4723_v56 = vld [vmem:[#allocation3 + $0x148] sm:$0xf0]  ;;  %v4210_v23 = vor.u32 %v4718_v4, %v4207_v5  ;;  %v4230_v24 = vor.u32 %v4725_v6, %v4229_v45 }
 0x1ed   : > { %3227 = vmatmul.bf16.gmra.mxu1 %v4170_v28  ;;  %v1773_v10 = vld [vmem:[#allocation2 + $0x64] sm:$0xf]  ;;  %1788 = vst [vmem:[#allocation3 + $0x1c8] sm:$0xf] %v1772_v2  ;;  %v1145_v12 = vrot.slane %v1143_v0, 5  ;;  %v1131_v14 = vrot.slane %v1130_v15, 4  ;;  %3549 = vmatpush.bf16.msra.mxu0 %v5643_v7  ;;  %v4214_v26 = vor.u32 %v4723_v56, %v4213_v60 }
 0x1ee   : > { %3276 = vmatmul.bf16.gmra.mxu2 %v4174_v29  ;;  %v1140_v11 = vor.u32 %v1139_v9, %v1135_v8  ;;  %1789 = vst [vmem:[#allocation3 + $0x1ec] sm:$0xf] %v1773_v10  ;;  %v1221_v13 = vld [vmem:[#allocation2 + $0x48] sm:$0xe]  ;;  %v1222_v16 = vld [vmem:[#allocation2 + $0x4c] sm:$0xf] }
 0x1ef   : > { %3521 = vmatmul.bf16.gmra.mxu0 %v4194_v33  ;;  %v1223_v17 = vld [vmem:[#allocation2 + $0x50] sm:$0x1]  ;;  %v4041_v18 = vrot.slane %v1221_v13, 9  ;;  %v1298_v20 = vrot.slane %v1222_v16, 5  ;;  %v1136_v25 = vsel %vm5585_vm14, %v1131_v14, %v1135_v8  ;;  %v973_v30 = vld [vmem:[#allocation2 + $0x54] sm:$0xf] }
 0x1f0   : > { %3325 = vmatmul.bf16.gmra.mxu3 %v4178_v35  ;;  %v1141_v19 = vrot.slane %v1140_v11, 4  ;;  %v1301_v21 = vrot.slane %v1223_v17, 5  ;;  %1199 = vst [vmem:[#allocation3 + $0x1b4] sm:$0xf] %v1136_v25  ;;  %v974_v31 = vld [vmem:[#allocation2 + $0x58] sm:$0xf] }
 0x1f1   : > { %v1299_v28 = vsel %vm5579_vm13, %v4041_v18, %v1298_v20  ;;  %v1300_v29 = vrot.slane %v1298_v20, 4  ;;  %v1148_v32 = vshrl.u32 %v973_v30, 16  ;;  %v1151_v33 = vshll.u32 %v973_v30, 16  ;;  %v5652_v35 = vld [vmem:[#allocation9 + $0x1e0] sm:$0xff]  ;;  %v4779_v41 = vld [vmem:[#allocation9 + $0xc8] sm:$0xff]  ;;  %v5657_v46 = vld [vmem:[#allocation9 + $0x1d8] sm:$0xff] }
 0x1f2   : > { %v1146_v27 = vsel %vm5585_vm14, %v1141_v19, %v1145_v12  ;;  %1338 = vst [vmem:[#allocation3 + $0x1b8] sm:$0xf] %v1299_v28  ;;  %v1157_v37 = vshll.u32 %v974_v31, 16  ;;  %v1161_v44 = vshrl.u32 %v974_v31, 16  ;;  %3550 = vmatpush.bf16.msra.mxu0 %v5652_v35  ;;  %3357 = vmatpush.bf16.msrb.mxu1 %v4779_v41  ;;  %v4800_v47 = vld [vmem:[#allocation9 + $0x170] sm:$0xff]  ;;  %v4799_v34 = vld [vmem:[#allocation9 + $0x168] sm:$0xff] }
 0x1f3   : > { %1200 = vst [vmem:[#allocation3 + $0x1d8] sm:$0xf] %v1146_v27  ;;  %v1302_v36 = vsel %vm5579_vm13, %v1300_v29, %v1301_v21  ;;  %v1150_v39 = vrot.slane %v1148_v32, 4  ;;  %v1153_v42 = vrot.slane %v1151_v33, 5  ;;  %v934_v48 = vld [vmem:[#allocation2 + $0x54] sm:$0xf]  ;;  %3450 = vmatpush.bf16.msrb.mxu3 %v4800_v47 }
 0x1f4   : > { %1339 = vst [vmem:[#allocation3 + $0x1dc] sm:$0xf] %v1302_v36  ;;  %v1159_v43 = vrot.slane %v1157_v37, 5  ;;  %v1163_v52 = vrot.slane %v1161_v44, 4  ;;  %v935_v53 = vld [vmem:[#allocation2 + $0x58] sm:$0xf] }
 0x1f5   : > { %v1154_v49 = vor.u32 %v1153_v42, %v1150_v39  ;;  %950 = vst [vmem:[#allocation3 + $0x1f8] sm:$0xf] %v934_v48  ;;  %v975_v54 = vld [vmem:[#allocation2 + $0x5c] sm:$0x1]  ;;  %v5660_v58 = vld [vmem:[#allocation9 + $0x1d0] sm:$0xff]  ;;  %v5665_v12 = vld [vmem:[#allocation9 + $0x1c8] sm:$0xff] }
 0x1f6   : > { %951 = vst [vmem:[#allocation3 + $0x21c] sm:$0xf] %v935_v53  ;;  %v1164_v57 = vor.u32 %v1163_v52, %v1159_v43  ;;  %3551 = vmatpush.bf16.msra.mxu0 %v5657_v46  ;;  %v1167_v62 = vshll.u32 %v975_v54, 16  ;;  %v1774_v63 = vld [vmem:[#allocation2 + $0x6c] sm:$0xf]  ;;  %v4798_v18 = vld [vmem:[#allocation9 + $0x160] sm:$0xff] }
 0x1f7   : > { %v1155_v61 = vrot.slane %v1154_v49, 4  ;;  %v4241_v0 = vld [vmem:[#allocation3 + $0x168] sm:$0xf]  ;;  %v4731_v1 = vld [vmem:[#allocation3 + $0x188] sm:$0xf0]  ;;  %3451 = vmatpush.bf16.msrb.mxu3 %v4799_v34  ;;  %v5674_v31 = vld [vmem:[#allocation9 + $0x1c0] sm:$0xff] }
 0x1f8   : > { %v4727_v2 = vld [vmem:[#allocation3 + $0x16c] sm:$0xf]  ;;  %v4243_v3 = vld [vmem:[#allocation3 + $0x18c] sm:$0xf0]  ;;  %v1165_v4 = vrot.slane %v1164_v57, 4  ;;  %v1169_v56 = vrot.slane %v1167_v62, 5  ;;  %v4242_v19 = vor.u32 %v4731_v1, %v4241_v0 }
 0x1f9   : > { %v1775_v5 = vld [vmem:[#allocation2 + $0x70] sm:$0xf]  ;;  %v4265_v45 = vld [vmem:[#allocation3 + $0x180] sm:$0xf]  ;;  %v4734_v6 = vld [vmem:[#allocation3 + $0x1a0] sm:$0xf0]  ;;  %v1160_v60 = vsel %vm5585_vm14, %v1155_v61, %v1159_v43  ;;  %v4246_v20 = vor.u32 %v4727_v2, %v4243_v3 }
 0x1fa   : > { %v4249_v8 = vld [vmem:[#allocation3 + $0x170] sm:$0xf]  ;;  %v4732_v9 = vld [vmem:[#allocation3 + $0x190] sm:$0xf0]  ;;  %1790 = vst [vmem:[#allocation3 + $0x210] sm:$0xf] %v1774_v63  ;;  %3552 = vmatpush.bf16.msra.mxu0 %v5660_v58  ;;  %v1170_v13 = vsel %vm5585_vm14, %v1165_v4, %v1169_v56 }
 0x1fb   : > { %v1224_v15 = vld [vmem:[#allocation2 + $0x54] sm:$0xe]  ;;  %1201 = vst [vmem:[#allocation3 + $0x1fc] sm:$0xf] %v1160_v60  ;;  %v1225_v10 = vld [vmem:[#allocation2 + $0x58] sm:$0xf]  ;;  %3452 = vmatpush.bf16.msrb.mxu3 %v4798_v18 }
 0x1fc   : > { %v1226_v11 = vld [vmem:[#allocation2 + $0x5c] sm:$0x1]  ;;  %1791 = vst [vmem:[#allocation3 + $0x234] sm:$0xf] %v1775_v5  ;;  %v4042_v14 = vrot.slane %v1224_v15, 9  ;;  %v1305_v16 = vrot.slane %v1225_v10, 5 }
 0x1fd   : > { %3232 = vmatmul.bf16.gmra.mxu1 %v4206_v22  ;;  %v1308_v17 = vrot.slane %v1226_v11, 5  ;;  %1202 = vst [vmem:[#allocation3 + $0x220] sm:$0xf] %v1170_v13  ;;  %v1375_v25 = vld [vmem:[#allocation2 + $0xc] sm:$0xf]  ;;  %v4786_v36 = vld [vmem:[#allocation9 + $0x100] sm:$0xff] }
 0x1fe   : > { %3281 = vmatmul.bf16.gmra.mxu2 %v4210_v23  ;;  %v1306_v21 = vsel %vm5579_vm13, %v4042_v14, %v1305_v16  ;;  %v1307_v22 = vrot.slane %v1305_v16, 4  ;;  %v4266_v23 = vor.u32 %v4734_v6, %v4265_v45  ;;  %3553 = vmatpush.bf16.msra.mxu0 %v5665_v12  ;;  %v1400_v28 = vshrl.u32 %v1375_v25, 16  ;;  %v1792_v33 = vld [vmem:[#allocation2 + $0x18] sm:$0xf]  ;;  %v4825_v37 = vld [vmem:[#allocation9 + $0x238] sm:$0xff]  ;;  %v4824_v48 = vld [vmem:[#allocation9 + $0x230] sm:$0xff] }
 0x1ff   : > { %3526 = vmatmul.bf16.gmra.mxu0 %v4230_v24  ;;  %v4250_v24 = vor.u32 %v4732_v9, %v4249_v8  ;;  %1340 = vst [vmem:[#allocation3 + $0x200] sm:$0xf] %v1306_v21  ;;  %v1403_v29 = vshll.u32 %v1375_v25, 16  ;;  %v4797_v40 = vld [vmem:[#allocation9 + $0x158] sm:$0xff]  ;;  %v4778_v41 = vld [vmem:[#allocation9 + $0xc0] sm:$0xff]  ;;  %3407 = vmatpush.bf16.msrb.mxu2 %v4786_v36  ;;  %v1817_v47 = vshrl.u32 %v1792_v33, 16 }
 0x200   : > { %3330 = vmatmul.bf16.gmra.mxu3 %v4214_v26  ;;  %v1376_v26 = vld [vmem:[#allocation2 + $0x10] sm:$0xf]  ;;  %v1309_v27 = vsel %vm5579_vm13, %v1307_v22, %v1308_v17  ;;  %v1402_v38 = vrot.slane %v1400_v28, 4  ;;  %v4796_v49 = vld [vmem:[#allocation9 + $0x150] sm:$0xff]  ;;  %v1820_v53 = vshll.u32 %v1792_v33, 16  ;;  %3358 = vmatpush.bf16.msrb.mxu1 %v4778_v41  ;;  %v4823_v34 = vld [vmem:[#allocation9 + $0x228] sm:$0xff] }
 0x201   : > { %v1409_v30 = vshll.u32 %v1376_v26, 16  ;;  %1341 = vst [vmem:[#allocation3 + $0x224] sm:$0xf] %v1309_v27  ;;  %v1413_v32 = vshrl.u32 %v1376_v26, 16  ;;  %v1405_v39 = vrot.slane %v1403_v29, 5  ;;  %3453 = vmatpush.bf16.msrb.mxu3 %v4797_v40  ;;  %v1819_v61 = vrot.slane %v1817_v47, 4 }
 0x202   : > { %3554 = vmatpush.bf16.msra.mxu0 %v5674_v31  ;;  %v1377_v54 = vld [vmem:[#allocation2 + $0x14] sm:$0x1]  ;;  %v1793_v0 = vld [vmem:[#allocation2 + $0x1c] sm:$0xf]  ;;  %v1794_v1 = vld [vmem:[#allocation2 + $0x20] sm:$0x1] }
 0x203   : > { %v1411_v42 = vrot.slane %v1409_v30, 5  ;;  %v1415_v43 = vrot.slane %v1413_v32, 4  ;;  %v1406_v44 = vor.u32 %v1405_v39, %v1402_v38  ;;  %4843 = vmatpush.bf16.msra.mxu2 %v4825_v37  ;;  %v1419_v63 = vshll.u32 %v1377_v54, 16  ;;  %v4277_v2 = vld [vmem:[#allocation3 + $0x1b0] sm:$0xf]  ;;  %v4795_v56 = vld [vmem:[#allocation9 + $0x148] sm:$0xff] }
 0x204   : > { %4835 = vmatpush.bf16.msra.mxu1 %v5637_v50  ;;  %v4740_v3 = vld [vmem:[#allocation3 + $0x1d0] sm:$0xf0]  ;;  %v1344_v5 = vld [vmem:[#allocation2 + $0x10] sm:$0xf]  ;;  %v4301_v9 = vld [vmem:[#allocation3 + $0x1c8] sm:$0xf] }
 0x205   : > { %v1416_v52 = vor.u32 %v1415_v43, %v1411_v42  ;;  %v1407_v57 = vrot.slane %v1406_v44, 4  ;;  %v1343_v4 = vld [vmem:[#allocation2 + $0xc] sm:$0xf]  ;;  %v4279_v8 = vld [vmem:[#allocation3 + $0x1d4] sm:$0xf0]  ;;  %3454 = vmatpush.bf16.msrb.mxu3 %v4796_v49  ;;  %v1421_v15 = vrot.slane %v1419_v63, 5  ;;  %v4278_v25 = vor.u32 %v4740_v3, %v4277_v2 }
 0x206   : > { %3596 = vmatpush.bf16.msrb.mxu0 %v4825_v37  ;;  %v4736_v6 = vld [vmem:[#allocation3 + $0x1b4] sm:$0xf]  ;;  %v4743_v60 = vld [vmem:[#allocation3 + $0x1e8] sm:$0xf0]  ;;  %1359 = vst [vmem:[#allocation3 + $0xc] sm:$0xf] %v1343_v4 }
 0x207   : > { %v1417_v62 = vrot.slane %v1416_v52, 4  ;;  %v1412_v45 = vsel %vm5585_vm14, %v1407_v57, %v1411_v42  ;;  %v1822_v10 = vrot.slane %v1820_v53, 5  ;;  %v1826_v11 = vshll.u32 %v1793_v0, 16  ;;  %v4285_v50 = vld [vmem:[#allocation3 + $0x1b8] sm:$0xf]  ;;  %4844 = vmatpush.bf16.msra.mxu2 %v4824_v48  ;;  %v4822_v32 = vld [vmem:[#allocation9 + $0x220] sm:$0xff] }
 0x208   : > { %v4741_v13 = vld [vmem:[#allocation3 + $0x1d8] sm:$0xf0]  ;;  %1360 = vst [vmem:[#allocation3 + $0x30] sm:$0xf] %v1344_v5  ;;  %v1830_v14 = vshrl.u32 %v1793_v0, 16  ;;  %v1836_v16 = vshll.u32 %v1794_v1, 16  ;;  %4836 = vmatpush.bf16.msra.mxu1 %v5639_v51  ;;  %v4282_v29 = vor.u32 %v4736_v6, %v4279_v8  ;;  %v4302_v30 = vor.u32 %v4743_v60, %v4301_v9 }
 0x209   : > { %v1623_v17 = vld [vmem:[#allocation2 + $0xc] sm:$0xe]  ;;  %v1422_v18 = vsel %vm5585_vm14, %v1417_v62, %v1421_v15  ;;  %1607 = vst [vmem:[#allocation3 + $0x10] sm:$0xf] %v1412_v45  ;;  %v1624_v21 = vld [vmem:[#allocation2 + $0x10] sm:$0xf]  ;;  %3455 = vmatpush.bf16.msrb.mxu3 %v4795_v56  ;;  %v4286_v37 = vor.u32 %v4741_v13, %v4285_v50 }
 0x20a   : > { %3597 = vmatpush.bf16.msrb.mxu0 %v4824_v48  ;;  %v4043_v22 = vrot.slane %v1623_v17, 9  ;;  %1608 = vst [vmem:[#allocation3 + $0x34] sm:$0xf] %v1422_v18  ;;  %v1673_v27 = vrot.slane %v1624_v21, 5  ;;  %v1838_v36 = vrot.slane %v1836_v16, 5  ;;  %v4794_v42 = vld [vmem:[#allocation9 + $0x140] sm:$0xff] }
 0x20b   : > { %4845 = vmatpush.bf16.msra.mxu2 %v4823_v34  ;;  %v1378_v40 = vld [vmem:[#allocation2 + $0x18] sm:$0xf]  ;;  %v1379_v41 = vld [vmem:[#allocation2 + $0x1c] sm:$0xf]  ;;  %v4821_v52 = vld [vmem:[#allocation9 + $0x218] sm:$0xff]  ;;  %s3868_s28 = sshll.u32 %s3865_s23, 4  ;;  %s3869_s28 = int_to_ptr.hbm [resolvable:$true] %s3868_s28 }
 0x20c   : > { %v1674_v51 = vsel %vm5579_vm13, %v4043_v22, %v1673_v27  ;;  %v1675_v39 = vrot.slane %v1673_v27, 4  ;;  %4837 = vmatpush.bf16.msra.mxu1 %v5643_v7  ;;  %v1424_v47 = vshrl.u32 %v1378_v40, 16  ;;  %v1427_v48 = vshll.u32 %v1378_v40, 16  ;;  %v1380_v7 = vld [vmem:[#allocation2 + $0x20] sm:$0x1]  ;;  %v4820_v3 = vld [vmem:[#allocation9 + $0x210] sm:$0xff] }
 0x20d   : > { %3237 = vmatmul.bf16.gmra.mxu1 %v4242_v19  ;;  %v1823_v19 = vor.u32 %v1822_v10, %v1819_v61  ;;  %1743 = vst [vmem:[#allocation3 + $0x14] sm:$0xf] %v1674_v51  ;;  %v1433_v53 = vshll.u32 %v1379_v41, 16  ;;  %3456 = vmatpush.bf16.msrb.mxu3 %v4794_v42  ;;  %v2041_v62 = vld [vmem:[#allocation2 + $0x1c] sm:$0xf]  ;;  %v1437_v63 = vshrl.u32 %v1379_v41, 16 }
 0x20e   : > { %3286 = vmatmul.bf16.gmra.mxu2 %v4246_v20  ;;  %v1828_v20 = vrot.slane %v1826_v11, 5  ;;  %3598 = vmatpush.bf16.msrb.mxu0 %v4823_v34  ;;  %v1426_v54 = vrot.slane %v1424_v47, 4  ;;  %v1429_v57 = vrot.slane %v1427_v48, 5  ;;  %v1443_v0 = vshll.u32 %v1380_v7, 16  ;;  %v2040_v1 = vld [vmem:[#allocation2 + $0x18] sm:$0xe] }
 0x20f   : > { %3531 = vmatmul.bf16.gmra.mxu0 %v4266_v23  ;;  %v1832_v23 = vrot.slane %v1830_v14, 4  ;;  %v1824_v26 = vrot.slane %v1823_v19, 4  ;;  %v1435_v61 = vrot.slane %v1433_v53, 5  ;;  %4846 = vmatpush.bf16.msra.mxu2 %v4822_v32  ;;  %v2042_v2 = vld [vmem:[#allocation2 + $0x20] sm:$0x1]  ;;  %v4051_v4 = vrot.slane %v2040_v1, 9 }
 0x210   : > { %3335 = vmatmul.bf16.gmra.mxu3 %v4250_v24  ;;  %v1625_v24 = vld [vmem:[#allocation2 + $0x14] sm:$0x1]  ;;  %4838 = vmatpush.bf16.msra.mxu1 %v5652_v35  ;;  %v1430_v34 = vor.u32 %v1429_v57, %v1426_v54  ;;  %v2090_v5 = vrot.slane %v2041_v62, 5  ;;  %v1439_v45 = vrot.slane %v1437_v63, 4  ;;  %v1626_v6 = vld [vmem:[#allocation2 + $0x18] sm:$0xe] }
 0x211   : > { %v1676_v28 = vrot.slane %v1625_v24, 5  ;;  %v1833_v33 = vor.u32 %v1832_v23, %v1828_v20  ;;  %v1829_v38 = vsel %vm5585_vm14, %v1824_v26, %v1828_v20  ;;  %v1345_v8 = vld [vmem:[#allocation2 + $0x18] sm:$0xf]  ;;  %v2093_v60 = vrot.slane %v2042_v2, 5  ;;  %v1627_v56 = vld [vmem:[#allocation2 + $0x1c] sm:$0xf] }
 0x212   : > { %2024 = vst [vmem:[#allocation3 + $0x1c] sm:$0xf] %v1829_v38  ;;  %3599 = vmatpush.bf16.msrb.mxu0 %v4822_v32  ;;  %v1431_v9 = vrot.slane %v1430_v34, 4  ;;  %v4313_v15 = vld [vmem:[#allocation3 + $0x1f8] sm:$0xf]  ;;  %v4819_v13 = vld [vmem:[#allocation9 + $0x208] sm:$0xff]  ;;  %v1440_v35 = vor.u32 %v1439_v45, %v1435_v61  ;;  %v2091_v17 = vsel %vm5579_vm13, %v4051_v4, %v2090_v5 }
 0x213   : > { %v1834_v43 = vrot.slane %v1833_v33, 4  ;;  %v1677_v44 = vsel %vm5579_vm13, %v1675_v39, %v1676_v28  ;;  %4847 = vmatpush.bf16.msra.mxu2 %v4821_v52  ;;  %v4749_v10 = vld [vmem:[#allocation3 + $0x218] sm:$0xf0]  ;;  %v4315_v50 = vld [vmem:[#allocation3 + $0x21c] sm:$0xf0]  ;;  %v1445_v16 = vrot.slane %v1443_v0, 5 }
 0x214   : > { %1744 = vst [vmem:[#allocation3 + $0x38] sm:$0xf] %v1677_v44  ;;  %v4745_v11 = vld [vmem:[#allocation3 + $0x1fc] sm:$0xf]  ;;  %v1346_v14 = vld [vmem:[#allocation2 + $0x1c] sm:$0xf]  ;;  %4839 = vmatpush.bf16.msra.mxu1 %v5657_v46  ;;  %v1436_v21 = vsel %vm5585_vm14, %v1431_v9, %v1435_v61  ;;  %v4314_v33 = vor.u32 %v4749_v10, %v4313_v15 }
 0x215   : > { %v1839_v49 = vsel %vm5585_vm14, %v1834_v43, %v1838_v36  ;;  %1361 = vst [vmem:[#allocation3 + $0x54] sm:$0xf] %v1345_v8  ;;  %v4337_v18 = vld [vmem:[#allocation3 + $0x210] sm:$0xf]  ;;  %v4752_v19 = vld [vmem:[#allocation3 + $0x230] sm:$0xf0]  ;;  %v4318_v36 = vor.u32 %v4745_v11, %v4315_v50 }
 0x216   : > { %2025 = vst [vmem:[#allocation3 + $0x40] sm:$0xf] %v1839_v49  ;;  %3600 = vmatpush.bf16.msrb.mxu0 %v4821_v52  ;;  %v4321_v20 = vld [vmem:[#allocation3 + $0x200] sm:$0xf]  ;;  %v2092_v22 = vrot.slane %v2090_v5, 4  ;;  %v4044_v23 = vrot.slane %v1626_v6, 9  ;;  %v4338_v38 = vor.u32 %v4752_v19, %v4337_v18 }
 0x217   : > { %1362 = vst [vmem:[#allocation3 + $0x78] sm:$0xf] %v1346_v14  ;;  %v1441_v24 = vrot.slane %v1440_v35, 4  ;;  %v1680_v26 = vrot.slane %v1627_v56, 5  ;;  %v4750_v27 = vld [vmem:[#allocation3 + $0x220] sm:$0xf0]  ;;  %4848 = vmatpush.bf16.msra.mxu2 %v4820_v3 }
 0x218   : > { %1609 = vst [vmem:[#allocation3 + $0x58] sm:$0xf] %v1436_v21  ;;  %v2094_v28 = vsel %vm5579_vm13, %v2092_v22, %v2093_v60  ;;  %4840 = vmatpush.bf16.msra.mxu1 %v5660_v58  ;;  %v4322_v51 = vor.u32 %v4750_v27, %v4321_v20  ;;  %v1381_v40 = vld [vmem:[#allocation2 + $0x24] sm:$0xf]  ;;  %v1382_v41 = vld [vmem:[#allocation2 + $0x28] sm:$0xf] }
 0x219   : > { %2160 = vst [vmem:[#allocation3 + $0x20] sm:$0xf] %v2091_v17  ;;  %v1446_v46 = vsel %vm5585_vm14, %v1441_v24, %v1445_v16  ;;  %v1682_v32 = vrot.slane %v1680_v26, 4  ;;  %v1448_v42 = vshrl.u32 %v1381_v40, 16  ;;  %v1451_v43 = vshll.u32 %v1381_v40, 16  ;;  %s3851_s9 = scalar_lea.sflag [#allocation6], %s5387_s14 }
 0x21a   : > { %3601 = vmatpush.bf16.msrb.mxu0 %v4820_v3  ;;  %2161 = vst [vmem:[#allocation3 + $0x44] sm:$0xf] %v2094_v28  ;;  %v1457_v44 = vshll.u32 %v1382_v41, 16  ;;  %v1461_v47 = vshrl.u32 %v1382_v41, 16  ;;  %v1383_v49 = vld [vmem:[#allocation2 + $0x2c] sm:$0x1] }
 0x21b   : > { %1610 = vst [vmem:[#allocation3 + $0x7c] sm:$0xf] %v1446_v46  ;;  %4849 = vmatpush.bf16.msra.mxu2 %v4819_v13  ;;  %v1450_v58 = vrot.slane %v1448_v42, 4  ;;  %v1453_v48 = vrot.slane %v1451_v43, 5  ;;  %v1467_v54 = vshll.u32 %v1383_v49, 16  ;;  %s5117_s10 = sshra.s32 %s3869_s28, 4  ;;  %s5118_s10 = int_to_ptr.hbm [resolvable:$true] %s5117_s10 }
 0x21c   : > { %4841 = vmatpush.bf16.msra.mxu1 %v5665_v12  ;;  %v1459_v52 = vrot.slane %v1457_v44, 5  ;;  %v1463_v53 = vrot.slane %v1461_v47, 4  ;;  %v1630_v61 = vld [vmem:[#allocation2 + $0x28] sm:$0xf]  ;;  %v1629_v1 = vld [vmem:[#allocation2 + $0x24] sm:$0xe]  ;;  %p5124_p12 = scmp.lt.s32.totalorder %s5118_s10, %s6136_s12 }
 0x21d   : > { %3242 = vmatmul.bf16.gmra.mxu1 %v4278_v25  ;;  %v1628_v25 = vld [vmem:[#allocation2 + $0x20] sm:$0x1]  ;;  %v1454_v7 = vor.u32 %v1453_v48, %v1450_v58  ;;  %v1469_v63 = vrot.slane %v1467_v54, 5  ;;  %v1687_v0 = vrot.slane %v1630_v61, 5  ;;  %v1347_v2 = vld [vmem:[#allocation2 + $0x24] sm:$0xf] }
 0x21e   : > { %3291 = vmatmul.bf16.gmra.mxu2 %v4282_v29  ;;  %v1683_v29 = vrot.slane %v1628_v25, 5  ;;  %3602 = vmatpush.bf16.msrb.mxu0 %v4819_v13  ;;  %v1464_v57 = vor.u32 %v1463_v53, %v1459_v52  ;;  %v1348_v3 = vld [vmem:[#allocation2 + $0x28] sm:$0xf]  ;;  %v1631_v4 = vld [vmem:[#allocation2 + $0x2c] sm:$0x1]  ;;  %v4045_v8 = vrot.slane %v1629_v1, 9 }
 0x21f   : > { %3536 = vmatmul.bf16.gmra.mxu0 %v4302_v30  ;;  %v1681_v30 = vsel %vm5579_vm13, %v4044_v23, %v1680_v26  ;;  %v1455_v62 = vrot.slane %v1454_v7, 4  ;;  %v4683_v5 = vld [vmem:[#allocation3 + $0xc] sm:$0xf]  ;;  %v4071_v45 = vld [vmem:[#allocation3 + $0x2c] sm:$0xf0]  ;;  %v1689_v9 = vrot.slane %v1687_v0, 4 }
 0x220   : > { %3340 = vmatmul.bf16.gmra.mxu3 %v4286_v37  ;;  %v4818_v37 = vld [vmem:[#allocation9 + $0x200] sm:$0xff]  ;;  %v1684_v39 = vsel %vm5579_vm13, %v1682_v32, %v1683_v29  ;;  %1745 = vst [vmem:[#allocation3 + $0x5c] sm:$0xf] %v1681_v30  ;;  %4842 = vmatpush.bf16.msra.mxu1 %v5674_v31  ;;  %v1465_v12 = vrot.slane %v1464_v57, 4  ;;  %v1690_v31 = vrot.slane %v1631_v4, 5  ;;  %v1688_v11 = vsel %vm5579_vm13, %v4045_v8, %v1687_v0  ;;  %s5119_s5 = scalar_lea.hbm %s5118_s10, 128 }
 0x221   : > { %1746 = vst [vmem:[#allocation3 + $0x80] sm:$0xf] %v1684_v39  ;;  %4850 = vmatpush.bf16.msra.mxu2 %v4818_v37  ;;  %v1460_v34 = vsel %vm5585_vm14, %v1455_v62, %v1459_v52  ;;  %v4077_v60 = vld [vmem:[#allocation3 + $0x10] sm:$0xf]  ;;  %v4688_v56 = vld [vmem:[#allocation3 + $0x30] sm:$0xf0]  ;;  %v4074_v16 = vor.u32 %v4683_v5, %v4071_v45  ;;  %p5120_p4 = scmp.ne.s32.totalorder %s5118_s10, %s5119_s5 }
 0x222   : > { %3603 = vmatpush.bf16.msrb.mxu0 %v4818_v37  ;;  %1363 = vst [vmem:[#allocation3 + $0x9c] sm:$0xf] %v1347_v2  ;;  %v1470_v6 = vsel %vm5585_vm14, %v1465_v12, %v1469_v63  ;;  %v4685_v15 = vld [vmem:[#allocation3 + $0x1c] sm:$0xf]  ;;  %v4684_v10 = vld [vmem:[#allocation3 + $0x14] sm:$0xf]  ;;  %v1691_v50 = vsel %vm5579_vm13, %v1689_v9, %v1690_v31  ;;  %v4078_v17 = vor.u32 %v4688_v56, %v4077_v60 }
 0x223   : > { %1364 = vst [vmem:[#allocation3 + $0xc0] sm:$0xf] %v1348_v3  ;;  %v4087_v13 = vld [vmem:[#allocation3 + $0x3c] sm:$0xf0]  ;;  %v4079_v14 = vld [vmem:[#allocation3 + $0x34] sm:$0xf0]  ;;  %p5121_p8 = pnand %p5120_p4, %p5366_p3 }
 0x224   : > { %1611 = vst [vmem:[#allocation3 + $0xa0] sm:$0xf] %v1460_v34  ;;  %v5720_v35 = vld [vmem:[%s6089_s4] ss:$0 sm:$0xff]  ;;  %v4090_v19 = vor.u32 %v4685_v15, %v4087_v13  ;;  %v4082_v20 = vor.u32 %v4684_v10, %v4079_v14  ;;  %v1384_v21 = vld [vmem:[#allocation2 + $0x30] sm:$0xf] }
 0x225   : > { %1612 = vst [vmem:[#allocation3 + $0xc4] sm:$0xf] %v1470_v6  ;;  %v1385_v22 = vld [vmem:[#allocation2 + $0x34] sm:$0xf]  ;;  %v1472_v24 = vshrl.u32 %v1384_v21, 16  ;;  %v1475_v25 = vshll.u32 %v1384_v21, 16  ;;  %p5122_p11 = pneg %p5121_p8 }
 0x226   : > { %1747 = vst [vmem:[#allocation3 + $0xa4] sm:$0xf] %v1688_v11  ;;  %v1481_v26 = vshll.u32 %v1385_v22, 16  ;;  %v1485_v27 = vshrl.u32 %v1385_v22, 16  ;;  %v1386_v32 = vld [vmem:[#allocation2 + $0x38] sm:$0x1] }
 0x227   : > { %1748 = vst [vmem:[#allocation3 + $0xc8] sm:$0xf] %v1691_v50  ;;  %v1474_v29 = vrot.slane %v1472_v24, 4  ;;  %v1477_v46 = vrot.slane %v1475_v25, 5  ;;  %v1491_v37 = vshll.u32 %v1386_v32, 16 }
 0x228   : > { %v1483_v30 = vrot.slane %v1481_v26, 5  ;;  %v1633_v39 = vld [vmem:[#allocation2 + $0x34] sm:$0xf]  ;;  %v1632_v58 = vld [vmem:[#allocation2 + $0x30] sm:$0xe] }
 0x229   : > { %v1493_v43 = vrot.slane %v1491_v37, 5  ;;  %v1634_v48 = vld [vmem:[#allocation2 + $0x38] sm:$0x1]  ;;  %v1694_v49 = vrot.slane %v1633_v39, 5  ;;  %v1349_v7 = vld [vmem:[#allocation2 + $0x30] sm:$0xf] }
 0x22a   : > { %v1350_v54 = vld [vmem:[#allocation2 + $0x34] sm:$0xf]  ;;  %v4046_v61 = vrot.slane %v1632_v58, 9  ;;  %v4692_v62 = vld [vmem:[#allocation3 + $0x54] sm:$0xf]  ;;  %v1697_v1 = vrot.slane %v1634_v48, 5 }
 0x22b   : > { %v4107_v63 = vld [vmem:[#allocation3 + $0x74] sm:$0xf0]  ;;  %1365 = vst [vmem:[#allocation3 + $0xe4] sm:$0xf] %v1349_v7  ;;  %v1696_v12 = vrot.slane %v1694_v49, 4 }
 0x22c   : > { %v4113_v2 = vld [vmem:[#allocation3 + $0x58] sm:$0xf]  ;;  %v4093_v3 = vld [vmem:[#allocation3 + $0x20] sm:$0xf]  ;;  %1366 = vst [vmem:[#allocation3 + $0x108] sm:$0xf] %v1350_v54  ;;  %v1695_v34 = vsel %vm5579_vm13, %v4046_v61, %v1694_v49  ;;  %v4110_v15 = vor.u32 %v4692_v62, %v4107_v63 }
 0x22d   : > { %3247 = vmatmul.bf16.gmra.mxu1 %v4314_v33  ;;  %v1487_v33 = vrot.slane %v1485_v27, 4  ;;  %v4697_v4 = vld [vmem:[#allocation3 + $0x78] sm:$0xf0]  ;;  %v4690_v5 = vld [vmem:[#allocation3 + $0x40] sm:$0xf0]  ;;  %v1698_v45 = vsel %vm5579_vm13, %v1696_v12, %v1697_v1 }
 0x22e   : > { %3296 = vmatmul.bf16.gmra.mxu2 %v4318_v36  ;;  %v1478_v36 = vor.u32 %v1477_v46, %v1474_v29  ;;  %v4693_v8 = vld [vmem:[#allocation3 + $0x5c] sm:$0xf]  ;;  %v4115_v9 = vld [vmem:[#allocation3 + $0x7c] sm:$0xf0]  ;;  %1749 = vst [vmem:[#allocation3 + $0xec] sm:$0xf] %v1695_v34  ;;  %v4114_v10 = vor.u32 %v4697_v4, %v4113_v2  ;;  %v4094_v50 = vor.u32 %v4690_v5, %v4093_v3 }
 0x22f   : > { %3541 = vmatmul.bf16.gmra.mxu0 %v4338_v38  ;;  %1750 = vst [vmem:[#allocation3 + $0x110] sm:$0xf] %v1698_v45  ;;  %v4118_v13 = vor.u32 %v4693_v8, %v4115_v9  ;;  %v1387_v14 = vld [vmem:[#allocation2 + $0x3c] sm:$0xf]  ;;  %v1389_v27 = vld [vmem:[#allocation2 + $0x44] sm:$0x1] }
 0x230   : > { %3345 = vmatmul.bf16.gmra.mxu3 %v4322_v51  ;;  %v1488_v51 = vor.u32 %v1487_v33, %v1483_v30  ;;  %v1479_v42 = vrot.slane %v1478_v36, 4  ;;  %v1636_v36 = vld [vmem:[#allocation2 + $0x40] sm:$0xf]  ;;  %v1351_v48 = vld [vmem:[#allocation2 + $0x3c] sm:$0xf] }
 0x231   : > { %v1352_v49 = vld [vmem:[#allocation2 + $0x40] sm:$0xf]  ;;  %1367 = vst [vmem:[#allocation3 + $0x12c] sm:$0xf] %v1351_v48  ;;  %v4701_v63 = vld [vmem:[#allocation3 + $0x9c] sm:$0xf] }
 0x232   : > { %v1489_v47 = vrot.slane %v1488_v51, 4  ;;  %v1484_v57 = vsel %vm5585_vm14, %v1479_v42, %v1483_v30  ;;  %v1515_v30 = vshll.u32 %v1389_v27, 16  ;;  %v1635_v42 = vld [vmem:[#allocation2 + $0x3c] sm:$0xe]  ;;  %1368 = vst [vmem:[#allocation3 + $0x150] sm:$0xf] %v1352_v49 }
 0x233   : > { %1613 = vst [vmem:[#allocation3 + $0xe8] sm:$0xf] %v1484_v57  ;;  %v4047_v54 = vrot.slane %v1635_v42, 9  ;;  %v4149_v1 = vld [vmem:[#allocation3 + $0xa0] sm:$0xf] }
 0x234   : > { %v1494_v0 = vsel %vm5585_vm14, %v1489_v47, %v1493_v43  ;;  %v1517_v39 = vrot.slane %v1515_v30, 5  ;;  %v1637_v43 = vld [vmem:[#allocation2 + $0x44] sm:$0x1]  ;;  %v4706_v2 = vld [vmem:[#allocation3 + $0xc0] sm:$0xf0] }
 0x235   : > { %1614 = vst [vmem:[#allocation3 + $0x10c] sm:$0xf] %v1494_v0  ;;  %v1704_v62 = vrot.slane %v1637_v43, 5  ;;  %v4143_v0 = vld [vmem:[#allocation3 + $0xbc] sm:$0xf0] }
 0x236   : > { %v4702_v4 = vld [vmem:[#allocation3 + $0xa4] sm:$0xf]  ;;  %v4151_v5 = vld [vmem:[#allocation3 + $0xc4] sm:$0xf0]  ;;  %v4146_v9 = vor.u32 %v4701_v63, %v4143_v0  ;;  %v1639_v30 = vld [vmem:[#allocation2 + $0x4c] sm:$0xf] }
 0x237   : > { %v1354_v48 = vld [vmem:[#allocation2 + $0x4c] sm:$0xf]  ;;  %v4179_v63 = vld [vmem:[#allocation3 + $0x104] sm:$0xf0] }
 0x238   : > { %1370 = vst [vmem:[#allocation3 + $0x198] sm:$0xf] %v1354_v48 }
 0x23a   : > { %v3213_v18 = vpop.f32.mrf.mxu1 }
 0x23b   : > { %v3214_v28 = vadd.f32 %v5720_v35, %v3213_v18 }
 0x23c   : > { %v5722_v23 = vpop.f32.mrf.mxu0 }
 0x23d   : > { %3359 = vmatmul.bf16.vlgmr.msrb.gmra.mxu1 %v4074_v16  ;;  %v1388_v16 = vld [vmem:[#allocation2 + $0x40] sm:$0xf] }
 0x23e   : > { %3408 = vmatmul.bf16.vlgmr.msrb.gmra.mxu2 %v4078_v17  ;;  %v1505_v21 = vshll.u32 %v1388_v16, 16  ;;  %v1509_v22 = vshrl.u32 %v1388_v16, 16 }
 0x23f   : > { %3555 = vmatmul.bf16.vlgmr.msra.gmra.mxu0 %v4090_v19  ;;  %v1496_v19 = vshrl.u32 %v1387_v14, 16 }
 0x240   : > { %3457 = vmatmul.bf16.vlgmr.msrb.gmra.mxu3 %v4082_v20  ;;  %v1499_v20 = vshll.u32 %v1387_v14, 16  ;;  %v1511_v29 = vrot.slane %v1509_v22, 4 }
 0x241   : > { %v3262_v38 = vpop.f32.mrf.mxu2  ;;  %v1498_v25 = vrot.slane %v1496_v19, 4 }
 0x242   : > { %v3263_v40 = vadd.f32 %v3262_v38, %v3214_v28  ;;  %v3215_v44 = vpop.f32.mrf.mxu1  ;;  %v1501_v26 = vrot.slane %v1499_v20, 5  ;;  %v1507_v28 = vrot.slane %v1505_v21, 5 }
 0x243   : > { %v3311_v41 = vpop.f32.mrf.mxu3  ;;  %v3216_v6 = vadd.f32 %v5720_v35, %v3215_v44  ;;  %v1701_v44 = vrot.slane %v1636_v36, 5 }
 0x244   : > { %v5725_v52 = vadd.f32 %v3311_v41, %v3263_v40  ;;  %v5727_v53 = vpop.f32.mrf.mxu0  ;;  %v1502_v46 = vor.u32 %v1501_v26, %v1498_v25  ;;  %v1512_v33 = vor.u32 %v1511_v29, %v1507_v28 }
 0x245   : > { %v1703_v61 = vrot.slane %v1701_v44, 4  ;;  %v1702_v12 = vsel %vm5579_vm13, %v4047_v54, %v1701_v44  ;;  %v1353_v44 = vld [vmem:[#allocation2 + $0x48] sm:$0xf] }
 0x246   : > { %v1503_v51 = vrot.slane %v1502_v46, 4  ;;  %v1513_v41 = vrot.slane %v1512_v33, 4  ;;  %1751 = vst [vmem:[#allocation3 + $0x134] sm:$0xf] %v1702_v12  ;;  %v4185_v12 = vld [vmem:[#allocation3 + $0xe8] sm:$0xf] }
 0x247   : > { %v1705_v3 = vsel %vm5579_vm13, %v1703_v61, %v1704_v62  ;;  %1369 = vst [vmem:[#allocation3 + $0x174] sm:$0xf] %v1353_v44  ;;  %v4710_v62 = vld [vmem:[#allocation3 + $0xe4] sm:$0xf] }
 0x248   : > { %v1508_v7 = vsel %vm5585_vm14, %v1503_v51, %v1507_v28  ;;  %v1518_v57 = vsel %vm5585_vm14, %v1513_v41, %v1517_v39  ;;  %1752 = vst [vmem:[#allocation3 + $0x158] sm:$0xf] %v1705_v3  ;;  %v1638_v39 = vld [vmem:[#allocation2 + $0x48] sm:$0xe]  ;;  %v1708_v41 = vrot.slane %v1639_v30, 5 }
 0x249   : > { %v3264_v31 = vpop.f32.mrf.mxu2  ;;  %1615 = vst [vmem:[#allocation3 + $0x130] sm:$0xf] %v1508_v7  ;;  %v4048_v7 = vrot.slane %v1638_v39, 9 }
 0x24a   : > { %v3265_v60 = vadd.f32 %v3264_v31, %v3216_v6  ;;  %v3218_v11 = vpop.f32.mrf.mxu1  ;;  %1616 = vst [vmem:[#allocation3 + $0x154] sm:$0xf] %v1518_v57  ;;  %v4150_v31 = vor.u32 %v4706_v2, %v4149_v1  ;;  %v1710_v57 = vrot.slane %v1708_v41, 4  ;;  %v4715_v1 = vld [vmem:[#allocation3 + $0x108] sm:$0xf0] }
 0x24b   : > { %v3313_v56 = vpop.f32.mrf.mxu3  ;;  %v3219_v24 = vadd.f32 %v5720_v35, %v3218_v11  ;;  %v1709_v0 = vsel %vm5579_vm13, %v4048_v7, %v1708_v41  ;;  %v1643_v41 = vld [vmem:[#allocation2 + $0x5c] sm:$0x1]  ;;  %v1355_v7 = vld [vmem:[#allocation2 + $0x54] sm:$0xf] }
 0x24c   : > { %v5738_v17 = vadd.f32 %v3313_v56, %v3265_v60  ;;  %v5740_v18 = vpop.f32.mrf.mxu0  ;;  %v4154_v56 = vor.u32 %v4702_v4, %v4151_v5  ;;  %v4187_v4 = vld [vmem:[#allocation3 + $0x10c] sm:$0xf0]  ;;  %1753 = vst [vmem:[#allocation3 + $0x17c] sm:$0xf] %v1709_v0  ;;  %v1718_v0 = vrot.slane %v1643_v41, 5 }
 0x24d   : > { %3364 = vmatmul.bf16.gmra.mxu1 %v4110_v15  ;;  %v1390_v15 = vld [vmem:[#allocation2 + $0x48] sm:$0xf]  ;;  %1371 = vst [vmem:[#allocation3 + $0x1bc] sm:$0xf] %v1355_v7 }
 0x24e   : > { %3413 = vmatmul.bf16.gmra.mxu2 %v4114_v10  ;;  %v1391_v10 = vld [vmem:[#allocation2 + $0x4c] sm:$0xf]  ;;  %v1523_v14 = vshll.u32 %v1390_v15, 16 }
 0x24f   : > { %3604 = vmatmul.bf16.vlgmr.msrb.gmra.mxu0 %v4094_v50  ;;  %v1529_v16 = vshll.u32 %v1391_v10, 16  ;;  %v1533_v19 = vshrl.u32 %v1391_v10, 16 }
 0x250   : > { %3462 = vmatmul.bf16.gmra.mxu3 %v4118_v13  ;;  %v1520_v13 = vshrl.u32 %v1390_v15, 16  ;;  %v1525_v22 = vrot.slane %v1523_v14, 5  ;;  %v1394_v15 = vld [vmem:[#allocation2 + $0x58] sm:$0xf] }
 0x251   : > { %v3267_v32 = vpop.f32.mrf.mxu2  ;;  %v1531_v25 = vrot.slane %v1529_v16, 5  ;;  %v1535_v26 = vrot.slane %v1533_v19, 4  ;;  %v1553_v19 = vshll.u32 %v1394_v15, 16 }
 0x252   : > { %v3268_v37 = vadd.f32 %v3267_v32, %v3219_v24  ;;  %v3220_v40 = vpop.f32.mrf.mxu1  ;;  %v1522_v21 = vrot.slane %v1520_v13, 4  ;;  %v1392_v24 = vld [vmem:[#allocation2 + $0x50] sm:$0x1] }
 0x253   : > { %v3316_v38 = vpop.f32.mrf.mxu3  ;;  %v3221_v34 = vadd.f32 %v5720_v35, %v3220_v40  ;;  %v1539_v28 = vshll.u32 %v1392_v24, 16  ;;  %v1536_v46 = vor.u32 %v1535_v26, %v1531_v25  ;;  %v1640_v40 = vld [vmem:[#allocation2 + $0x50] sm:$0x1]  ;;  %v1555_v26 = vrot.slane %v1553_v19, 5  ;;  %v1397_v19 = vld [vmem:[#allocation2 + $0x64] sm:$0xf] }
 0x254   : > { %v5743_v47 = vadd.f32 %v3316_v38, %v3268_v37  ;;  %v5745_v58 = vpop.f32.mrf.mxu0  ;;  %v1526_v27 = vor.u32 %v1525_v22, %v1522_v21  ;;  %v1711_v61 = vrot.slane %v1640_v40, 5  ;;  %v1641_v40 = vld [vmem:[#allocation2 + $0x54] sm:$0xe] }
 0x255   : > { %v1541_v37 = vrot.slane %v1539_v28, 5  ;;  %v1537_v51 = vrot.slane %v1536_v46, 4 }
 0x256   : > { %v1527_v36 = vrot.slane %v1526_v27, 4  ;;  %v1712_v2 = vsel %vm5579_vm13, %v1710_v57, %v1711_v61  ;;  %v4049_v61 = vrot.slane %v1641_v40, 9 }
 0x257   : > { %v1542_v54 = vsel %vm5585_vm14, %v1537_v51, %v1541_v37  ;;  %1754 = vst [vmem:[#allocation3 + $0x1a0] sm:$0xf] %v1712_v2 }
 0x258   : > { %v1532_v49 = vsel %vm5585_vm14, %v1527_v36, %v1531_v25  ;;  %1618 = vst [vmem:[#allocation3 + $0x19c] sm:$0xf] %v1542_v54  ;;  %v1395_v25 = vld [vmem:[#allocation2 + $0x5c] sm:$0x1]  ;;  %v1356_v54 = vld [vmem:[#allocation2 + $0x58] sm:$0xf] }
 0x259   : > { %v3269_v45 = vpop.f32.mrf.mxu2  ;;  %1617 = vst [vmem:[#allocation3 + $0x178] sm:$0xf] %v1532_v49 }
 0x25a   : > { %v3270_v6 = vadd.f32 %v3269_v45, %v3221_v34  ;;  %v3223_v60 = vpop.f32.mrf.mxu1  ;;  %v4711_v34 = vld [vmem:[#allocation3 + $0xec] sm:$0xf]  ;;  %1372 = vst [vmem:[#allocation3 + $0x1e0] sm:$0xf] %v1356_v54 }
 0x25b   : > { %v3318_v8 = vpop.f32.mrf.mxu3  ;;  %v3224_v20 = vadd.f32 %v5720_v35, %v3223_v60  ;;  %v4190_v60 = vor.u32 %v4711_v34, %v4187_v4  ;;  %v4724_v34 = vld [vmem:[#allocation3 + $0x150] sm:$0xf0] }
 0x25c   : > { %v5756_v11 = vadd.f32 %v3318_v8, %v3270_v6  ;;  %v5758_v50 = vpop.f32.mrf.mxu0  ;;  %v4182_v8 = vor.u32 %v4710_v62, %v4179_v63 }
 0x25d   : > { %3369 = vmatmul.bf16.gmra.mxu1 %v4146_v9  ;;  %v4186_v9 = vor.u32 %v4715_v1, %v4185_v12  ;;  %v4719_v12 = vld [vmem:[#allocation3 + $0x12c] sm:$0xf]  ;;  %v4215_v1 = vld [vmem:[#allocation3 + $0x14c] sm:$0xf0] }
 0x25e   : > { %3418 = vmatmul.bf16.gmra.mxu2 %v4150_v31 }
 0x260   : > { %3467 = vmatmul.bf16.gmra.mxu3 %v4154_v56  ;;  %v1393_v56 = vld [vmem:[#allocation2 + $0x54] sm:$0xf] }
 0x261   : > { %v3272_v29 = vpop.f32.mrf.mxu2  ;;  %v1544_v14 = vshrl.u32 %v1393_v56, 16  ;;  %v1547_v16 = vshll.u32 %v1393_v56, 16 }
 0x262   : > { %v3273_v32 = vadd.f32 %v3272_v29, %v3224_v20  ;;  %v3225_v38 = vpop.f32.mrf.mxu1  ;;  %v1557_v20 = vshrl.u32 %v1394_v15, 16  ;;  %v1563_v29 = vshll.u32 %v1395_v25, 16  ;;  %v1577_v25 = vshll.u32 %v1397_v19, 16 }
 0x263   : > { %v3321_v33 = vpop.f32.mrf.mxu3  ;;  %v3226_v3 = vadd.f32 %v5720_v35, %v3225_v38  ;;  %v1546_v22 = vrot.slane %v1544_v14, 4  ;;  %v1549_v24 = vrot.slane %v1547_v16, 5  ;;  %v1396_v16 = vld [vmem:[#allocation2 + $0x60] sm:$0xf] }
 0x264   : > { %v5761_v42 = vadd.f32 %v3321_v33, %v3273_v32  ;;  %v5763_v43 = vpop.f32.mrf.mxu0  ;;  %v1559_v27 = vrot.slane %v1557_v20, 4  ;;  %v1642_v32 = vld [vmem:[#allocation2 + $0x58] sm:$0xf]  ;;  %v1565_v38 = vrot.slane %v1563_v29, 5 }
 0x265   : > { %v1550_v28 = vor.u32 %v1549_v24, %v1546_v22  ;;  %v1715_v44 = vrot.slane %v1642_v32, 5  ;;  %v1568_v22 = vshrl.u32 %v1396_v16, 16  ;;  %v1571_v24 = vshll.u32 %v1396_v16, 16 }
 0x266   : > { %v1560_v30 = vor.u32 %v1559_v27, %v1555_v26 }
 0x267   : > { %v1551_v37 = vrot.slane %v1550_v28, 4  ;;  %v1717_v63 = vrot.slane %v1715_v44, 4  ;;  %v1716_v2 = vsel %vm5579_vm13, %v4049_v61, %v1715_v44  ;;  %v1570_v28 = vrot.slane %v1568_v22, 4  ;;  %v1646_v61 = vld [vmem:[#allocation2 + $0x68] sm:$0x1] }
 0x268   : > { %v1561_v39 = vrot.slane %v1560_v30, 4  ;;  %1755 = vst [vmem:[#allocation3 + $0x1c4] sm:$0xf] %v1716_v2  ;;  %v1573_v29 = vrot.slane %v1571_v24, 5  ;;  %v1579_v30 = vrot.slane %v1577_v25, 5 }
 0x269   : > { %v3274_v5 = vpop.f32.mrf.mxu2  ;;  %v1556_v57 = vsel %vm5585_vm14, %v1551_v37, %v1555_v26  ;;  %v1719_v4 = vsel %vm5579_vm13, %v1717_v63, %v1718_v0  ;;  %v1581_v26 = vshrl.u32 %v1397_v19, 16 }
 0x26a   : > { %v3275_v45 = vadd.f32 %v3274_v5, %v3226_v3  ;;  %v3228_v31 = vpop.f32.mrf.mxu1  ;;  %v1566_v62 = vsel %vm5585_vm14, %v1561_v39, %v1565_v38  ;;  %v4221_v3 = vld [vmem:[#allocation3 + $0x130] sm:$0xf]  ;;  %1619 = vst [vmem:[#allocation3 + $0x1c0] sm:$0xf] %v1556_v57  ;;  %v1644_v57 = vld [vmem:[#allocation2 + $0x60] sm:$0xe] }
 0x26b   : > { %v3323_v6 = vpop.f32.mrf.mxu3  ;;  %v3229_v21 = vadd.f32 %v5720_v35, %v3228_v31  ;;  %1620 = vst [vmem:[#allocation3 + $0x1e4] sm:$0xf] %v1566_v62  ;;  %v4222_v56 = vor.u32 %v4724_v34, %v4221_v3  ;;  %v1583_v32 = vrot.slane %v1581_v26, 4  ;;  %v4050_v3 = vrot.slane %v1644_v57, 9 }
 0x26c   : > { %v5774_v10 = vadd.f32 %v3323_v6, %v3275_v45  ;;  %v5776_v13 = vpop.f32.mrf.mxu0  ;;  %v4720_v45 = vld [vmem:[#allocation3 + $0x134] sm:$0xf]  ;;  %v4223_v6 = vld [vmem:[#allocation3 + $0x154] sm:$0xf0]  ;;  %1756 = vst [vmem:[#allocation3 + $0x1e8] sm:$0xf] %v1719_v4 }
 0x26d   : > { %3374 = vmatmul.bf16.gmra.mxu1 %v4182_v8  ;;  %v4226_v14 = vor.u32 %v4720_v45, %v4223_v6  ;;  %v1584_v38 = vor.u32 %v1583_v32, %v1579_v30  ;;  %v4728_v45 = vld [vmem:[#allocation3 + $0x174] sm:$0xf]  ;;  %v4251_v6 = vld [vmem:[#allocation3 + $0x194] sm:$0xf0] }
 0x26e   : > { %3423 = vmatmul.bf16.gmra.mxu2 %v4186_v9  ;;  %v4254_v24 = vor.u32 %v4728_v45, %v4251_v6 }
 0x26f   : > { %v1585_v54 = vrot.slane %v1584_v38, 4 }
 0x270   : > { %3472 = vmatmul.bf16.gmra.mxu3 %v4190_v60  ;;  %v4218_v60 = vor.u32 %v4719_v12, %v4215_v1  ;;  %v1357_v12 = vld [vmem:[#allocation2 + $0x60] sm:$0xf]  ;;  %v1358_v1 = vld [vmem:[#allocation2 + $0x64] sm:$0xf] }
 0x271   : > { %v3277_v46 = vpop.f32.mrf.mxu2  ;;  %1373 = vst [vmem:[#allocation3 + $0x204] sm:$0xf] %v1357_v12  ;;  %v2045_v12 = vld [vmem:[#allocation2 + $0x2c] sm:$0x1] }
 0x272   : > { %v3278_v33 = vadd.f32 %v3277_v46, %v3229_v21  ;;  %v3230_v51 = vpop.f32.mrf.mxu1  ;;  %v1398_v46 = vld [vmem:[#allocation2 + $0x68] sm:$0x1]  ;;  %1374 = vst [vmem:[#allocation3 + $0x228] sm:$0xf] %v1358_v1 }
 0x273   : > { %v3326_v36 = vpop.f32.mrf.mxu3  ;;  %v3231_v5 = vadd.f32 %v5720_v35, %v3230_v51  ;;  %v1645_v51 = vld [vmem:[#allocation2 + $0x64] sm:$0xf] }
 0x274   : > { %v5779_v48 = vadd.f32 %v3326_v36, %v3278_v33  ;;  %v5781_v49 = vpop.f32.mrf.mxu0  ;;  %v1574_v33 = vor.u32 %v1573_v29, %v1570_v28  ;;  %v1587_v36 = vshll.u32 %v1398_v46, 16  ;;  %v1722_v62 = vrot.slane %v1645_v51, 5  ;;  %v1795_v28 = vld [vmem:[#allocation2 + $0x24] sm:$0xf]  ;;  %v1796_v29 = vld [vmem:[#allocation2 + $0x28] sm:$0xf] }
 0x275   : > { %v1844_v32 = vshll.u32 %v1795_v28, 16 }
 0x276   : > { %v1575_v41 = vrot.slane %v1574_v33, 4  ;;  %v1589_v44 = vrot.slane %v1587_v36, 5  ;;  %v1724_v4 = vrot.slane %v1722_v62, 4  ;;  %v1850_v33 = vshll.u32 %v1796_v29, 16 }
 0x277   : > { %v1854_v36 = vshrl.u32 %v1796_v29, 16  ;;  %v1846_v51 = vrot.slane %v1844_v32, 5  ;;  %v4738_v29 = vld [vmem:[#allocation3 + $0x1c4] sm:$0xf] }
 0x278   : > { %v1580_v2 = vsel %vm5585_vm14, %v1575_v41, %v1579_v30  ;;  %v1590_v34 = vsel %vm5585_vm14, %v1585_v54, %v1589_v44  ;;  %v1841_v30 = vshrl.u32 %v1795_v28, 16  ;;  %v2044_v54 = vld [vmem:[#allocation2 + $0x28] sm:$0xf] }
 0x279   : > { %v3279_v8 = vpop.f32.mrf.mxu2  ;;  %1621 = vst [vmem:[#allocation3 + $0x208] sm:$0xf] %v1580_v2  ;;  %v1856_v41 = vrot.slane %v1854_v36, 4  ;;  %v2097_v6 = vrot.slane %v2044_v54, 5 }
 0x27a   : > { %v3280_v9 = vadd.f32 %v3279_v8, %v3231_v5  ;;  %v3233_v15 = vpop.f32.mrf.mxu1  ;;  %v1725_v5 = vrot.slane %v1646_v61, 5  ;;  %v1723_v8 = vsel %vm5579_vm13, %v4050_v3, %v1722_v62  ;;  %1622 = vst [vmem:[#allocation3 + $0x22c] sm:$0xf] %v1590_v34  ;;  %v1843_v38 = vrot.slane %v1841_v30, 4  ;;  %v2043_v62 = vld [vmem:[#allocation2 + $0x24] sm:$0xe] }
 0x27b   : > { %v3328_v31 = vpop.f32.mrf.mxu3  ;;  %v3234_v27 = vadd.f32 %v5720_v35, %v3233_v15  ;;  %v4729_v15 = vld [vmem:[#allocation3 + $0x17c] sm:$0xf]  ;;  %1757 = vst [vmem:[#allocation3 + $0x20c] sm:$0xf] %v1723_v8  ;;  %v4052_v45 = vrot.slane %v2043_v62, 9  ;;  %v2100_v8 = vrot.slane %v2045_v12, 5 }
 0x27c   : > { %v5792_v20 = vadd.f32 %v3328_v31, %v3280_v9  ;;  %v5794_v21 = vpop.f32.mrf.mxu0  ;;  %v4257_v9 = vld [vmem:[#allocation3 + $0x178] sm:$0xf]  ;;  %v4733_v31 = vld [vmem:[#allocation3 + $0x198] sm:$0xf0]  ;;  %v1847_v44 = vor.u32 %v1846_v51, %v1843_v38  ;;  %v4295_v30 = vld [vmem:[#allocation3 + $0x1e4] sm:$0xf0] }
 0x27d   : > { %3379 = vmatmul.bf16.gmra.mxu1 %v4218_v60  ;;  %v1726_v60 = vsel %vm5579_vm13, %v1724_v4, %v1725_v5  ;;  %v4258_v25 = vor.u32 %v4733_v31, %v4257_v9  ;;  %v4833_v51 = vld [vmem:[#allocation10 + $0x38] sm:$0xff] }
 0x27e   : > { %3428 = vmatmul.bf16.gmra.mxu2 %v4222_v56  ;;  %1758 = vst [vmem:[#allocation3 + $0x230] sm:$0xf] %v1726_v60  ;;  %v1848_v3 = vrot.slane %v1847_v44, 4  ;;  %v1799_v44 = vld [vmem:[#allocation2 + $0x34] sm:$0xf]  ;;  %3737 = vmatpush.bf16.msra.mxu0 %v4833_v51 }
 0x27f   : > { %4851 = vmatpush.bf16.msra.mxu3 %v4833_v51  ;;  %v1878_v62 = vshrl.u32 %v1799_v44, 16 }
 0x280   : > { %3477 = vmatmul.bf16.gmra.mxu3 %v4226_v14  ;;  %v4259_v14 = vld [vmem:[#allocation3 + $0x19c] sm:$0xf0] }
 0x281   : > { %v3282_v37 = vpop.f32.mrf.mxu2 }
 0x282   : > { %v3283_v39 = vadd.f32 %v3282_v37, %v3234_v27  ;;  %v3235_v7 = vpop.f32.mrf.mxu1  ;;  %v4262_v27 = vor.u32 %v4729_v15, %v4259_v14  ;;  %v2098_v15 = vsel %vm5579_vm13, %v4052_v45, %v2097_v6  ;;  %v2099_v14 = vrot.slane %v2097_v6, 4 }
 0x283   : > { %v3331_v40 = vpop.f32.mrf.mxu3  ;;  %v3236_v56 = vadd.f32 %v5720_v35, %v3235_v7  ;;  %2162 = vst [vmem:[#allocation3 + $0x68] sm:$0xf] %v2098_v15  ;;  %v2046_v15 = vld [vmem:[#allocation2 + $0x30] sm:$0xe] }
 0x284   : > { %v5797_v63 = vadd.f32 %v3331_v40, %v3283_v39  ;;  %v5799_v0 = vpop.f32.mrf.mxu0  ;;  %v1797_v39 = vld [vmem:[#allocation2 + $0x2c] sm:$0x1]  ;;  %v1852_v40 = vrot.slane %v1850_v33, 5 }
 0x285   : > { %v1860_v7 = vshll.u32 %v1797_v39, 16 }
 0x286   : > { %v1857_v61 = vor.u32 %v1856_v41, %v1852_v40  ;;  %v1853_v60 = vsel %vm5585_vm14, %v1848_v3, %v1852_v40  ;;  %v4298_v40 = vor.u32 %v4738_v29, %v4295_v30  ;;  %v1798_v41 = vld [vmem:[#allocation2 + $0x30] sm:$0xf]  ;;  %v4053_v29 = vrot.slane %v2046_v15, 9 }
 0x287   : > { %v1862_v34 = vrot.slane %v1860_v7, 5  ;;  %2026 = vst [vmem:[#allocation3 + $0x64] sm:$0xf] %v1853_v60  ;;  %v1865_v54 = vshrl.u32 %v1798_v41, 16 }
 0x288   : > { %v1858_v5 = vrot.slane %v1857_v61, 4  ;;  %v1874_v61 = vshll.u32 %v1799_v44, 16  ;;  %v4746_v44 = vld [vmem:[#allocation3 + $0x204] sm:$0xf] }
 0x289   : > { %v3284_v16 = vpop.f32.mrf.mxu2 }
 0x28a   : > { %v5810_v19 = vadd.f32 %v3284_v16, %v3236_v56  ;;  %v3238_v26 = vpop.f32.mrf.mxu1  ;;  %v1863_v56 = vsel %vm5585_vm14, %v1858_v5, %v1862_v34  ;;  %v4737_v16 = vld [vmem:[#allocation3 + $0x1bc] sm:$0xf]  ;;  %v1800_v34 = vld [vmem:[#allocation2 + $0x38] sm:$0x1]  ;;  %v1880_v5 = vrot.slane %v1878_v62, 4 }
 0x28b   : > { %v5812_v22 = vpop.f32.mrf.mxu3  ;;  %v3239_v37 = vadd.f32 %v5720_v35, %v3238_v26  ;;  %2027 = vst [vmem:[#allocation3 + $0x88] sm:$0xf] %v1863_v56  ;;  %v4742_v26 = vld [vmem:[#allocation3 + $0x1e0] sm:$0xf0]  ;;  %v1884_v6 = vshll.u32 %v1800_v34, 16 }
 0x28c   : > { %v5814_v46 = vpop.f32.mrf.mxu0  ;;  %v4830_v62 = vld [vmem:[#allocation10 + $0x20] sm:$0xff]  ;;  %v4331_v34 = vld [vmem:[#allocation3 + $0x22c] sm:$0xf0]  ;;  %v3334_v55 = vadd.f32 %v5812_v22, %v5810_v19 }
 0x28d   : > { %3384 = vmatmul.bf16.gmra.mxu1 %v4254_v24  ;;  %v4287_v24 = vld [vmem:[#allocation3 + $0x1dc] sm:$0xf0] }
 0x28e   : > { %3433 = vmatmul.bf16.gmra.mxu2 %v4258_v25  ;;  %v4293_v25 = vld [vmem:[#allocation3 + $0x1c0] sm:$0xf] }
 0x28f   : > { %v4294_v38 = vor.u32 %v4742_v26, %v4293_v25  ;;  %v4831_v26 = vld [vmem:[#allocation10 + $0x28] sm:$0xff] }
 0x290   : > { %3482 = vmatmul.bf16.gmra.mxu3 %v4262_v27  ;;  %v2101_v27 = vsel %vm5579_vm13, %v2099_v14, %v2100_v8  ;;  %v2047_v8 = vld [vmem:[#allocation2 + $0x34] sm:$0xf]  ;;  %v2048_v14 = vld [vmem:[#allocation2 + $0x38] sm:$0x1] }
 0x291   : > { %v3287_v57 = vpop.f32.mrf.mxu2  ;;  %2163 = vst [vmem:[#allocation3 + $0x8c] sm:$0xf] %v2101_v27 }
 0x292   : > { %v3288_v1 = vadd.f32 %v3287_v57, %v3239_v37  ;;  %v3240_v4 = vpop.f32.mrf.mxu1  ;;  %v4290_v37 = vor.u32 %v4737_v16, %v4287_v24  ;;  %v1868_v57 = vshll.u32 %v1798_v41, 16  ;;  %v2104_v16 = vrot.slane %v2047_v8, 5 }
 0x293   : > { %v3336_v2 = vpop.f32.mrf.mxu3  ;;  %v3241_v28 = vadd.f32 %v5720_v35, %v3240_v4  ;;  %v1876_v4 = vrot.slane %v1874_v61, 5  ;;  %v4323_v61 = vld [vmem:[#allocation3 + $0x224] sm:$0xf0] }
 0x294   : > { %v5817_v9 = vadd.f32 %v3336_v2, %v3288_v1  ;;  %v5819_v31 = vpop.f32.mrf.mxu0  ;;  %v4832_v1 = vld [vmem:[#allocation10 + $0x30] sm:$0xff]  ;;  %v1867_v2 = vrot.slane %v1865_v54, 4  ;;  %v1870_v3 = vrot.slane %v1868_v57, 5  ;;  %v2105_v41 = vsel %vm5579_vm13, %v4053_v29, %v2104_v16 }
 0x295   : > { %3738 = vmatpush.bf16.msra.mxu0 %v4832_v1  ;;  %4852 = vmatpush.bf16.msra.mxu3 %v4832_v1  ;;  %v1881_v56 = vor.u32 %v1880_v5, %v1876_v4  ;;  %v4751_v1 = vld [vmem:[#allocation3 + $0x228] sm:$0xf0]  ;;  %2164 = vst [vmem:[#allocation3 + $0xb0] sm:$0xf] %v2105_v41 }
 0x296   : > { %v1871_v45 = vor.u32 %v1870_v3, %v1867_v2  ;;  %v4747_v3 = vld [vmem:[#allocation3 + $0x20c] sm:$0xf] }
 0x297   : > { %v4334_v15 = vor.u32 %v4747_v3, %v4331_v34 }
 0x298   : > { %v1872_v27 = vrot.slane %v1871_v45, 4 }
 0x299   : > { %v3289_v32 = vpop.f32.mrf.mxu2  ;;  %3739 = vmatpush.bf16.msra.mxu0 %v4831_v26  ;;  %4853 = vmatpush.bf16.msra.mxu3 %v4831_v26 }
 0x29a   : > { %v5830_v33 = vadd.f32 %v3289_v32, %v3241_v28  ;;  %v3243_v39 = vpop.f32.mrf.mxu1  ;;  %v1886_v28 = vrot.slane %v1884_v6, 5  ;;  %v1882_v32 = vrot.slane %v1881_v56, 4  ;;  %v4326_v6 = vor.u32 %v4746_v44, %v4323_v61 }
 0x29b   : > { %v5832_v36 = vpop.f32.mrf.mxu3  ;;  %v3244_v12 = vadd.f32 %v5720_v35, %v3243_v39 }
 0x29c   : > { %v5834_v7 = vpop.f32.mrf.mxu0  ;;  %v1887_v54 = vsel %vm5585_vm14, %v1882_v32, %v1886_v28  ;;  %v3339_v19 = vadd.f32 %v5832_v36, %v5830_v33 }
 0x29d   : > { %3389 = vmatmul.bf16.gmra.mxu1 %v4290_v37  ;;  %v2106_v37 = vrot.slane %v2104_v16, 4  ;;  %2029 = vst [vmem:[#allocation3 + $0xd0] sm:$0xf] %v1887_v54  ;;  %3740 = vmatpush.bf16.msra.mxu0 %v4830_v62  ;;  %v1802_v16 = vld [vmem:[#allocation2 + $0x40] sm:$0xf] }
 0x29e   : > { %3438 = vmatmul.bf16.gmra.mxu2 %v4294_v38  ;;  %v2107_v38 = vrot.slane %v2048_v14, 5  ;;  %4854 = vmatpush.bf16.msra.mxu3 %v4830_v62  ;;  %v1801_v14 = vld [vmem:[#allocation2 + $0x3c] sm:$0xf]  ;;  %v1902_v28 = vshrl.u32 %v1802_v16, 16 }
 0x29f   : > { %v1892_v26 = vshll.u32 %v1801_v14, 16 }
 0x2a0   : > { %3487 = vmatmul.bf16.gmra.mxu3 %v4298_v40  ;;  %v1877_v40 = vsel %vm5585_vm14, %v1872_v27, %v1876_v4  ;;  %v2108_v57 = vsel %vm5579_vm13, %v2106_v37, %v2107_v38  ;;  %v1898_v27 = vshll.u32 %v1802_v16, 16  ;;  %v1803_v38 = vld [vmem:[#allocation2 + $0x44] sm:$0x1]  ;;  %v1904_v41 = vrot.slane %v1902_v28, 4 }
 0x2a1   : > { %v3292_v60 = vpop.f32.mrf.mxu2  ;;  %2028 = vst [vmem:[#allocation3 + $0xac] sm:$0xf] %v1877_v40  ;;  %v1894_v37 = vrot.slane %v1892_v26, 5  ;;  %v1908_v54 = vshll.u32 %v1803_v38, 16  ;;  %v4826_v38 = vld [vmem:[#allocation10] sm:$0xff] }
 0x2a2   : > { %v3293_v24 = vadd.f32 %v3292_v60, %v3244_v12  ;;  %v3245_v30 = vpop.f32.mrf.mxu1  ;;  %v4329_v12 = vld [vmem:[#allocation3 + $0x208] sm:$0xf]  ;;  %2165 = vst [vmem:[#allocation3 + $0xd4] sm:$0xf] %v2108_v57  ;;  %v4829_v60 = vld [vmem:[#allocation10 + $0x18] sm:$0xff]  ;;  %v1900_v40 = vrot.slane %v1898_v27, 5 }
 0x2a3   : > { %v3341_v25 = vpop.f32.mrf.mxu3  ;;  %v3246_v2 = vadd.f32 %v5720_v35, %v3245_v30  ;;  %v4330_v8 = vor.u32 %v4751_v1, %v4329_v12  ;;  %3741 = vmatpush.bf16.msra.mxu0 %v4829_v60  ;;  %4855 = vmatpush.bf16.msra.mxu3 %v4829_v60  ;;  %v4828_v30 = vld [vmem:[#allocation10 + $0x10] sm:$0xff]  ;;  %v2050_v57 = vld [vmem:[#allocation2 + $0x40] sm:$0xf]  ;;  %v2049_v12 = vld [vmem:[#allocation2 + $0x3c] sm:$0xe] }
 0x2a4   : > { %v5837_v51 = vadd.f32 %v3341_v25, %v3293_v24  ;;  %v5839_v39 = vpop.f32.mrf.mxu0  ;;  %v1889_v25 = vshrl.u32 %v1801_v14, 16  ;;  %v1905_v62 = vor.u32 %v1904_v41, %v1900_v40  ;;  %v2051_v1 = vld [vmem:[#allocation2 + $0x44] sm:$0x1]  ;;  %v4054_v60 = vrot.slane %v2049_v12, 9  ;;  %v4129_v41 = vld [vmem:[#allocation3 + $0x68] sm:$0xf] }
 0x2a5   : > { %v2114_v16 = vrot.slane %v2051_v1, 5 }
 0x2a6   : > { %v1891_v32 = vrot.slane %v1889_v25, 4 }
 0x2a7   : > { %3742 = vmatpush.bf16.msra.mxu0 %v4828_v30  ;;  %4856 = vmatpush.bf16.msra.mxu3 %v4828_v30 }
 0x2a8   : > { %v1895_v44 = vor.u32 %v1894_v37, %v1891_v32  ;;  %v4123_v37 = vld [vmem:[#allocation3 + $0x84] sm:$0xf0] }
 0x2a9   : > { %v3294_v4 = vpop.f32.mrf.mxu2 }
 0x2aa   : > { %v5850_v5 = vadd.f32 %v3294_v4, %v3246_v2  ;;  %v3248_v56 = vpop.f32.mrf.mxu1  ;;  %v2111_v2 = vrot.slane %v2050_v57, 5  ;;  %v4827_v4 = vld [vmem:[#allocation10 + $0x8] sm:$0xff] }
 0x2ab   : > { %v5852_v45 = vpop.f32.mrf.mxu3  ;;  %v3249_v29 = vadd.f32 %v5720_v35, %v3248_v56  ;;  %3743 = vmatpush.bf16.msra.mxu0 %v4827_v4  ;;  %4857 = vmatpush.bf16.msra.mxu3 %v4827_v4 }
 0x2ac   : > { %v5854_v24 = vpop.f32.mrf.mxu0  ;;  %v2113_v14 = vrot.slane %v2111_v2, 4  ;;  %v2112_v28 = vsel %vm5579_vm13, %v4054_v60, %v2111_v2  ;;  %v1804_v2 = vld [vmem:[#allocation2 + $0x48] sm:$0xf]  ;;  %v3344_v36 = vadd.f32 %v5852_v45, %v5850_v5 }
 0x2ad   : > { %3394 = vmatmul.bf16.gmra.mxu1 %v4326_v6  ;;  %v1896_v6 = vrot.slane %v1895_v44, 4  ;;  %v4699_v44 = vld [vmem:[#allocation3 + $0x88] sm:$0xf0]  ;;  %2166 = vst [vmem:[#allocation3 + $0xf8] sm:$0xf] %v2112_v28  ;;  %v1913_v4 = vshrl.u32 %v1804_v2, 16 }
 0x2ae   : > { %3443 = vmatmul.bf16.gmra.mxu2 %v4330_v8  ;;  %v1910_v8 = vrot.slane %v1908_v54, 5  ;;  %v2115_v32 = vsel %vm5579_vm13, %v2113_v14, %v2114_v16  ;;  %v4130_v12 = vor.u32 %v4699_v44, %v4129_v41  ;;  %v2054_v41 = vld [vmem:[#allocation2 + $0x50] sm:$0x1] }
 0x2af   : > { %v1901_v27 = vsel %vm5585_vm14, %v1896_v6, %v1900_v40  ;;  %3744 = vmatpush.bf16.msra.mxu0 %v4826_v38  ;;  %2167 = vst [vmem:[#allocation3 + $0x11c] sm:$0xf] %v2115_v32  ;;  %4858 = vmatpush.bf16.msra.mxu3 %v4826_v38  ;;  %v1916_v6 = vshll.u32 %v1804_v2, 16  ;;  %v2052_v38 = vld [vmem:[#allocation2 + $0x48] sm:$0xe] }
 0x2b0   : > { %3492 = vmatmul.bf16.gmra.mxu3 %v4334_v15  ;;  %v1906_v15 = vrot.slane %v1905_v62, 4  ;;  %2030 = vst [vmem:[#allocation3 + $0xf4] sm:$0xf] %v1901_v27 }
 0x2b1   : > { %v3297_v61 = vpop.f32.mrf.mxu2 }
 0x2b2   : > { %v3298_v3 = vadd.f32 %v3297_v61, %v3249_v29  ;;  %v3250_v56 = vpop.f32.mrf.mxu1  ;;  %v4694_v29 = vld [vmem:[#allocation3 + $0x64] sm:$0xf]  ;;  %v1911_v30 = vsel %vm5585_vm14, %v1906_v15, %v1910_v8  ;;  %v1806_v15 = vld [vmem:[#allocation2 + $0x50] sm:$0x1] }
 0x2b3   : > { %v3346_v34 = vpop.f32.mrf.mxu3  ;;  %2031 = vst [vmem:[#allocation3 + $0x118] sm:$0xf] %v1911_v30  ;;  %v3251_v40 = vadd.f32 %v5720_v35, %v3250_v56  ;;  %v4126_v62 = vor.u32 %v4694_v29, %v4123_v37  ;;  %v1915_v35 = vrot.slane %v1913_v4, 4  ;;  %v1918_v56 = vrot.slane %v1916_v6, 5  ;;  %v2053_v29 = vld [vmem:[#allocation2 + $0x4c] sm:$0xf] }
 0x2b4   : > { %v5857_v25 = vadd.f32 %v3346_v34, %v3298_v3  ;;  %v5859_v26 = vpop.f32.mrf.mxu0  ;;  %v1805_v3 = vld [vmem:[#allocation2 + $0x4c] sm:$0xf]  ;;  %v1932_v28 = vshll.u32 %v1806_v15, 16  ;;  %v2118_v44 = vrot.slane %v2053_v29, 5  ;;  %v4703_v15 = vld [vmem:[#allocation3 + $0xac] sm:$0xf] }
 0x2b5   : > { %v1922_v8 = vshll.u32 %v1805_v3, 16  ;;  %v1926_v60 = vshrl.u32 %v1805_v3, 16  ;;  %v1919_v27 = vor.u32 %v1918_v56, %v1915_v35  ;;  %v4708_v29 = vld [vmem:[#allocation3 + $0xd0] sm:$0xf0] }
 0x2b6   : > { %v1934_v2 = vrot.slane %v1932_v28, 5  ;;  %v2120_v6 = vrot.slane %v2118_v44, 4  ;;  %v4165_v28 = vld [vmem:[#allocation3 + $0xb0] sm:$0xf] }
 0x2b7   : > { %v1924_v14 = vrot.slane %v1922_v8, 5  ;;  %v1928_v16 = vrot.slane %v1926_v60, 4  ;;  %v2121_v8 = vrot.slane %v2054_v41, 5  ;;  %v4166_v41 = vor.u32 %v4708_v29, %v4165_v28  ;;  %v2056_v28 = vld [vmem:[#allocation2 + $0x58] sm:$0xf] }
 0x2b9   : > { %v3299_v54 = vpop.f32.mrf.mxu2  ;;  %v1929_v37 = vor.u32 %v1928_v16, %v1924_v14  ;;  %v2122_v56 = vsel %vm5579_vm13, %v2120_v6, %v2121_v8  ;;  %v4159_v16 = vld [vmem:[#allocation3 + $0xcc] sm:$0xf0] }
 0x2ba   : > { %v5870_v57 = vadd.f32 %v3299_v54, %v3251_v40  ;;  %v3360_v1 = vpop.f32.mrf.mxu1  ;;  %v1920_v54 = vrot.slane %v1919_v27, 4  ;;  %2169 = vst [vmem:[#allocation3 + $0x164] sm:$0xf] %v2122_v56 }
 0x2bb   : > { %v5872_v61 = vpop.f32.mrf.mxu3  ;;  %v3361_v30 = vadd.f32 %v3360_v1, %v5725_v52  ;;  %v1930_v4 = vrot.slane %v1929_v37, 4 }
 0x2bc   : > { %v5874_v34 = vpop.f32.mrf.mxu0  ;;  %v1925_v35 = vsel %vm5585_vm14, %v1920_v54, %v1924_v14 }
 0x2bd   : > { %3560 = vmatmul.bf16.vlgmr.msra.gmra.mxu1 %v4126_v62  ;;  %v4055_v62 = vrot.slane %v2052_v38, 9  ;;  %v1935_v1 = vsel %vm5585_vm14, %v1930_v4, %v1934_v2  ;;  %2032 = vst [vmem:[#allocation3 + $0x13c] sm:$0xf] %v1925_v35  ;;  %v4162_v38 = vor.u32 %v4703_v15, %v4159_v16  ;;  %v1807_v2 = vld [vmem:[#allocation2 + $0x54] sm:$0xf] }
 0x2be   : > { %3609 = vmatmul.bf16.vlgmr.msra.gmra.mxu2 %v4130_v12  ;;  %2033 = vst [vmem:[#allocation3 + $0x160] sm:$0xf] %v1935_v1  ;;  %v1940_v8 = vshll.u32 %v1807_v2, 16 }
 0x2bf   : > { %v2119_v52 = vsel %vm5579_vm13, %v4055_v62, %v2118_v44  ;;  %v1808_v62 = vld [vmem:[#allocation2 + $0x58] sm:$0xf] }
 0x2c0   : > { %2168 = vst [vmem:[#allocation3 + $0x140] sm:$0xf] %v2119_v52  ;;  %v1946_v35 = vshll.u32 %v1808_v62, 16  ;;  %v1950_v52 = vshrl.u32 %v1808_v62, 16 }
 0x2c1   : > { %v3409_v32 = vpop.f32.mrf.mxu2 }
 0x2c2   : > { %v3410_v12 = vadd.f32 %v3409_v32, %v3361_v30  ;;  %v3362_v3 = vpop.f32.mrf.mxu1  ;;  %v1948_v15 = vrot.slane %v1946_v35, 5 }
 0x2c3   : > { %v3458_v40 = vpop.f32.mrf.mxu3  ;;  %v3363_v30 = vadd.f32 %v3362_v3, %v5738_v17  ;;  %v1942_v3 = vrot.slane %v1940_v8, 5 }
 0x2c4   : > { %v3558_v60 = vpop.f32.mrf.mxu0  ;;  %v3459_v27 = vadd.f32 %v3458_v40, %v3410_v12  ;;  %v1937_v12 = vshrl.u32 %v1807_v2, 16 }
 0x2c6   : > { %v3508_v44 = vadd.f32 %v5722_v23, %v3459_v27  ;;  %v1939_v17 = vrot.slane %v1937_v12, 4  ;;  %v1809_v23 = vld [vmem:[#allocation2 + $0x5c] sm:$0x1]  ;;  %v1952_v27 = vrot.slane %v1950_v52, 4 }
 0x2c8   : > { %v3557_v56 = vadd.f32 %v5874_v34, %v3508_v44  ;;  %v1943_v16 = vor.u32 %v1942_v3, %v1939_v17  ;;  %v4712_v17 = vld [vmem:[#allocation3 + $0xf4] sm:$0xf] }
 0x2c9   : > { %v3411_v14 = vpop.f32.mrf.mxu2 }
 0x2ca   : > { %v3412_v32 = vadd.f32 %v3411_v14, %v3363_v30  ;;  %v3365_v54 = vpop.f32.mrf.mxu1  ;;  %v1956_v30 = vshll.u32 %v1809_v23, 16  ;;  %v2055_v14 = vld [vmem:[#allocation2 + $0x54] sm:$0xe] }
 0x2cb   : > { %v3460_v37 = vpop.f32.mrf.mxu3  ;;  %v3366_v4 = vadd.f32 %v3365_v54, %v5743_v47  ;;  %v4056_v2 = vrot.slane %v2055_v14, 9 }
 0x2cc   : > { %v3461_v6 = vadd.f32 %v3460_v37, %v3412_v32  ;;  %v3605_v40 = vpop.f32.mrf.mxu0  ;;  %v2057_v32 = vld [vmem:[#allocation2 + $0x5c] sm:$0x1]  ;;  %v2125_v37 = vrot.slane %v2056_v28, 5 }
 0x2cd   : > { %3565 = vmatmul.bf16.gmra.mxu1 %v4162_v38  ;;  %v3606_v47 = vadd.f32 %v3605_v40, %v3557_v56  ;;  %v1944_v38 = vrot.slane %v1943_v16, 4  ;;  %v2128_v44 = vrot.slane %v2057_v32, 5  ;;  %v4717_v16 = vld [vmem:[#allocation3 + $0x118] sm:$0xf0]  ;;  %v1810_v32 = vld [vmem:[#allocation2 + $0x60] sm:$0xf] }
 0x2ce   : > { %3614 = vmatmul.bf16.gmra.mxu2 %v4166_v41  ;;  %v3510_v1 = vadd.f32 %v5727_v53, %v3461_v6  ;;  %v1953_v41 = vor.u32 %v1952_v27, %v1948_v15  ;;  %v1958_v6 = vrot.slane %v1956_v30, 5  ;;  %v2127_v34 = vrot.slane %v2125_v37, 4 }
 0x2cf   : > { %v1949_v40 = vsel %vm5585_vm14, %v1944_v38, %v1948_v15 }
 0x2d0   : > { %v3559_v53 = vadd.f32 %v3558_v60, %v3510_v1  ;;  %v1954_v35 = vrot.slane %v1953_v41, 4  ;;  %2034 = vst [vmem:[#allocation3 + $0x184] sm:$0xf] %v1949_v40  ;;  %v2129_v3 = vsel %vm5579_vm13, %v2127_v34, %v2128_v44  ;;  %v4195_v60 = vld [vmem:[#allocation3 + $0x114] sm:$0xf0]  ;;  %v1961_v41 = vshrl.u32 %v1810_v32, 16 }
 0x2d1   : > { %v3414_v29 = vpop.f32.mrf.mxu2  ;;  %v4201_v1 = vld [vmem:[#allocation3 + $0xf8] sm:$0xf]  ;;  %2171 = vst [vmem:[#allocation3 + $0x1ac] sm:$0xf] %v2129_v3  ;;  %v1812_v34 = vld [vmem:[#allocation2 + $0x68] sm:$0x1] }
 0x2d2   : > { %v5890_v54 = vadd.f32 %v3414_v29, %v3366_v4  ;;  %v3367_v62 = vpop.f32.mrf.mxu1  ;;  %v2126_v4 = vsel %vm5579_vm13, %v4056_v2, %v2125_v37  ;;  %v1959_v56 = vsel %vm5585_vm14, %v1954_v35, %v1958_v6  ;;  %v4198_v29 = vor.u32 %v4712_v17, %v4195_v60  ;;  %v1811_v37 = vld [vmem:[#allocation2 + $0x64] sm:$0xf]  ;;  %v2060_v3 = vld [vmem:[#allocation2 + $0x68] sm:$0x1] }
 0x2d3   : > { %v3368_v12 = vadd.f32 %v3367_v62, %v5756_v11  ;;  %2170 = vst [vmem:[#allocation3 + $0x188] sm:$0xf] %v2126_v4  ;;  %v3645_v11 = vmax.f32 %v3606_v47, 0.0  ;;  %v4202_v30 = vor.u32 %v4717_v16, %v4201_v1  ;;  %v1964_v2 = vshll.u32 %v1810_v32, 16  ;;  %v2059_v35 = vld [vmem:[#allocation2 + $0x64] sm:$0xf] }
 0x2d4   : > { %v3607_v8 = vpop.f32.mrf.mxu0  ;;  %2035 = vst [vmem:[#allocation3 + $0x1a8] sm:$0xf] %v1959_v56  ;;  %v1970_v62 = vshll.u32 %v1811_v37, 16  ;;  %v1974_v47 = vshrl.u32 %v1811_v37, 16  ;;  %v1980_v40 = vshll.u32 %v1812_v34, 16  ;;  %v2132_v60 = vrot.slane %v2059_v35, 5 }
 0x2d5   : > { %v3608_v52 = vadd.f32 %v3607_v8, %v3559_v53  ;;  %v1963_v53 = vrot.slane %v1961_v41, 4  ;;  %v1966_v6 = vrot.slane %v1964_v2, 5  ;;  %v2058_v4 = vld [vmem:[#allocation2 + $0x60] sm:$0xe]  ;;  %v4231_v41 = vld [vmem:[#allocation3 + $0x15c] sm:$0xf0] }
 0x2d6   : > { %v1972_v44 = vrot.slane %v1970_v62, 5  ;;  %v1982_v56 = vrot.slane %v1980_v40, 5  ;;  %v4237_v2 = vld [vmem:[#allocation3 + $0x140] sm:$0xf]  ;;  %v4726_v62 = vld [vmem:[#allocation3 + $0x160] sm:$0xf0] }
 0x2d7   : > { %v3646_v23 = vmax.f32 %v3608_v52, 0.0  ;;  %v1967_v8 = vor.u32 %v1966_v6, %v1963_v53  ;;  %v4238_v6 = vor.u32 %v4726_v62, %v4237_v2 }
 0x2d9   : > { %v3661_v15 = vpack.c.bf16 %v3646_v23, %v3645_v11  ;;  %v3416_v27 = vpop.f32.mrf.mxu2  ;;  %v1968_v1 = vrot.slane %v1967_v8, 4  ;;  %v4057_v11 = vrot.slane %v2058_v4, 9 }
 0x2da   : > { %v5901_v28 = vadd.f32 %v3416_v27, %v3368_v12  ;;  %v3370_v14 = vpop.f32.mrf.mxu1  ;;  %v1976_v12 = vrot.slane %v1974_v47, 4  ;;  %v2135_v27 = vrot.slane %v2060_v3, 5 }
 0x2db   : > { %3745 = vmatmul.bf16.vlgmr.msra.gmra.mxu0 %v3661_v15  ;;  %v3371_v38 = vadd.f32 %v3370_v14, %v5761_v42  ;;  %v2134_v15 = vrot.slane %v2132_v60, 4  ;;  %v2133_v14 = vsel %vm5579_vm13, %v4057_v11, %v2132_v60  ;;  %v1815_v60 = vld [vmem:[#allocation2 + $0x74] sm:$0x1] }
 0x2dc   : > { %v1977_v17 = vor.u32 %v1976_v12, %v1972_v44  ;;  %2172 = vst [vmem:[#allocation3 + $0x1d0] sm:$0xf] %v2133_v14  ;;  %v1814_v12 = vld [vmem:[#allocation2 + $0x70] sm:$0xf] }
 0x2dd   : > { %3570 = vmatmul.bf16.gmra.mxu1 %v4198_v29  ;;  %v2136_v37 = vsel %vm5579_vm13, %v2134_v15, %v2135_v27 }
 0x2de   : > { %3619 = vmatmul.bf16.gmra.mxu2 %v4202_v30  ;;  %v1978_v16 = vrot.slane %v1977_v17, 4  ;;  %v1973_v30 = vsel %vm5585_vm14, %v1968_v1, %v1972_v44  ;;  %2173 = vst [vmem:[#allocation3 + $0x1f4] sm:$0xf] %v2136_v37  ;;  %v1813_v44 = vld [vmem:[#allocation2 + $0x6c] sm:$0xf]  ;;  %v1998_v17 = vshrl.u32 %v1814_v12, 16 }
 0x2df   : > { %2036 = vst [vmem:[#allocation3 + $0x1cc] sm:$0xf] %v1973_v30  ;;  %v1985_v40 = vshrl.u32 %v1813_v44, 16  ;;  %v1988_v35 = vshll.u32 %v1813_v44, 16  ;;  %v2063_v30 = vld [vmem:[#allocation2 + $0x74] sm:$0x1] }
 0x2e0   : > { %v1983_v32 = vsel %vm5585_vm14, %v1978_v16, %v1982_v56  ;;  %v2000_v56 = vrot.slane %v1998_v17, 4  ;;  %v2062_v16 = vld [vmem:[#allocation2 + $0x70] sm:$0xf] }
 0x2e1   : > { %v3419_v52 = vpop.f32.mrf.mxu2  ;;  %2037 = vst [vmem:[#allocation3 + $0x1f0] sm:$0xf] %v1983_v32  ;;  %v1987_v4 = vrot.slane %v1985_v40, 4  ;;  %v1990_v3 = vrot.slane %v1988_v35, 5  ;;  %v2139_v14 = vrot.slane %v2062_v16, 5 }
 0x2e2   : > { %v5904_v42 = vadd.f32 %v3419_v52, %v3371_v38  ;;  %v3372_v23 = vpop.f32.mrf.mxu1  ;;  %v4721_v38 = vld [vmem:[#allocation3 + $0x13c] sm:$0xf]  ;;  %v1994_v52 = vshll.u32 %v1814_v12, 16  ;;  %v4273_v40 = vld [vmem:[#allocation3 + $0x188] sm:$0xf] }
 0x2e3   : > { %v3373_v29 = vadd.f32 %v3372_v23, %v5774_v10  ;;  %v4234_v53 = vor.u32 %v4721_v38, %v4231_v41  ;;  %v1991_v11 = vor.u32 %v1990_v3, %v1987_v4  ;;  %v2004_v23 = vshll.u32 %v1815_v60, 16  ;;  %v4267_v35 = vld [vmem:[#allocation3 + $0x1a4] sm:$0xf0] }
 0x2e4   : > { %v1996_v1 = vrot.slane %v1994_v52, 5  ;;  %v2141_v62 = vrot.slane %v2139_v14, 4  ;;  %v4735_v52 = vld [vmem:[#allocation3 + $0x1a8] sm:$0xf0] }
 0x2e5   : > { %v1992_v32 = vrot.slane %v1991_v11, 4  ;;  %v2006_v37 = vrot.slane %v2004_v23, 5  ;;  %v4274_v3 = vor.u32 %v4735_v52, %v4273_v40  ;;  %v3463_v52 = vpop.f32.mrf.mxu3 }
 0x2e6   : > { %v2001_v27 = vor.u32 %v2000_v56, %v1996_v1  ;;  %v4739_v16 = vld [vmem:[#allocation3 + $0x1cc] sm:$0xf] }
 0x2e8   : > { %v2002_v2 = vrot.slane %v2001_v27, 4  ;;  %v4309_v27 = vld [vmem:[#allocation3 + $0x1d0] sm:$0xf] }
 0x2e9   : > { %v3421_v10 = vpop.f32.mrf.mxu2 }
 0x2ea   : > { %v5915_v47 = vadd.f32 %v3421_v10, %v3373_v29  ;;  %v3375_v34 = vpop.f32.mrf.mxu1  ;;  %v2061_v29 = vld [vmem:[#allocation2 + $0x6c] sm:$0xe]  ;;  %v2142_v10 = vrot.slane %v2063_v30, 5  ;;  %v2007_v44 = vsel %vm5585_vm14, %v2002_v2, %v2006_v37 }
 0x2eb   : > { %v3376_v8 = vadd.f32 %v3375_v34, %v5779_v48  ;;  %v4058_v38 = vrot.slane %v2061_v29, 9  ;;  %2039 = vst [vmem:[#allocation3 + $0x238] sm:$0xf] %v2007_v44  ;;  %v4744_v29 = vld [vmem:[#allocation3 + $0x1f0] sm:$0xf0] }
 0x2ec   : > { %v2143_v12 = vsel %vm5579_vm13, %v2141_v62, %v2142_v10  ;;  %v4310_v37 = vor.u32 %v4744_v29, %v4309_v27 }
 0x2ed   : > { %3575 = vmatmul.bf16.gmra.mxu1 %v4234_v53  ;;  %v2140_v34 = vsel %vm5579_vm13, %v4058_v38, %v2139_v14  ;;  %2175 = vst [vmem:[#allocation3 + $0x23c] sm:$0xf] %v2143_v12 }
 0x2ee   : > { %3624 = vmatmul.bf16.gmra.mxu2 %v4238_v6  ;;  %v1997_v6 = vsel %vm5585_vm14, %v1992_v32, %v1996_v1  ;;  %2174 = vst [vmem:[#allocation3 + $0x218] sm:$0xf] %v2140_v34 }
 0x2ef   : > { %2038 = vst [vmem:[#allocation3 + $0x214] sm:$0xf] %v1997_v6 }
 0x2f1   : > { %v3424_v15 = vpop.f32.mrf.mxu2 }
 0x2f2   : > { %v5918_v48 = vadd.f32 %v3424_v15, %v3376_v8  ;;  %v3377_v41 = vpop.f32.mrf.mxu1  ;;  %v4730_v8 = vld [vmem:[#allocation3 + $0x184] sm:$0xf]  ;;  %v4303_v15 = vld [vmem:[#allocation3 + $0x1ec] sm:$0xf0] }
 0x2f3   : > { %v3378_v53 = vadd.f32 %v3377_v41, %v5792_v20  ;;  %v4270_v4 = vor.u32 %v4730_v8, %v4267_v35  ;;  %v4306_v32 = vor.u32 %v4739_v16, %v4303_v15  ;;  %v3349_v16 = vadd.f32 %v5872_v61, %v5870_v57 }
 0x2f4   : > { %v4753_v34 = vld [vmem:[#allocation3 + $0x238] sm:$0xf0] }
 0x2f5   : > { %v4345_v6 = vld [vmem:[#allocation3 + $0x218] sm:$0xf] }
 0x2f6   : > { %v4748_v10 = vld [vmem:[#allocation3 + $0x214] sm:$0xf]  ;;  %v4346_v40 = vor.u32 %v4753_v34, %v4345_v6 }
 0x2f9   : > { %v3426_v20 = vpop.f32.mrf.mxu2 }
 0x2fa   : > { %v5929_v17 = vadd.f32 %v3426_v20, %v3378_v53  ;;  %v3380_v60 = vpop.f32.mrf.mxu1  ;;  %v4339_v53 = vld [vmem:[#allocation3 + $0x234] sm:$0xf0] }
 0x2fb   : > { %v3381_v59 = vadd.f32 %v3380_v60, %v5797_v63  ;;  %v4342_v8 = vor.u32 %v4748_v10, %v4339_v53  ;;  %v3465_v60 = vpop.f32.mrf.mxu3 }
 0x2fd   : > { %3580 = vmatmul.bf16.gmra.mxu1 %v4270_v4 }
 0x2fe   : > { %3629 = vmatmul.bf16.gmra.mxu2 %v4274_v3 }
 0x301   : > { %v3429_v1 = vpop.f32.mrf.mxu2 }
 0x302   : > { %v5934_v56 = vadd.f32 %v3429_v1, %v3381_v59  ;;  %v3382_v11 = vpop.f32.mrf.mxu1 }
 0x303   : > { %v3383_v23 = vadd.f32 %v3382_v11, %v3334_v55 }
 0x309   : > { %v3431_v30 = vpop.f32.mrf.mxu2 }
 0x30a   : > { %v5936_v14 = vadd.f32 %v3431_v30, %v3383_v23  ;;  %v3385_v63 = vpop.f32.mrf.mxu1  ;;  %v3468_v23 = vpop.f32.mrf.mxu3 }
 0x30b   : > { %v3386_v38 = vadd.f32 %v3385_v63, %v5817_v9 }
 0x30d   : > { %3585 = vmatmul.bf16.gmra.mxu1 %v4306_v32 }
 0x30e   : > { %3634 = vmatmul.bf16.gmra.mxu2 %v4310_v37  ;;  %v3464_v37 = vadd.f32 %v3463_v52, %v5890_v54 }
 0x311   : > { %v3434_v41 = vpop.f32.mrf.mxu2 }
 0x312   : > { %v5941_v22 = vadd.f32 %v3434_v41, %v3386_v38  ;;  %v3387_v2 = vpop.f32.mrf.mxu1  ;;  %v3470_v30 = vpop.f32.mrf.mxu3  ;;  %v3466_v38 = vadd.f32 %v3465_v60, %v5901_v28  ;;  %v3513_v41 = vadd.f32 %v5740_v18, %v3464_v37 }
 0x313   : > { %v3388_v62 = vadd.f32 %v3387_v2, %v3339_v19  ;;  %v3471_v18 = vadd.f32 %v3470_v30, %v5915_v47 }
 0x314   : > { %v3515_v57 = vadd.f32 %v5745_v58, %v3466_v38  ;;  %v5969_v58 = vld [vmem:[%s6091_s6] ss:$0 sm:$0xff] }
 0x319   : > { %v3436_v44 = vpop.f32.mrf.mxu2 }
 0x31a   : > { %v5943_v12 = vadd.f32 %v3436_v44, %v3388_v62  ;;  %v3390_v9 = vpop.f32.mrf.mxu1  ;;  %v3473_v19 = vpop.f32.mrf.mxu3 }
 0x31b   : > { %v3391_v35 = vadd.f32 %v3390_v9, %v5837_v51 }
 0x31d   : > { %3590 = vmatmul.bf16.gmra.mxu1 %v4342_v8 }
 0x31e   : > { %3639 = vmatmul.bf16.gmra.mxu2 %v4346_v40  ;;  %v3469_v40 = vadd.f32 %v3468_v23, %v5904_v42 }
 0x321   : > { %v3439_v33 = vpop.f32.mrf.mxu2 }
 0x322   : > { %v5948_v20 = vadd.f32 %v3439_v33, %v3391_v35  ;;  %v3392_v4 = vpop.f32.mrf.mxu1  ;;  %v3475_v54 = vpop.f32.mrf.mxu3  ;;  %v3518_v35 = vadd.f32 %v5758_v50, %v3469_v40  ;;  %v3520_v33 = vadd.f32 %v5763_v43, %v3471_v18  ;;  %v3474_v43 = vadd.f32 %v3473_v19, %v5918_v48 }
 0x323   : > { %v3393_v3 = vadd.f32 %v3392_v4, %v3344_v36  ;;  %v3476_v37 = vadd.f32 %v3475_v54, %v5929_v17 }
 0x329   : > { %v3441_v59 = vpop.f32.mrf.mxu2 }
 0x32a   : > { %v5950_v1 = vadd.f32 %v3441_v59, %v3393_v3  ;;  %v3395_v55 = vpop.f32.mrf.mxu1  ;;  %v3786_v3 = vld [vmem:[%s5391_s15 + $0x10] sm:$0xff]  ;;  %v3478_v60 = vpop.f32.mrf.mxu3 }
 0x32b   : > { %v3396_v11 = vadd.f32 %v3395_v55, %v5857_v25  ;;  %v3479_v17 = vadd.f32 %v3478_v60, %v5934_v56 }
 0x331   : > { %v3444_v51 = vpop.f32.mrf.mxu2 }
 0x332   : > { %v5955_v15 = vadd.f32 %v3444_v51, %v3396_v11  ;;  %v3397_v27 = vpop.f32.mrf.mxu1 }
 0x333   : > { %v3398_v5 = vadd.f32 %v3397_v27, %v3349_v16 }
 0x339   : > { %v3446_v45 = vpop.f32.mrf.mxu2 }
 0x33a   : > { %v5957_v29 = vadd.f32 %v3446_v45, %v3398_v5  ;;  %v3561_v32 = vpop.f32.mrf.mxu1  ;;  %v3787_v45 = vld [vmem:[%s5391_s15 + $0x18] sm:$0xff] }
 0x33b   : > { %v3562_v2 = vadd.f32 %v3561_v32, %v3513_v41  ;;  %v3523_v41 = vadd.f32 %v5776_v13, %v3474_v43 }
 0x341   : > { %v3610_v63 = vpop.f32.mrf.mxu2 }
 0x342   : > { %v3563_v25 = vpop.f32.mrf.mxu1  ;;  %v3611_v61 = vadd.f32 %v3610_v63, %v3562_v2  ;;  %v3480_v63 = vpop.f32.mrf.mxu3 }
 0x343   : > { %v3564_v62 = vadd.f32 %v3563_v25, %v3515_v57  ;;  %v3481_v13 = vadd.f32 %v3480_v63, %v5936_v14 }
 0x344   : > { %v3647_v34 = vmax.f32 %v3611_v61, 0.0  ;;  %v3525_v61 = vadd.f32 %v5781_v49, %v3476_v37 }
 0x345   : > { %v3530_v18 = vadd.f32 %v5799_v0, %v3481_v13 }
 0x349   : > { %v3612_v10 = vpop.f32.mrf.mxu2 }
 0x34a   : > { %v3613_v53 = vadd.f32 %v3612_v10, %v3564_v62  ;;  %v3566_v6 = vpop.f32.mrf.mxu1 }
 0x34b   : > { %v3567_v52 = vadd.f32 %v3566_v6, %v3518_v35 }
 0x34c   : > { %v3648_v44 = vmax.f32 %v3613_v53, 0.0 }
 0x34e   : > { %v3662_v8 = vpack.c.bf16 %v3648_v44, %v3647_v34  ;;  %v3483_v44 = vpop.f32.mrf.mxu3 }
 0x34f   : > { %v3484_v56 = vadd.f32 %v3483_v44, %v5941_v22 }
 0x350   : > { %3750 = vmatmul.bf16.vlgmr.msra.gmra.mxu3 %v3662_v8 }
 0x351   : > { %v3615_v28 = vpop.f32.mrf.mxu2 }
 0x352   : > { %v3568_v9 = vpop.f32.mrf.mxu1  ;;  %v3616_v36 = vadd.f32 %v3615_v28, %v3567_v52  ;;  %v3528_v28 = vadd.f32 %v5794_v21, %v3479_v17 }
 0x353   : > { %v3569_v4 = vadd.f32 %v3568_v9, %v3520_v33 }
 0x354   : > { %v3649_v23 = vmax.f32 %v3616_v36, 0.0 }
 0x356   : > { %v3485_v9 = vpop.f32.mrf.mxu3 }
 0x358   : > { %v3746_v42 = vpop.f32.mrf.mxu0 }
 0x359   : > { %v3747_v47 = vadd.f32 %v5969_v58, %v3746_v42  ;;  %v3617_v59 = vpop.f32.mrf.mxu2 }
 0x35a   : > { %v3618_v55 = vadd.f32 %v3617_v59, %v3569_v4  ;;  %v3571_v11 = vpop.f32.mrf.mxu1  ;;  %v3486_v59 = vadd.f32 %v3485_v9, %v5943_v12  ;;  %v3789_v9 = vld [vmem:[%s5391_s15 + $0x28] sm:$0xff] }
 0x35b   : > { %v3802_v50 = vadd.f32 %v3786_v3, %v3747_v47  ;;  %v3572_v57 = vadd.f32 %v3571_v11, %v3523_v41 }
 0x35c   : > { %v3650_v51 = vmax.f32 %v3618_v55, 0.0  ;;  %v3533_v55 = vadd.f32 %v5814_v46, %v3484_v56 }
 0x35d   : > { %v3818_v16 = vmax.f32 %v3802_v50, 0.0  ;;  %v3535_v50 = vadd.f32 %v5819_v31, %v3486_v59 }
 0x35e   : > { %v3663_v27 = vpack.c.bf16 %v3650_v51, %v3649_v23  ;;  %v3488_v60 = vpop.f32.mrf.mxu3 }
 0x35f   : > { %3834 = vst [vmem:[%s5573_s29] sm:$0xff] %v3818_v16 }
 0x360   : > { %v3748_v5 = vpop.f32.mrf.mxu0  ;;  %3755 = vmatmul.bf16.gmra.mxu3 %v3663_v27 }
 0x361   : > { %v3749_v30 = vadd.f32 %v5969_v58, %v3748_v5  ;;  %v3620_v32 = vpop.f32.mrf.mxu2 }
 0x362   : > { %v3573_v25 = vpop.f32.mrf.mxu1  ;;  %v3621_v62 = vadd.f32 %v3620_v32, %v3572_v57 }
 0x363   : > { %v3803_v38 = vadd.f32 %v3787_v45, %v3749_v30  ;;  %v3574_v48 = vadd.f32 %v3573_v25, %v3525_v61  ;;  %v3489_v30 = vadd.f32 %v3488_v60, %v5948_v20  ;;  %v3791_v60 = vld [vmem:[%s5391_s15 + $0x38] sm:$0xff] }
 0x364   : > { %v3651_v6 = vmax.f32 %v3621_v62, 0.0 }
 0x365   : > { %v3819_v2 = vmax.f32 %v3803_v38, 0.0  ;;  %v3538_v46 = vadd.f32 %v5834_v7, %v3489_v30 }
 0x366   : > { %v3490_v27 = vpop.f32.mrf.mxu3 }
 0x367   : > { %3835 = vst [vmem:[%s5573_s29 + $0x8] sm:$0xff] %v3819_v2  ;;  %v3491_v12 = vadd.f32 %v3490_v27, %v5950_v1 }
 0x369   : > { %v3622_v19 = vpop.f32.mrf.mxu2  ;;  %v3540_v38 = vadd.f32 %v5839_v39, %v3491_v12 }
 0x36a   : > { %v3623_v10 = vadd.f32 %v3622_v19, %v3574_v48  ;;  %v3576_v53 = vpop.f32.mrf.mxu1 }
 0x36b   : > { %v3577_v49 = vadd.f32 %v3576_v53, %v3528_v28 }
 0x36c   : > { %v3652_v34 = vmax.f32 %v3623_v10, 0.0 }
 0x36e   : > { %v3664_v8 = vpack.c.bf16 %v3652_v34, %v3651_v6  ;;  %v3493_v63 = vpop.f32.mrf.mxu3 }
 0x36f   : > { %v3494_v10 = vadd.f32 %v3493_v63, %v5955_v15 }
 0x370   : > { %3760 = vmatmul.bf16.gmra.mxu3 %v3664_v8 }
 0x371   : > { %v3625_v54 = vpop.f32.mrf.mxu2  ;;  %v3543_v53 = vadd.f32 %v5854_v24, %v3494_v10 }
 0x372   : > { %v3578_v40 = vpop.f32.mrf.mxu1  ;;  %v3626_v35 = vadd.f32 %v3625_v54, %v3577_v49 }
 0x373   : > { %v3579_v52 = vadd.f32 %v3578_v40, %v3530_v18 }
 0x374   : > { %v3653_v42 = vmax.f32 %v3626_v35, 0.0 }
 0x376   : > { %v3495_v20 = vpop.f32.mrf.mxu3 }
 0x377   : > { %v3496_v7 = vadd.f32 %v3495_v20, %v5957_v29  ;;  %v3788_v29 = vld [vmem:[%s5391_s15 + $0x20] sm:$0xff] }
 0x379   : > { %v3627_v33 = vpop.f32.mrf.mxu2  ;;  %v3545_v34 = vadd.f32 %v5859_v26, %v3496_v7  ;;  %v3798_v7 = vld [vmem:[%s5391_s15 + $0x70] sm:$0xff] }
 0x37a   : > { %v3628_v36 = vadd.f32 %v3627_v33, %v3579_v52  ;;  %v3581_v4 = vpop.f32.mrf.mxu1 }
 0x37b   : > { %v3582_v0 = vadd.f32 %v3581_v4, %v3533_v55  ;;  %v3790_v4 = vld [vmem:[%s5391_s15 + $0x30] sm:$0xff] }
 0x37c   : > { %v3654_v3 = vmax.f32 %v3628_v36, 0.0 }
 0x37e   : > { %v3665_v47 = vpack.c.bf16 %v3654_v3, %v3653_v42 }
 0x380   : > { %3765 = vmatmul.bf16.gmra.mxu3 %v3665_v47 }
 0x381   : > { %v3630_v14 = vpop.f32.mrf.mxu2 }
 0x382   : > { %v3583_v21 = vpop.f32.mrf.mxu1  ;;  %v3631_v11 = vadd.f32 %v3630_v14, %v3582_v0  ;;  %v3792_v0 = vld [vmem:[%s5391_s15 + $0x40] sm:$0xff] }
 0x383   : > { %v3584_v23 = vadd.f32 %v3583_v21, %v3535_v50 }
 0x384   : > { %v3655_v5 = vmax.f32 %v3631_v11, 0.0 }
 0x389   : > { %v3632_v51 = vpop.f32.mrf.mxu2 }
 0x38a   : > { %v3633_v16 = vadd.f32 %v3632_v51, %v3584_v23  ;;  %v3586_v43 = vpop.f32.mrf.mxu1 }
 0x38b   : > { %v3587_v31 = vadd.f32 %v3586_v43, %v3538_v46  ;;  %v3795_v46 = vld [vmem:[%s5391_s15 + $0x58] sm:$0xff] }
 0x38c   : > { %v3656_v45 = vmax.f32 %v3633_v16, 0.0  ;;  %v3793_v16 = vld [vmem:[%s5391_s15 + $0x48] sm:$0xff] }
 0x38e   : > { %v3666_v22 = vpack.c.bf16 %v3656_v45, %v3655_v5 }
 0x390   : > { %3770 = vmatmul.bf16.gmra.mxu3 %v3666_v22  ;;  %v3794_v22 = vld [vmem:[%s5391_s15 + $0x50] sm:$0xff] }
 0x391   : > { %v3635_v32 = vpop.f32.mrf.mxu2 }
 0x392   : > { %v3588_v37 = vpop.f32.mrf.mxu1  ;;  %v3636_v25 = vadd.f32 %v3635_v32, %v3587_v31 }
 0x393   : > { %v3589_v41 = vadd.f32 %v3588_v37, %v3540_v38 }
 0x394   : > { %v3657_v62 = vmax.f32 %v3636_v25, 0.0 }
 0x399   : > { %v3637_v2 = vpop.f32.mrf.mxu2 }
 0x39a   : > { %v3638_v57 = vadd.f32 %v3637_v2, %v3589_v41  ;;  %v3591_v61 = vpop.f32.mrf.mxu1  ;;  %v3796_v41 = vld [vmem:[%s5391_s15 + $0x60] sm:$0xff] }
 0x39b   : > { %v3592_v39 = vadd.f32 %v3591_v61, %v3543_v53 }
 0x39c   : > { %v3658_v48 = vmax.f32 %v3638_v57, 0.0 }
 0x39e   : > { %v3667_v19 = vpack.c.bf16 %v3658_v48, %v3657_v62  ;;  %v3797_v48 = vld [vmem:[%s5391_s15 + $0x68] sm:$0xff] }
 0x3a0   : > { %3775 = vmatmul.bf16.gmra.mxu3 %v3667_v19 }
 0x3a1   : > { %v3640_v1 = vpop.f32.mrf.mxu2 }
 0x3a2   : > { %v3593_v6 = vpop.f32.mrf.mxu1  ;;  %v3641_v44 = vadd.f32 %v3640_v1, %v3592_v39 }
 0x3a3   : > { %v3594_v8 = vadd.f32 %v3593_v6, %v3545_v34 }
 0x3a4   : > { %v3659_v13 = vmax.f32 %v3641_v44, 0.0  ;;  %v3799_v44 = vld [vmem:[%s5391_s15 + $0x78] sm:$0xff] }
 0x3a9   : > { %v3642_v17 = vpop.f32.mrf.mxu2 }
 0x3aa   : > { %v3643_v54 = vadd.f32 %v3642_v17, %v3594_v8 }
 0x3ac   : > { %v3660_v15 = vmax.f32 %v3643_v54, 0.0 }
 0x3ae   : > { %v3668_v40 = vpack.c.bf16 %v3660_v15, %v3659_v13  ;;  %v3800_v15 = vld [vmem:[%s5391_s15 + $0x80] sm:$0xff] }
 0x3b0   : > { %3780 = vmatmul.bf16.gmra.mxu3 %v3668_v40 }
 0x3d3   : > { %v3751_v28 = vpop.f32.mrf.mxu3 }
 0x3d4   : > { %v3752_v24 = vadd.f32 %v5969_v58, %v3751_v28 }
 0x3d6   : > { %v3804_v49 = vadd.f32 %v3788_v29, %v3752_v24 }
 0x3d8   : > { %v3820_v18 = vmax.f32 %v3804_v49, 0.0  ;;  %v3801_v49 = vld [vmem:[%s5391_s15 + $0x88] sm:$0xff]  ;;  %s5123_s15 = scalar_lea.hbm %s6136_s12, 512 }
 0x3d9   : > { %p5125_p13 = scmp.lt.s32.totalorder %s5123_s15, %s5119_s5 }
 0x3da   : > { %3836 = vst [vmem:[%s5573_s29 + $0x10] sm:$0xff] %v3820_v18 }
 0x3db   : > { %v3753_v26 = vpop.f32.mrf.mxu3  ;;  %p5126_p0 = por %p5125_p13, %p5124_p12 }
 0x3dc   : > { %v3754_v35 = vadd.f32 %v5969_v58, %v3753_v26 }
 0x3dd   : > { %p5127_p5 = pnand %p5126_p0, %p5122_p11 }
 0x3de   : > { %v3805_v52 = vadd.f32 %v3789_v9, %v3754_v35 }
 0x3e0   : > { %v3821_v33 = vmax.f32 %v3805_v52, 0.0 }
 0x3e2   : > { %3837 = vst [vmem:[%s5573_s29 + $0x18] sm:$0xff] %v3821_v33 }
 0x3e3   : > { %v3756_v36 = vpop.f32.mrf.mxu3 }
 0x3e4   : > { %v3757_v42 = vadd.f32 %v5969_v58, %v3756_v36 }
 0x3e6   : > { %v3806_v3 = vadd.f32 %v3790_v4, %v3757_v42 }
 0x3e8   : > { %v3822_v47 = vmax.f32 %v3806_v3, 0.0 }
 0x3ea   : > { %3838 = vst [vmem:[%s5573_s29 + $0x20] sm:$0xff] %v3822_v47 }
 0x3eb   : > { %v3758_v56 = vpop.f32.mrf.mxu3 }
 0x3ec   : > { %v3759_v14 = vadd.f32 %v5969_v58, %v3758_v56 }
 0x3ee   : > { %v3807_v59 = vadd.f32 %v3791_v60, %v3759_v14 }
 0x3f0   : > { %v3823_v21 = vmax.f32 %v3807_v59, 0.0 }
 0x3f2   : > { %3839 = vst [vmem:[%s5573_s29 + $0x28] sm:$0xff] %v3823_v21 }
 0x3f3   : > { %v3761_v55 = vpop.f32.mrf.mxu3 }
 0x3f4   : > { %v3762_v50 = vadd.f32 %v5969_v58, %v3761_v55 }
 0x3f6   : > { %v3808_v11 = vadd.f32 %v3792_v0, %v3762_v50 }
 0x3f8   : > { %v3824_v23 = vmax.f32 %v3808_v11, 0.0 }
 0x3fa   : > { %3840 = vst [vmem:[%s5573_s29 + $0x30] sm:$0xff] %v3824_v23 }
 0x3fb   : > { %v3763_v51 = vpop.f32.mrf.mxu3 }
 0x3fc   : > { %v3764_v27 = vadd.f32 %v5969_v58, %v3763_v51 }
 0x3fe   : > { %v3809_v43 = vadd.f32 %v3793_v16, %v3764_v27 }
 0x400   : > { %v3825_v5 = vmax.f32 %v3809_v43, 0.0 }
 0x402   : > { %3841 = vst [vmem:[%s5573_s29 + $0x38] sm:$0xff] %v3825_v5 }
 0x403   : > { %v3766_v45 = vpop.f32.mrf.mxu3 }
 0x404   : > { %v3767_v30 = vadd.f32 %v5969_v58, %v3766_v45 }
 0x406   : > { %v3810_v32 = vadd.f32 %v3794_v22, %v3767_v30 }
 0x408   : > { %v3826_v12 = vmax.f32 %v3810_v32, 0.0 }
 0x40a   : > { %3842 = vst [vmem:[%s5573_s29 + $0x40] sm:$0xff] %v3826_v12 }
 0x40b   : > { %v3768_v37 = vpop.f32.mrf.mxu3 }
 0x40c   : > { %v3769_v63 = vadd.f32 %v5969_v58, %v3768_v37 }
 0x40e   : > { %v3811_v31 = vadd.f32 %v3795_v46, %v3769_v63 }
 0x410   : > { %v3827_v38 = vmax.f32 %v3811_v31, 0.0 }
 0x412   : > { %3843 = vst [vmem:[%s5573_s29 + $0x48] sm:$0xff] %v3827_v38 }
 0x413   : > { %v3771_v25 = vpop.f32.mrf.mxu3 }
 0x414   : > { %v3772_v2 = vadd.f32 %v5969_v58, %v3771_v25 }
 0x416   : > { %v3812_v57 = vadd.f32 %v3796_v41, %v3772_v2 }
 0x418   : > { %v3828_v61 = vmax.f32 %v3812_v57, 0.0 }
 0x41a   : > { %3844 = vst [vmem:[%s5573_s29 + $0x50] sm:$0xff] %v3828_v61 }
 0x41b   : > { %v3773_v62 = vpop.f32.mrf.mxu3 }
 0x41c   : > { %v3774_v19 = vadd.f32 %v5969_v58, %v3773_v62 }
 0x41e   : > { %v3813_v20 = vadd.f32 %v3797_v48, %v3774_v19 }
 0x420   : > { %v3829_v10 = vmax.f32 %v3813_v20, 0.0 }
 0x422   : > { %3845 = vst [vmem:[%s5573_s29 + $0x58] sm:$0xff] %v3829_v10 }
 0x423   : > { %v3776_v1 = vpop.f32.mrf.mxu3 }
 0x424   : > { %v3777_v53 = vadd.f32 %v5969_v58, %v3776_v1 }
 0x426   : > { %v3814_v6 = vadd.f32 %v3798_v7, %v3777_v53 }
 0x428   : > { %v3830_v39 = vmax.f32 %v3814_v6, 0.0 }
 0x42a   : > { %3846 = vst [vmem:[%s5573_s29 + $0x60] sm:$0xff] %v3830_v39 }
 0x42b   : > { %v3778_v34 = vpop.f32.mrf.mxu3 }
 0x42c   : > { %v3779_v8 = vadd.f32 %v5969_v58, %v3778_v34 }
 0x42e   : > { %v3815_v17 = vadd.f32 %v3799_v44, %v3779_v8 }
 0x430   : > { %v3831_v54 = vmax.f32 %v3815_v17, 0.0 }
 0x432   : > { %3847 = vst [vmem:[%s5573_s29 + $0x68] sm:$0xff] %v3831_v54 }
 0x433   : > { %v3781_v13 = vpop.f32.mrf.mxu3 }
 0x434   : > { %v3782_v40 = vadd.f32 %v5969_v58, %v3781_v13 }
 0x436   : > { %v3816_v28 = vadd.f32 %v3800_v15, %v3782_v40 }
 0x438   : > { %v3832_v29 = vmax.f32 %v3816_v28, 0.0 }
 0x43a   : > { %3848 = vst [vmem:[%s5573_s29 + $0x70] sm:$0xff] %v3832_v29 }
 0x43b   : > { %v3783_v24 = vpop.f32.mrf.mxu3 }
 0x43c   : > { %v3784_v18 = vadd.f32 %v5969_v58, %v3783_v24 }
 0x43e   : > { %v3817_v26 = vadd.f32 %v3801_v49, %v3784_v18 }
 0x440   : > { %v3833_v9 = vmax.f32 %v3817_v26, 0.0 }
 0x442   : > { %3849 = vst [vmem:[%s5573_s29 + $0x78] sm:$0xff] %v3833_v9 }
 0x443   : > { %5130 = shalt.err (!%p5127_p5)
}
 0x444   : > { %s5220_s14 = smov 128   ;;  %s5221_s29 = smov 8  }
 0x445   : > { %4877 = dma.vmem_to_hbm [thread:$0]  (%p5366_p3), %s3867_s27, 2048, %s3869_s28, %s3851_s9, %s5220_s14, %s5220_s14, %s5221_s29  }
 0x446 PF: > { %s6138_s13 = sld [smem:[#allocation19_spill]] }
 0x447   : > { %s6139_s18 = sld [smem:[#allocation17_spill]] }
 0x44c   : > { %p4904_p7 = scmp.ge.s32.totalorder %s6138_s13, 2 }
 0x44d   : > { %s3883_s1 = sand.u32 1, %s6139_s18  }
 0x44e   : > { %p4894_p9 = pnand %p4904_p7, %p5321_p6  ;;  %s3884_s21 = scalar_lea.sflag [#allocation6], %s3883_s1 }
 0x450   : > { %p4895_p10 = pneg %p4894_p9 }
 0x452   : > { %5176 = dma.done.wait (%p4895_p10), %s3884_s21, 2048  }
 0x453   : > { %5178 = vsyncadd (%p4895_p10), %s3884_s21, 4294965248  ;;  %s25_s8 = sadd.s32 1, %s6138_s13   ;;  %s6141_s27 = sld [smem:[#allocation18_spill]] }
 0x454   : > { %p22_p1 = scmp.ge.s32.totalorder %s25_s8, 6   ;;  %s6142_s29 = sld [smem:[#allocation21_spill]] }
 0x455   : > { %s6143_s3 = sld [smem:[#allocation23_spill]]  ;;  %s6144_s24 = smov %s5185_s25 }
 0x456   : > { %s6145_s25 = smov %s5189_s26  ;;  %s6146_s26 = smov %s5379_s22 }
 0x457   : > { %s6147_s28 = smov %s5205_s30  ;;  %24 = sbr.rel (!%p22_p1) target bundleno = 14 (0xe), region = 116 }
 0x45b   : > { %s6148_s30 = smov %s6143_s3 }
 0x45c   :  { %3890 = vsyncpa [#allocation5], 1 }
 0x45d   :  { %3892 = vsyncpa [#allocation5 + $0x1], 1 }
 0x45e   :  { %3893 = vsyncpa [#allocation8], 1 }
 0x45f   :  { %3894 = vsyncpa [#allocation11], 1 }
 0x460   :  { %3895 = vsyncpa [#allocation6], 1 }
 0x461   :  { %3897 = vsyncpa [#allocation6 + $0x1], 1 }

</bundles_post_ra>
